<compile_context>
chip_gen: v7x
topology: tpu7x:2x2x1
jax: 0.10.0
libtpu: 0.0.40
codegen_flags: <defaults>
</compile_context>

<pallas_src>
import functools

import jax
import jax.numpy as jnp
from jax.experimental import pallas as pl
from jax.experimental.pallas import tpu as pltpu


# ----------------------------------------------------------------------------
# helpers
# ----------------------------------------------------------------------------
def _round_up(x, m):
    return ((x + m - 1) // m) * m


def _choose_row_tile(rows, max_tile):
    """Row-tile size + count. Tiles are multiples of 16 (bf16 sublane packing);
    prefers an exact divisor of `rows`, otherwise cdiv + zero padding."""
    r16 = _round_up(rows, 16)
    if r16 <= max_tile:
        return r16, 1
    for t in range(max_tile, max(16, max_tile // 2) - 1, -16):
        if rows % t == 0:
            return t, rows // t
    return max_tile, pl.cdiv(rows, max_tile)


def _stack_heads_padded(out_w, out_b, oc_pad):
    """Stack (M+1) head weights (C, cn) into (M+1, C, oc_pad) with head m
    occupying columns [m*cn:(m+1)*cn]; heads write disjoint columns so adding
    the per-head dot results reproduces the block-diagonal matmul."""
    m1 = len(out_w)
    c, cn = out_w[0].shape
    w = jnp.zeros((m1, c, oc_pad), jnp.float32)
    b = jnp.zeros((1, oc_pad), jnp.float32)
    for m in range(m1):
        w = w.at[m, :, m * cn:(m + 1) * cn].set(out_w[m].astype(jnp.float32))
        b = b.at[0, m * cn:(m + 1) * cn].set(out_b[m].astype(jnp.float32))
    return w, b


# ----------------------------------------------------------------------------
# Kernel 1: fused encoder 1x1conv(+relu) -> up_sample 1x1conv(+folded BN bias)
#           two back-to-back dots per row tile; intermediate stays on-chip;
#           output stored as bf16 (big-slab bandwidth).
# ----------------------------------------------------------------------------
def _enc_up_kernel(x_ref, we_ref, be_ref, wu_ref, bu_ref, o_ref):
    h = jnp.dot(x_ref[...], we_ref[...], preferred_element_type=jnp.float32)
    h = jnp.maximum(h + be_ref[...], 0.0)
    y = jnp.dot(h, wu_ref[...], preferred_element_type=jnp.float32)
    o_ref[...] = (y + bu_ref[...]).astype(o_ref.dtype)


def enc_up_fused(x2d, we, be, wu_scaled, bu, max_tile=2048):
    """x2d: (P, Cin) f32 -> relu(x@we+be) @ wu_scaled + bu : (P, Cout) bf16."""
    P, Cin = x2d.shape
    Cmid = we.shape[1]
    Cout = wu_scaled.shape[1]
    tile = min(max_tile, _round_up(P, 16))
    grid_p = pl.cdiv(P, tile)
    Ppad = grid_p * tile
    xp = x2d if Ppad == P else jnp.pad(x2d, ((0, Ppad - P), (0, 0)))
    out = pl.pallas_call(
        _enc_up_kernel,
        out_shape=jax.ShapeDtypeStruct((Ppad, Cout), jnp.bfloat16),
        grid_spec=pltpu.PrefetchScalarGridSpec(
            num_scalar_prefetch=0,
            grid=(grid_p,),
            in_specs=[
                pl.BlockSpec((tile, Cin), lambda i: (i, 0)),
                pl.BlockSpec((Cin, Cmid), lambda i: (0, 0)),
                pl.BlockSpec((1, Cmid), lambda i: (0, 0)),
                pl.BlockSpec((Cmid, Cout), lambda i: (0, 0)),
                pl.BlockSpec((1, Cout), lambda i: (0, 0)),
            ],
            out_specs=pl.BlockSpec((tile, Cout), lambda i: (i, 0)),
        ),
        compiler_params=pltpu.CompilerParams(dimension_semantics=("parallel",)),
    )(xp,
      we.astype(jnp.float32),
      be.reshape(1, Cmid).astype(jnp.float32),
      wu_scaled.astype(jnp.float32),
      bu.reshape(1, Cout).astype(jnp.float32))
    return out if Ppad == P else out[:P]


# ----------------------------------------------------------------------------
# Kernel 2: attention-weighted fusion + ALL (M+1) output heads.
#   fuse = sum_m att_m * feas_m     (never written to HBM)
#   out[:, m*cn:(m+1)*cn] = feas_m @ W_m + b_m ;  last head uses `fuse`.
#   Heads write disjoint columns of a 128-lane-padded output, so the
#   zero-padded per-head dots are simply added (f32 accumulate).
# ----------------------------------------------------------------------------
def _fuse_heads_kernel(*args, M):
    att_ref = args[0]                      # (1, M, C) f32
    f_refs = args[1:1 + M]                 # each (1, thw, C) bf16
    w_ref, b_ref, o_ref = args[1 + M:]
    a = att_ref[...]                       # (1, M, C) f32
    total = None
    fuse32 = None
    for m in range(M):
        fm = f_refs[m][0]                                            # (thw, C) bf16
        ym = jnp.dot(fm, w_ref[m], preferred_element_type=jnp.float32)
        total = ym if total is None else total + ym
        cm = a[:, m, :] * fm.astype(jnp.float32)                     # f32 elementwise
        fuse32 = cm if fuse32 is None else fuse32 + cm
    yf = jnp.dot(fuse32.astype(w_ref.dtype), w_ref[M],
                 preferred_element_type=jnp.float32)
    o_ref[...] = (total + yf + b_ref[...])[None]


def sk_fuse_heads(feas, att, w_heads, b_pad, max_tile=4096):
    """feas: list of M (N, HW, C) bf16; att: (N, M, C) f32;
    w_heads: (M+1, C, OCpad); returns (N, HW, OCpad) f32 (pad cols are zero)."""
    M = len(feas)
    N, HW, C = feas[0].shape
    OCp = w_heads.shape[2]
    thw, n_t = _choose_row_tile(HW, max_tile)
    HWp = thw * n_t
    if HWp != HW:  # zero padding is safe: padded rows are sliced off below
        feas = [jnp.pad(f, ((0, 0), (0, HWp - HW), (0, 0))) for f in feas]
    kern = functools.partial(_fuse_heads_kernel, M=M)
    in_specs = [pl.BlockSpec((1, M, C), lambda n, t: (n, 0, 0))]
    in_specs += [pl.BlockSpec((1, thw, C), lambda n, t: (n, t, 0)) for _ in range(M)]
    in_specs += [
        pl.BlockSpec((M + 1, C, OCp), lambda n, t: (0, 0, 0)),
        pl.BlockSpec((1, OCp), lambda n, t: (0, 0)),
    ]
    out = pl.pallas_call(
        kern,
        out_shape=jax.ShapeDtypeStruct((N, HWp, OCp), jnp.float32),
        grid_spec=pltpu.PrefetchScalarGridSpec(
            num_scalar_prefetch=0,
            grid=(N, n_t),
            in_specs=in_specs,
            out_specs=pl.BlockSpec((1, thw, OCp), lambda n, t: (n, t, 0)),
        ),
        compiler_params=pltpu.CompilerParams(
            dimension_semantics=("parallel", "parallel"),
            vmem_limit_bytes=32 * 1024 * 1024),
    )(att,
      *feas,
      w_heads.astype(jnp.bfloat16), b_pad.astype(jnp.float32))
    return out[:, :HW] if HWp != HW else out


# ----------------------------------------------------------------------------
# Plain-JAX glue (tiny / O(small) pieces, per perf review)
# ----------------------------------------------------------------------------
def avg_pool_nhwc(x, k):
    if k == 1:
        return x
    N, H, W, C = x.shape
    return x.reshape(N, H // k, k, W // k, k, C).mean(axis=(2, 4))


def _interp_matrix(n_in, n_out):
    """Bilinear align_corners=True 1-D interpolation matrix (n_out, n_in)."""
    if n_in == 1:
        return jnp.ones((n_out, 1), jnp.float32)
    pos = jnp.arange(n_out, dtype=jnp.float32) * (n_in - 1) / (n_out - 1)
    lo = jnp.floor(pos).astype(jnp.int32)
    hi = jnp.minimum(lo + 1, n_in - 1)
    w = pos - lo.astype(jnp.float32)
    m = jnp.zeros((n_out, n_in), jnp.float32)
    m = m.at[jnp.arange(n_out), lo].add(1.0 - w)
    m = m.at[jnp.arange(n_out), hi].add(w)
    return m


def _pool_weights(n_in, n_out):
    """Weights w s.t. mean over the bilinearly-upsampled (align_corners=True)
    axis equals sum_h w[h] * x[h]:  w = colsum(interp_matrix) / n_out."""
    return jnp.sum(_interp_matrix(n_in, n_out), axis=0) / float(n_out)


def upsample_bilinear_ac(x, scale):
    """nn.UpsamplingBilinear2d(scale_factor=scale), NHWC, bf16 intermediates.
    Two interp-matrix contractions with f32 accumulation.
    TODO(synk): fold the interp contractions into the Pallas pipeline so the
    full-resolution slabs never round-trip HBM before the fuse kernel."""
    if scale == 1:
        return x
    N, H, W, C = x.shape
    Ah = _interp_matrix(H, H * scale).astype(x.dtype)      # (Ho, H)
    Aw = _interp_matrix(W, W * scale).astype(x.dtype)      # (Wo, W)
    y = jnp.einsum('ph,nhwc->npwc', Ah, x,
                   preferred_element_type=jnp.float32).astype(x.dtype)
    y = jnp.einsum('qw,npwc->npqc', Aw, y,
                   preferred_element_type=jnp.float32).astype(x.dtype)
    return y


def sk_attention_from_pool(fea_s, fc_w, fc_b, fcs_w, fcs_b):
    """SKConv attention from the (closed-form) pooled feature:
    fc+relu -> M fcs -> softmax over M.  O(N*C*d): plain JAX per review."""
    fea_z = jnp.maximum(fea_s @ fc_w + fc_b[None, :], 0.0)          # (N, d)
    logits = jnp.einsum('nd,mdc->nmc', fea_z, fcs_w) + fcs_b[None]  # (N, M, C)
    return jax.nn.softmax(logits, axis=1)


# ----------------------------------------------------------------------------
# Model: parameters + forward
# ----------------------------------------------------------------------------
def init_params(key, in_ch, channel_list, pred_channel, class_num, d):
    ks = iter(jax.random.split(key, 64))
    p = {}
    M = len(channel_list)
    # TODO(synk): getencoder(cfg) backbone is external; synthetic encoder =
    # avg-pool downsample + 1x1 conv (+relu) per scale (channel mixing in Pallas).
    p["enc_w"] = [0.1 * jax.random.normal(next(ks), (in_ch, c)) for c in channel_list]
    p["enc_b"] = [0.01 * jax.random.normal(next(ks), (c,)) for c in channel_list]
    # up_samples[i]: Conv2d(c_i, pred, 1, bias=False) + BatchNorm2d (eval mode, folded).
    up_w = [0.1 * jax.random.normal(next(ks), (c, pred_channel)) for c in channel_list]
    bn_gamma = [1.0 + 0.05 * jax.random.normal(next(ks), (pred_channel,)) for _ in channel_list]
    bn_beta = [0.05 * jax.random.normal(next(ks), (pred_channel,)) for _ in channel_list]
    bn_mean = [0.05 * jax.random.normal(next(ks), (pred_channel,)) for _ in channel_list]
    bn_var = [1.0 + 0.1 * jax.random.uniform(next(ks), (pred_channel,)) for _ in channel_list]
    eps = 1e-5
    up_scale = [g / jnp.sqrt(v + eps) for g, v in zip(bn_gamma, bn_var)]
    p["up_w_scaled"] = [w * s[None, :] for w, s in zip(up_w, up_scale)]
    p["up_bias"] = [b - m * s for b, m, s in zip(bn_beta, bn_mean, up_scale)]
    # SKConv(pred_channel, M, L): fc (pred->d)+relu, M fcs (d->pred), softmax over M.
    p["sk_fc_w"] = 0.1 * jax.random.normal(next(ks), (pred_channel, d))
    p["sk_fc_b"] = 0.01 * jax.random.normal(next(ks), (d,))
    p["sk_fcs_w"] = 0.1 * jax.random.normal(next(ks), (M, d, pred_channel))
    p["sk_fcs_b"] = 0.01 * jax.random.normal(next(ks), (M, pred_channel))
    # outLayers: M+1 heads, 1x1 conv pred_channel -> class_num; stacked into a
    # 128-lane-padded disjoint-column form for the fused heads kernel.
    # TODO(synk): `outlayer` ctor is caller-supplied; modeled as Conv2d(pred, class_num, 1).
    out_w = [0.1 * jax.random.normal(next(ks), (pred_channel, class_num)) for _ in range(M + 1)]
    out_b = [0.01 * jax.random.normal(next(ks), (class_num,)) for _ in range(M + 1)]
    oc_pad = max(128, _round_up((M + 1) * class_num, 128))
    p["out_w_heads"], p["out_b_pad"] = _stack_heads_padded(out_w, out_b, oc_pad)
    return p


def forward(params, x_nchw, *, channel_list, pred_channel, class_num):
    x = jnp.transpose(x_nchw, (0, 2, 3, 1)).astype(jnp.float32)   # NCHW -> NHWC
    N, H, W, Cin = x.shape
    M = len(channel_list)

    # --- synthetic encoder + up_samples (fused enc-conv+relu -> up-conv+BN) ---
    feas = []          # full-res (N, HW, pred) slabs in bf16
    fea_s = None       # (N, pred) f32: SK global pool, closed form from small maps
    for i, _c in enumerate(channel_list):
        s = 2 ** i
        xi = avg_pool_nhwc(x, s)                                   # (N, Hi, Wi, Cin)
        _, Hi, Wi, _ = xi.shape
        f_small = enc_up_fused(xi.reshape(N * Hi * Wi, Cin),
                               params["enc_w"][i], params["enc_b"][i],
                               params["up_w_scaled"][i], params["up_bias"][i])
        f_small = f_small.reshape(N, Hi, Wi, pred_channel)         # bf16
        # mean over the (bilinearly upsampled) full-res map == weighted sum of
        # the small map (linear functional) -> no full-resolution read needed.
        wh = _pool_weights(Hi, H)
        ww = _pool_weights(Wi, W)
        ps = jnp.einsum('nhwc,h,w->nc', f_small.astype(jnp.float32), wh, ww)
        fea_s = ps if fea_s is None else fea_s + ps
        f_full = upsample_bilinear_ac(f_small, s)                  # (N, H, W, pred) bf16
        feas.append(f_full.reshape(N, H * W, pred_channel))

    # --- SKConv attention (tiny: fc + fcs + softmax in plain JAX) ---
    att = sk_attention_from_pool(fea_s, params["sk_fc_w"], params["sk_fc_b"],
                                 params["sk_fcs_w"], params["sk_fcs_b"])  # (N, M, C) f32

    # --- fusion + all output heads (one kernel, 128-lane-dense output) ---
    out_cat = sk_fuse_heads(feas, att, params["out_w_heads"], params["out_b_pad"])

    outs = []
    for i in range(M + 1):
        o = out_cat[..., i * class_num:(i + 1) * class_num].reshape(N, H, W, class_num)
        outs.append(jnp.transpose(o, (0, 3, 1, 2)))                # back to NCHW
    return outs


if __name__ == "__main__":
    # Small shapes consistent with the module.
    N, Cin, H, W = 2, 4, 16, 16
    channel_list = [8, 16, 32]          # encoder channels per scale (fine -> coarse)
    pred_channel = 32
    class_num = 3
    L = 8
    d = max(pred_channel // 4, L)       # SKConv bottleneck dim

    key = jax.random.PRNGKey(0)
    kp, kx = jax.random.split(key)
    params = init_params(kp, Cin, channel_list, pred_channel, class_num, d)
    x = jax.random.normal(kx, (N, Cin, H, W), dtype=jnp.float32)

    fwd = jax.jit(functools.partial(forward, channel_list=channel_list,
                                    pred_channel=pred_channel, class_num=class_num))
    outs = fwd(params, x)
    outs = [jax.block_until_ready(o) for o in outs]

    assert len(outs) == len(channel_list) + 1
    for o in outs:
        assert o.shape == (N, class_num, H, W), o.shape
        assert bool(jnp.all(jnp.isfinite(o)))
    print("KERNEL_OK")
</pallas_src>

<mosaic_0001>
module attributes {stable_mosaic.version = 11 : i64} {
  func.func private @main(%arg0: i32) attributes {dimension_semantics = [#tpu.dimension_semantics<core_parallel>], iteration_bounds = array<i64: 2>, tpu.core_type = #tpu.core_type<sc_scalar_subcore>, window_params = []} {
    return
  }
}

module attributes {stable_mosaic.version = 11 : i64} {
  func.func private @main(%arg0: i32) attributes {dimension_semantics = [#tpu.dimension_semantics<core_parallel>], iteration_bounds = array<i64: 2>, tpu.core_type = #tpu.core_type<sc_scalar_subcore>, window_params = []} {
    return
  }
}

module attributes {stable_mosaic.version = 11 : i64} {
  func.func @_enc_up_kernel(%arg0: i32, %arg1: memref<512x4xf32, #tpu.memory_space<vmem>>, %arg2: memref<4x8xf32, #tpu.memory_space<vmem>>, %arg3: memref<1x8xf32, #tpu.memory_space<vmem>>, %arg4: memref<8x32xf32, #tpu.memory_space<vmem>>, %arg5: memref<1x32xf32, #tpu.memory_space<vmem>>, %arg6: memref<512x32xbf16, #tpu.memory_space<vmem>>) attributes {dimension_semantics = [#tpu.dimension_semantics<parallel>], iteration_bounds = array<i64: 1>, scalar_prefetch = 0 : i64, scratch_operands = 0 : i64, tpu.core_type = #tpu.core_type<tc>, window_params = [{transform_indices = @transform_0, window_bounds = array<i64: 512, 4>}, {pipeline_mode = #tpu.pipeline_mode<synchronous>, transform_indices = @transform_1, window_bounds = array<i64: 4, 8>}, {pipeline_mode = #tpu.pipeline_mode<synchronous>, transform_indices = @transform_2, window_bounds = array<i64: 1, 8>}, {pipeline_mode = #tpu.pipeline_mode<synchronous>, transform_indices = @transform_3, window_bounds = array<i64: 8, 32>}, {pipeline_mode = #tpu.pipeline_mode<synchronous>, transform_indices = @transform_4, window_bounds = array<i64: 1, 32>}, {transform_indices = @transform_5, window_bounds = array<i64: 512, 32>}]} {
    %c0 = arith.constant 0 : index
    %c0_0 = arith.constant 0 : index
    %0 = vector.load %arg1[%c0, %c0_0] : memref<512x4xf32, #tpu.memory_space<vmem>>, vector<512x4xf32>
    %c0_1 = arith.constant 0 : index
    %c0_2 = arith.constant 0 : index
    %1 = vector.load %arg2[%c0_1, %c0_2] : memref<4x8xf32, #tpu.memory_space<vmem>>, vector<4x8xf32>
    %cst = arith.constant dense<0.000000e+00> : vector<512x8xf32>
    %2 = tpu.matmul %0, %1, %cst {dimension_numbers = #tpu.dot_dimension_numbers<[1], [0], [0], [1], [0, 0, 1, 1], [], []>} : vector<512x4xf32>, vector<4x8xf32>, vector<512x8xf32> -> vector<512x8xf32>
    %c0_3 = arith.constant 0 : index
    %c0_4 = arith.constant 0 : index
    %3 = vector.load %arg3[%c0_3, %c0_4] : memref<1x8xf32, #tpu.memory_space<vmem>>, vector<1x8xf32>
    %4 = vector.broadcast %3 : vector<1x8xf32> to vector<512x8xf32>
    %5 = arith.addf %2, %4 : vector<512x8xf32>
    %cst_5 = arith.constant 0.000000e+00 : f32
    %6 = vector.broadcast %cst_5 : f32 to vector<512x8xf32>
    %7 = arith.maximumf %5, %6 : vector<512x8xf32>
    %c0_6 = arith.constant 0 : index
    %c0_7 = arith.constant 0 : index
    %8 = vector.load %arg4[%c0_6, %c0_7] : memref<8x32xf32, #tpu.memory_space<vmem>>, vector<8x32xf32>
    %cst_8 = arith.constant dense<0.000000e+00> : vector<512x32xf32>
    %9 = tpu.matmul %7, %8, %cst_8 {dimension_numbers = #tpu.dot_dimension_numbers<[1], [0], [0], [1], [0, 0, 1, 1], [], []>} : vector<512x8xf32>, vector<8x32xf32>, vector<512x32xf32> -> vector<512x32xf32>
    %c0_9 = arith.constant 0 : index
    %c0_10 = arith.constant 0 : index
    %10 = vector.load %arg5[%c0_9, %c0_10] : memref<1x32xf32, #tpu.memory_space<vmem>>, vector<1x32xf32>
    %11 = vector.broadcast %10 : vector<1x32xf32> to vector<512x32xf32>
    %12 = arith.addf %9, %11 : vector<512x32xf32>
    %13 = arith.truncf %12 : vector<512x32xf32> to vector<512x32xbf16>
    %c0_11 = arith.constant 0 : index
    %c0_12 = arith.constant 0 : index
    %14 = vector.load %arg6[%c0_11, %c0_12] : memref<512x32xbf16, #tpu.memory_space<vmem>>, vector<512x32xbf16>
    tpu.vector_store %arg6[%c0_11, %c0_12], %13 {strides = array<i32>} : memref<512x32xbf16, #tpu.memory_space<vmem>>, vector<512x32xbf16>,
    return
  }
  func.func @transform_0(%arg0: i32) -> (i32, i32) {
    %c0_i32 = arith.constant 0 : i32
    %c0_i32_0 = arith.constant 0 : i32
    return %arg0, %c0_i32 : i32, i32
  }
  func.func @transform_1(%arg0: i32) -> (i32, i32) {
    %c0_i32 = arith.constant 0 : i32
    %c0_i32_0 = arith.constant 0 : i32
    %c0_i32_1 = arith.constant 0 : i32
    return %c0_i32, %c0_i32_0 : i32, i32
  }
  func.func @transform_2(%arg0: i32) -> (i32, i32) {
    %c0_i32 = arith.constant 0 : i32
    %c0_i32_0 = arith.constant 0 : i32
    %c0_i32_1 = arith.constant 0 : i32
    return %c0_i32, %c0_i32_0 : i32, i32
  }
  func.func @transform_3(%arg0: i32) -> (i32, i32) {
    %c0_i32 = arith.constant 0 : i32
    %c0_i32_0 = arith.constant 0 : i32
    %c0_i32_1 = arith.constant 0 : i32
    return %c0_i32, %c0_i32_0 : i32, i32
  }
  func.func @transform_4(%arg0: i32) -> (i32, i32) {
    %c0_i32 = arith.constant 0 : i32
    %c0_i32_0 = arith.constant 0 : i32
    %c0_i32_1 = arith.constant 0 : i32
    return %c0_i32, %c0_i32_0 : i32, i32
  }
  func.func @transform_5(%arg0: i32) -> (i32, i32) {
    %c0_i32 = arith.constant 0 : i32
    %c0_i32_0 = arith.constant 0 : i32
    return %arg0, %c0_i32 : i32, i32
  }
}

module attributes {stable_mosaic.version = 11 : i64} {
  func.func @_enc_up_kernel(%arg0: i32, %arg1: memref<128x4xf32, #tpu.memory_space<vmem>>, %arg2: memref<4x16xf32, #tpu.memory_space<vmem>>, %arg3: memref<1x16xf32, #tpu.memory_space<vmem>>, %arg4: memref<16x32xf32, #tpu.memory_space<vmem>>, %arg5: memref<1x32xf32, #tpu.memory_space<vmem>>, %arg6: memref<128x32xbf16, #tpu.memory_space<vmem>>) attributes {dimension_semantics = [#tpu.dimension_semantics<parallel>], iteration_bounds = array<i64: 1>, scalar_prefetch = 0 : i64, scratch_operands = 0 : i64, tpu.core_type = #tpu.core_type<tc>, window_params = [{transform_indices = @transform_0, window_bounds = array<i64: 128, 4>}, {pipeline_mode = #tpu.pipeline_mode<synchronous>, transform_indices = @transform_1, window_bounds = array<i64: 4, 16>}, {pipeline_mode = #tpu.pipeline_mode<synchronous>, transform_indices = @transform_2, window_bounds = array<i64: 1, 16>}, {pipeline_mode = #tpu.pipeline_mode<synchronous>, transform_indices = @transform_3, window_bounds = array<i64: 16, 32>}, {pipeline_mode = #tpu.pipeline_mode<synchronous>, transform_indices = @transform_4, window_bounds = array<i64: 1, 32>}, {transform_indices = @transform_5, window_bounds = array<i64: 128, 32>}]} {
    %c0 = arith.constant 0 : index
    %c0_0 = arith.constant 0 : index
    %0 = vector.load %arg1[%c0, %c0_0] : memref<128x4xf32, #tpu.memory_space<vmem>>, vector<128x4xf32>
    %c0_1 = arith.constant 0 : index
    %c0_2 = arith.constant 0 : index
    %1 = vector.load %arg2[%c0_1, %c0_2] : memref<4x16xf32, #tpu.memory_space<vmem>>, vector<4x16xf32>
    %cst = arith.constant dense<0.000000e+00> : vector<128x16xf32>
    %2 = tpu.matmul %0, %1, %cst {dimension_numbers = #tpu.dot_dimension_numbers<[1], [0], [0], [1], [0, 0, 1, 1], [], []>} : vector<128x4xf32>, vector<4x16xf32>, vector<128x16xf32> -> vector<128x16xf32>
    %c0_3 = arith.constant 0 : index
    %c0_4 = arith.constant 0 : index
    %3 = vector.load %arg3[%c0_3, %c0_4] : memref<1x16xf32, #tpu.memory_space<vmem>>, vector<1x16xf32>
    %4 = vector.broadcast %3 : vector<1x16xf32> to vector<128x16xf32>
    %5 = arith.addf %2, %4 : vector<128x16xf32>
    %cst_5 = arith.constant 0.000000e+00 : f32
    %6 = vector.broadcast %cst_5 : f32 to vector<128x16xf32>
    %7 = arith.maximumf %5, %6 : vector<128x16xf32>
    %c0_6 = arith.constant 0 : index
    %c0_7 = arith.constant 0 : index
    %8 = vector.load %arg4[%c0_6, %c0_7] : memref<16x32xf32, #tpu.memory_space<vmem>>, vector<16x32xf32>
    %cst_8 = arith.constant dense<0.000000e+00> : vector<128x32xf32>
    %9 = tpu.matmul %7, %8, %cst_8 {dimension_numbers = #tpu.dot_dimension_numbers<[1], [0], [0], [1], [0, 0, 1, 1], [], []>} : vector<128x16xf32>, vector<16x32xf32>, vector<128x32xf32> -> vector<128x32xf32>
    %c0_9 = arith.constant 0 : index
    %c0_10 = arith.constant 0 : index
    %10 = vector.load %arg5[%c0_9, %c0_10] : memref<1x32xf32, #tpu.memory_space<vmem>>, vector<1x32xf32>
    %11 = vector.broadcast %10 : vector<1x32xf32> to vector<128x32xf32>
    %12 = arith.addf %9, %11 : vector<128x32xf32>
    %13 = arith.truncf %12 : vector<128x32xf32> to vector<128x32xbf16>
    %c0_11 = arith.constant 0 : index
    %c0_12 = arith.constant 0 : index
    %14 = vector.load %arg6[%c0_11, %c0_12] : memref<128x32xbf16, #tpu.memory_space<vmem>>, vector<128x32xbf16>
    tpu.vector_store %arg6[%c0_11, %c0_12], %13 {strides = array<i32>} : memref<128x32xbf16, #tpu.memory_space<vmem>>, vector<128x32xbf16>,
    return
  }
  func.func @transform_0(%arg0: i32) -> (i32, i32) {
    %c0_i32 = arith.constant 0 : i32
    %c0_i32_0 = arith.constant 0 : i32
    return %arg0, %c0_i32 : i32, i32
  }
  func.func @transform_1(%arg0: i32) -> (i32, i32) {
    %c0_i32 = arith.constant 0 : i32
    %c0_i32_0 = arith.constant 0 : i32
    %c0_i32_1 = arith.constant 0 : i32
    return %c0_i32, %c0_i32_0 : i32, i32
  }
  func.func @transform_2(%arg0: i32) -> (i32, i32) {
    %c0_i32 = arith.constant 0 : i32
    %c0_i32_0 = arith.constant 0 : i32
    %c0_i32_1 = arith.constant 0 : i32
    return %c0_i32, %c0_i32_0 : i32, i32
  }
  func.func @transform_3(%arg0: i32) -> (i32, i32) {
    %c0_i32 = arith.constant 0 : i32
    %c0_i32_0 = arith.constant 0 : i32
    %c0_i32_1 = arith.constant 0 : i32
    return %c0_i32, %c0_i32_0 : i32, i32
  }
  func.func @transform_4(%arg0: i32) -> (i32, i32) {
    %c0_i32 = arith.constant 0 : i32
    %c0_i32_0 = arith.constant 0 : i32
    %c0_i32_1 = arith.constant 0 : i32
    return %c0_i32, %c0_i32_0 : i32, i32
  }
  func.func @transform_5(%arg0: i32) -> (i32, i32) {
    %c0_i32 = arith.constant 0 : i32
    %c0_i32_0 = arith.constant 0 : i32
    return %arg0, %c0_i32 : i32, i32
  }
}

module attributes {stable_mosaic.version = 11 : i64} {
  func.func @_enc_up_kernel(%arg0: i32, %arg1: memref<32x4xf32, #tpu.memory_space<vmem>>, %arg2: memref<4x32xf32, #tpu.memory_space<vmem>>, %arg3: memref<1x32xf32, #tpu.memory_space<vmem>>, %arg4: memref<32x32xf32, #tpu.memory_space<vmem>>, %arg5: memref<1x32xf32, #tpu.memory_space<vmem>>, %arg6: memref<32x32xbf16, #tpu.memory_space<vmem>>) attributes {dimension_semantics = [#tpu.dimension_semantics<parallel>], iteration_bounds = array<i64: 1>, scalar_prefetch = 0 : i64, scratch_operands = 0 : i64, tpu.core_type = #tpu.core_type<tc>, window_params = [{transform_indices = @transform_0, window_bounds = array<i64: 32, 4>}, {pipeline_mode = #tpu.pipeline_mode<synchronous>, transform_indices = @transform_1, window_bounds = array<i64: 4, 32>}, {pipeline_mode = #tpu.pipeline_mode<synchronous>, transform_indices = @transform_2, window_bounds = array<i64: 1, 32>}, {pipeline_mode = #tpu.pipeline_mode<synchronous>, transform_indices = @transform_3, window_bounds = array<i64: 32, 32>}, {pipeline_mode = #tpu.pipeline_mode<synchronous>, transform_indices = @transform_4, window_bounds = array<i64: 1, 32>}, {transform_indices = @transform_5, window_bounds = array<i64: 32, 32>}]} {
    %c0 = arith.constant 0 : index
    %c0_0 = arith.constant 0 : index
    %0 = vector.load %arg1[%c0, %c0_0] : memref<32x4xf32, #tpu.memory_space<vmem>>, vector<32x4xf32>
    %c0_1 = arith.constant 0 : index
    %c0_2 = arith.constant 0 : index
    %1 = vector.load %arg2[%c0_1, %c0_2] : memref<4x32xf32, #tpu.memory_space<vmem>>, vector<4x32xf32>
    %cst = arith.constant dense<0.000000e+00> : vector<32x32xf32>
    %2 = tpu.matmul %0, %1, %cst {dimension_numbers = #tpu.dot_dimension_numbers<[1], [0], [0], [1], [0, 0, 1, 1], [], []>} : vector<32x4xf32>, vector<4x32xf32>, vector<32x32xf32> -> vector<32x32xf32>
    %c0_3 = arith.constant 0 : index
    %c0_4 = arith.constant 0 : index
    %3 = vector.load %arg3[%c0_3, %c0_4] : memref<1x32xf32, #tpu.memory_space<vmem>>, vector<1x32xf32>
    %4 = vector.broadcast %3 : vector<1x32xf32> to vector<32x32xf32>
    %5 = arith.addf %2, %4 : vector<32x32xf32>
    %cst_5 = arith.constant 0.000000e+00 : f32
    %6 = vector.broadcast %cst_5 : f32 to vector<32x32xf32>
    %7 = arith.maximumf %5, %6 : vector<32x32xf32>
    %c0_6 = arith.constant 0 : index
    %c0_7 = arith.constant 0 : index
    %8 = vector.load %arg4[%c0_6, %c0_7] : memref<32x32xf32, #tpu.memory_space<vmem>>, vector<32x32xf32>
    %cst_8 = arith.constant dense<0.000000e+00> : vector<32x32xf32>
    %9 = tpu.matmul %7, %8, %cst_8 {dimension_numbers = #tpu.dot_dimension_numbers<[1], [0], [0], [1], [0, 0, 1, 1], [], []>} : vector<32x32xf32>, vector<32x32xf32>, vector<32x32xf32> -> vector<32x32xf32>
    %c0_9 = arith.constant 0 : index
    %c0_10 = arith.constant 0 : index
    %10 = vector.load %arg5[%c0_9, %c0_10] : memref<1x32xf32, #tpu.memory_space<vmem>>, vector<1x32xf32>
    %11 = vector.broadcast %10 : vector<1x32xf32> to vector<32x32xf32>
    %12 = arith.addf %9, %11 : vector<32x32xf32>
    %13 = arith.truncf %12 : vector<32x32xf32> to vector<32x32xbf16>
    %c0_11 = arith.constant 0 : index
    %c0_12 = arith.constant 0 : index
    %14 = vector.load %arg6[%c0_11, %c0_12] : memref<32x32xbf16, #tpu.memory_space<vmem>>, vector<32x32xbf16>
    tpu.vector_store %arg6[%c0_11, %c0_12], %13 {strides = array<i32>} : memref<32x32xbf16, #tpu.memory_space<vmem>>, vector<32x32xbf16>,
    return
  }
  func.func @transform_0(%arg0: i32) -> (i32, i32) {
    %c0_i32 = arith.constant 0 : i32
    %c0_i32_0 = arith.constant 0 : i32
    return %arg0, %c0_i32 : i32, i32
  }
  func.func @transform_1(%arg0: i32) -> (i32, i32) {
    %c0_i32 = arith.constant 0 : i32
    %c0_i32_0 = arith.constant 0 : i32
    %c0_i32_1 = arith.constant 0 : i32
    return %c0_i32, %c0_i32_0 : i32, i32
  }
  func.func @transform_2(%arg0: i32) -> (i32, i32) {
    %c0_i32 = arith.constant 0 : i32
    %c0_i32_0 = arith.constant 0 : i32
    %c0_i32_1 = arith.constant 0 : i32
    return %c0_i32, %c0_i32_0 : i32, i32
  }
  func.func @transform_3(%arg0: i32) -> (i32, i32) {
    %c0_i32 = arith.constant 0 : i32
    %c0_i32_0 = arith.constant 0 : i32
    %c0_i32_1 = arith.constant 0 : i32
    return %c0_i32, %c0_i32_0 : i32, i32
  }
  func.func @transform_4(%arg0: i32) -> (i32, i32) {
    %c0_i32 = arith.constant 0 : i32
    %c0_i32_0 = arith.constant 0 : i32
    %c0_i32_1 = arith.constant 0 : i32
    return %c0_i32, %c0_i32_0 : i32, i32
  }
  func.func @transform_5(%arg0: i32) -> (i32, i32) {
    %c0_i32 = arith.constant 0 : i32
    %c0_i32_0 = arith.constant 0 : i32
    return %arg0, %c0_i32 : i32, i32
  }
}

module attributes {stable_mosaic.version = 11 : i64} {
  func.func @_fuse_heads_kernel(%arg0: i32, %arg1: i32, %arg2: memref<1x3x32xf32, #tpu.memory_space<vmem>>, %arg3: memref<1x256x32xbf16, #tpu.memory_space<vmem>>, %arg4: memref<1x256x32xbf16, #tpu.memory_space<vmem>>, %arg5: memref<1x256x32xbf16, #tpu.memory_space<vmem>>, %arg6: memref<4x32x128xbf16, #tpu.memory_space<vmem>>, %arg7: memref<1x128xf32, #tpu.memory_space<vmem>>, %arg8: memref<1x256x128xf32, #tpu.memory_space<vmem>>) attributes {dimension_semantics = [#tpu.dimension_semantics<parallel>, #tpu.dimension_semantics<parallel>], iteration_bounds = array<i64: 2, 1>, scalar_prefetch = 0 : i64, scratch_operands = 0 : i64, tpu.core_type = #tpu.core_type<tc>, window_params = [{transform_indices = @transform_0, window_bounds = array<i64: 1, 3, 32>}, {transform_indices = @transform_1, window_bounds = array<i64: 1, 256, 32>}, {transform_indices = @transform_2, window_bounds = array<i64: 1, 256, 32>}, {transform_indices = @transform_3, window_bounds = array<i64: 1, 256, 32>}, {pipeline_mode = #tpu.pipeline_mode<synchronous>, transform_indices = @transform_4, window_bounds = array<i64: 4, 32, 128>}, {pipeline_mode = #tpu.pipeline_mode<synchronous>, transform_indices = @transform_5, window_bounds = array<i64: 1, 128>}, {transform_indices = @transform_6, window_bounds = array<i64: 1, 256, 128>}]} {
    %c0 = arith.constant 0 : index
    %c0_0 = arith.constant 0 : index
    %c0_1 = arith.constant 0 : index
    %0 = vector.load %arg2[%c0, %c0_0, %c0_1] : memref<1x3x32xf32, #tpu.memory_space<vmem>>, vector<1x3x32xf32>
    %c0_2 = arith.constant 0 : index
    %c0_3 = arith.constant 0 : index
    %c0_4 = arith.constant 0 : index
    %1 = vector.load %arg3[%c0_2, %c0_3, %c0_4] : memref<1x256x32xbf16, #tpu.memory_space<vmem>>, vector<1x256x32xbf16>
    %2 = vector.shape_cast %1 : vector<1x256x32xbf16> to vector<256x32xbf16>
    %c0_5 = arith.constant 0 : index
    %c0_6 = arith.constant 0 : index
    %c0_7 = arith.constant 0 : index
    %3 = vector.load %arg6[%c0_5, %c0_6, %c0_7] : memref<4x32x128xbf16, #tpu.memory_space<vmem>>, vector<1x32x128xbf16>
    %4 = vector.shape_cast %3 : vector<1x32x128xbf16> to vector<32x128xbf16>
    %cst = arith.constant dense<0.000000e+00> : vector<256x128xf32>
    %5 = tpu.matmul %2, %4, %cst {dimension_numbers = #tpu.dot_dimension_numbers<[1], [0], [0], [1], [0, 0, 1, 1], [], []>} : vector<256x32xbf16>, vector<32x128xbf16>, vector<256x128xf32> -> vector<256x128xf32>
    %6 = vector.extract_strided_slice %0 {offsets = [0, 0, 0], sizes = [1, 1, 32], strides = [1, 1, 1]} : vector<1x3x32xf32> to vector<1x1x32xf32>
    %7 = vector.shape_cast %6 : vector<1x1x32xf32> to vector<1x32xf32>
    %8 = arith.extf %2 : vector<256x32xbf16> to vector<256x32xf32>
    %9 = vector.broadcast %7 : vector<1x32xf32> to vector<256x32xf32>
    %10 = arith.mulf %9, %8 : vector<256x32xf32>
    %c0_8 = arith.constant 0 : index
    %c0_9 = arith.constant 0 : index
    %c0_10 = arith.constant 0 : index
    %11 = vector.load %arg4[%c0_8, %c0_9, %c0_10] : memref<1x256x32xbf16, #tpu.memory_space<vmem>>, vector<1x256x32xbf16>
    %12 = vector.shape_cast %11 : vector<1x256x32xbf16> to vector<256x32xbf16>
    %c1 = arith.constant 1 : index
    %c0_11 = arith.constant 0 : index
    %c0_12 = arith.constant 0 : index
    %13 = vector.load %arg6[%c1, %c0_11, %c0_12] : memref<4x32x128xbf16, #tpu.memory_space<vmem>>, vector<1x32x128xbf16>
    %14 = vector.shape_cast %13 : vector<1x32x128xbf16> to vector<32x128xbf16>
    %cst_13 = arith.constant dense<0.000000e+00> : vector<256x128xf32>
    %15 = tpu.matmul %12, %14, %cst_13 {dimension_numbers = #tpu.dot_dimension_numbers<[1], [0], [0], [1], [0, 0, 1, 1], [], []>} : vector<256x32xbf16>, vector<32x128xbf16>, vector<256x128xf32> -> vector<256x128xf32>
    %16 = arith.addf %5, %15 : vector<256x128xf32>
    %17 = vector.extract_strided_slice %0 {offsets = [0, 1, 0], sizes = [1, 1, 32], strides = [1, 1, 1]} : vector<1x3x32xf32> to vector<1x1x32xf32>
    %18 = vector.shape_cast %17 : vector<1x1x32xf32> to vector<1x32xf32>
    %19 = arith.extf %12 : vector<256x32xbf16> to vector<256x32xf32>
    %20 = vector.broadcast %18 : vector<1x32xf32> to vector<256x32xf32>
    %21 = arith.mulf %20, %19 : vector<256x32xf32>
    %22 = arith.addf %10, %21 : vector<256x32xf32>
    %c0_14 = arith.constant 0 : index
    %c0_15 = arith.constant 0 : index
    %c0_16 = arith.constant 0 : index
    %23 = vector.load %arg5[%c0_14, %c0_15, %c0_16] : memref<1x256x32xbf16, #tpu.memory_space<vmem>>, vector<1x256x32xbf16>
    %24 = vector.shape_cast %23 : vector<1x256x32xbf16> to vector<256x32xbf16>
    %c2 = arith.constant 2 : index
    %c0_17 = arith.constant 0 : index
    %c0_18 = arith.constant 0 : index
    %25 = vector.load %arg6[%c2, %c0_17, %c0_18] : memref<4x32x128xbf16, #tpu.memory_space<vmem>>, vector<1x32x128xbf16>
    %26 = vector.shape_cast %25 : vector<1x32x128xbf16> to vector<32x128xbf16>
    %cst_19 = arith.constant dense<0.000000e+00> : vector<256x128xf32>
    %27 = tpu.matmul %24, %26, %cst_19 {dimension_numbers = #tpu.dot_dimension_numbers<[1], [0], [0], [1], [0, 0, 1, 1], [], []>} : vector<256x32xbf16>, vector<32x128xbf16>, vector<256x128xf32> -> vector<256x128xf32>
    %28 = arith.addf %16, %27 : vector<256x128xf32>
    %29 = vector.extract_strided_slice %0 {offsets = [0, 2, 0], sizes = [1, 1, 32], strides = [1, 1, 1]} : vector<1x3x32xf32> to vector<1x1x32xf32>
    %30 = vector.shape_cast %29 : vector<1x1x32xf32> to vector<1x32xf32>
    %31 = arith.extf %24 : vector<256x32xbf16> to vector<256x32xf32>
    %32 = vector.broadcast %30 : vector<1x32xf32> to vector<256x32xf32>
    %33 = arith.mulf %32, %31 : vector<256x32xf32>
    %34 = arith.addf %22, %33 : vector<256x32xf32>
    %35 = arith.truncf %34 : vector<256x32xf32> to vector<256x32xbf16>
    %c3 = arith.constant 3 : index
    %c0_20 = arith.constant 0 : index
    %c0_21 = arith.constant 0 : index
    %36 = vector.load %arg6[%c3, %c0_20, %c0_21] : memref<4x32x128xbf16, #tpu.memory_space<vmem>>, vector<1x32x128xbf16>
    %37 = vector.shape_cast %36 : vector<1x32x128xbf16> to vector<32x128xbf16>
    %cst_22 = arith.constant dense<0.000000e+00> : vector<256x128xf32>
    %38 = tpu.matmul %35, %37, %cst_22 {dimension_numbers = #tpu.dot_dimension_numbers<[1], [0], [0], [1], [0, 0, 1, 1], [], []>} : vector<256x32xbf16>, vector<32x128xbf16>, vector<256x128xf32> -> vector<256x128xf32>
    %39 = arith.addf %28, %38 : vector<256x128xf32>
    %c0_23 = arith.constant 0 : index
    %c0_24 = arith.constant 0 : index
    %40 = vector.load %arg7[%c0_23, %c0_24] : memref<1x128xf32, #tpu.memory_space<vmem>>, vector<1x128xf32>
    %41 = vector.broadcast %40 : vector<1x128xf32> to vector<256x128xf32>
    %42 = arith.addf %39, %41 : vector<256x128xf32>
    %43 = vector.shape_cast %42 : vector<256x128xf32> to vector<1x256x128xf32>
    %c0_25 = arith.constant 0 : index
    %c0_26 = arith.constant 0 : index
    %c0_27 = arith.constant 0 : index
    %44 = vector.load %arg8[%c0_25, %c0_26, %c0_27] : memref<1x256x128xf32, #tpu.memory_space<vmem>>, vector<1x256x128xf32>
    tpu.vector_store %arg8[%c0_25, %c0_26, %c0_27], %43 {strides = array<i32>} : memref<1x256x128xf32, #tpu.memory_space<vmem>>, vector<1x256x128xf32>,
    return
  }
  func.func @transform_0(%arg0: i32, %arg1: i32) -> (i32, i32, i32) {
    %c0_i32 = arith.constant 0 : i32
    %c0_i32_0 = arith.constant 0 : i32
    %c0_i32_1 = arith.constant 0 : i32
    return %arg0, %c0_i32, %c0_i32_0 : i32, i32, i32
  }
  func.func @transform_1(%arg0: i32, %arg1: i32) -> (i32, i32, i32) {
    %c0_i32 = arith.constant 0 : i32
    %c0_i32_0 = arith.constant 0 : i32
    return %arg0, %arg1, %c0_i32 : i32, i32, i32
  }
  func.func @transform_2(%arg0: i32, %arg1: i32) -> (i32, i32, i32) {
    %c0_i32 = arith.constant 0 : i32
    %c0_i32_0 = arith.constant 0 : i32
    return %arg0, %arg1, %c0_i32 : i32, i32, i32
  }
  func.func @transform_3(%arg0: i32, %arg1: i32) -> (i32, i32, i32) {
    %c0_i32 = arith.constant 0 : i32
    %c0_i32_0 = arith.constant 0 : i32
    return %arg0, %arg1, %c0_i32 : i32, i32, i32
  }
  func.func @transform_4(%arg0: i32, %arg1: i32) -> (i32, i32, i32) {
    %c0_i32 = arith.constant 0 : i32
    %c0_i32_0 = arith.constant 0 : i32
    %c0_i32_1 = arith.constant 0 : i32
    %c0_i32_2 = arith.constant 0 : i32
    return %c0_i32, %c0_i32_0, %c0_i32_1 : i32, i32, i32
  }
  func.func @transform_5(%arg0: i32, %arg1: i32) -> (i32, i32) {
    %c0_i32 = arith.constant 0 : i32
    %c0_i32_0 = arith.constant 0 : i32
    %c0_i32_1 = arith.constant 0 : i32
    return %c0_i32, %c0_i32_0 : i32, i32
  }
  func.func @transform_6(%arg0: i32, %arg1: i32) -> (i32, i32, i32) {
    %c0_i32 = arith.constant 0 : i32
    %c0_i32_0 = arith.constant 0 : i32
    return %arg0, %arg1, %c0_i32 : i32, i32, i32
  }
}

</mosaic_0001>

<bundles_post_ra>
// kernel: forward.5
= control target key start
LH: loop header
LB: loop body
LE: loop exit
PB: predicated region body
PF: predicated region fallthrough
CT: control target
= control target key end

     0   :  { %vm93_vm0 = vcmask 1043456   ;;  %vm44_vm1 = vcmask 31744   ;;  %vm267_vm2 = vcmask 130048   ;;  %vm525_vm3 = vcmask 257024   ;;  %s895_s1 = inlined_call_operand.vmem [shape: f32[4,16], index: 1, kind: input, shape index: {}]   ;;  %s896_s0 = inlined_call_operand.vmem [shape: f32[128,4], index: 0, kind: input, shape index: {}]   ;;  %s897_s3 = inlined_call_operand.vmem [shape: f32[16,32], index: 3, kind: input, shape index: {}]   ;;  %s898_s2 = inlined_call_operand.vmem [shape: f32[1,16], index: 2, kind: input, shape index: {}]   ;;  %s899_s4 = inlined_call_operand.vmem [shape: f32[1,32], index: 4, kind: input, shape index: {}]   ;;  %s900_s5 = inlined_call_operand.vmem [shape: bf16[128,32], index: 5, kind: output, shape index: {}]  }
   0x1   :  { %v36_v0 = vld [vmem:[%s895_s1] sm:$0xf]  ;;  %v21_v2 = vld [vmem:[%s896_s0 + $0x8] sm:$0xff]  ;;  %v22_v3 = vld [vmem:[%s896_s0 + $0x10] sm:$0xff] }
   0x2   :  { %v20_v1 = vld [vmem:[%s896_s0] sm:$0xff]  ;;  %648 = vmatprep.subr.msk.mxu0 %vm93_vm0, %v36_v0  ;;  %v23_v4 = vld [vmem:[%s896_s0 + $0x18] sm:$0xff]  ;;  %v25_v6 = vld [vmem:[%s896_s0 + $0x28] sm:$0xff] }
   0x3   :  { %650 = vmatprep.mubr.msk.f32.mxu0 %vm44_vm1, %v20_v1  ;;  %649 = vmatpush3.msk.msra.mxu0 %vm93_vm0, %v36_v0  ;;  %v24_v5 = vld [vmem:[%s896_s0 + $0x20] sm:$0xff]  ;;  %v26_v7 = vld [vmem:[%s896_s0 + $0x30] sm:$0xff]  ;;  %v27_v8 = vld [vmem:[%s896_s0 + $0x38] sm:$0xff] }
   0x4   :  { %651 = vmatmul.mubr.msk.f32.vlgmr.msra.gmra.mrb[0].mxu0 %vm44_vm1, %v21_v2  ;;  %v28_v9 = vld [vmem:[%s896_s0 + $0x40] sm:$0xff]  ;;  %v29_v10 = vld [vmem:[%s896_s0 + $0x48] sm:$0xff]  ;;  %v30_v11 = vld [vmem:[%s896_s0 + $0x50] sm:$0xff] }
   0x5   :  { %653 = vmatprep.mubr.msk.f32.mxu0 %vm44_vm1, %v22_v3  ;;  %v31_v12 = vld [vmem:[%s896_s0 + $0x58] sm:$0xff]  ;;  %v32_v13 = vld [vmem:[%s896_s0 + $0x60] sm:$0xff]  ;;  %v33_v14 = vld [vmem:[%s896_s0 + $0x68] sm:$0xff] }
   0x6   :  { %v34_v15 = vld [vmem:[%s896_s0 + $0x70] sm:$0xff]  ;;  %v35_v16 = vld [vmem:[%s896_s0 + $0x78] sm:$0xff]  ;;  %v258_v17 = vld [vmem:[%s897_s3] sm:$0xff] }
   0x7   :  { %v259_v18 = vld [vmem:[%s897_s3 + $0x8] sm:$0xff]  ;;  %v546_v20 = vld [vmem:[%s898_s2] ss:$0 sm:$0xff] }
   0x8   :  { %654 = vmatmul.mubr.msk.f32.gmra.mrb[2].mxu0 %vm44_vm1, %v23_v4  ;;  %v702_v19 = vpack.c.bf16 %v259_v18, %v258_v17 }
   0x9   :  { %656 = vmatprep.mubr.msk.f32.mxu0 %vm44_vm1, %v24_v5  ;;  %v564_v5 = vld [vmem:[%s899_s4] ss:$0 sm:$0xff] }
   0xa   :  { %703 = vmatprep.subr.bf16.mxu1 %v702_v19 }
   0xb   :  { %705 = vmatpush3.bf16.msra.mxu1 %v702_v19 }
   0xc   :  { %657 = vmatmul.mubr.msk.f32.gmra.mrb[4].mxu0 %vm44_vm1, %v25_v6 }
   0xd   :  { %659 = vmatprep.mubr.msk.f32.mxu0 %vm44_vm1, %v26_v7 }
  0x10   :  { %660 = vmatmul.mubr.msk.f32.gmra.mrb[6].mxu0 %vm44_vm1, %v27_v8 }
  0x11   :  { %662 = vmatprep.mubr.msk.f32.mxu0 %vm44_vm1, %v28_v9 }
  0x14   :  { %663 = vmatmul.mubr.msk.f32.gmra.mrb[8].mxu0 %vm44_vm1, %v29_v10 }
  0x15   :  { %665 = vmatprep.mubr.msk.f32.mxu0 %vm44_vm1, %v30_v11 }
  0x18   :  { %666 = vmatmul.mubr.msk.f32.gmra.mrb[10].mxu0 %vm44_vm1, %v31_v12 }
  0x19   :  { %668 = vmatprep.mubr.msk.f32.mxu0 %vm44_vm1, %v32_v13 }
  0x1c   :  { %669 = vmatmul.mubr.msk.f32.gmra.mrb[12].mxu0 %vm44_vm1, %v33_v14 }
  0x1d   :  { %671 = vmatprep.mubr.msk.f32.mxu0 %vm44_vm1, %v34_v15 }
  0x20   :  { %672 = vmatmul.mubr.msk.f32.gmra.mrb[14].mxu0 %vm44_vm1, %v35_v16 }
  0xd7   :  { %v652_v21 = vpop.f32.mrb[0].mxu0 }
  0xd8   :  { %v169_v22 = vadd.f32 %v652_v21, %v546_v20  ;;  %v163_v23 = vpop.f32.mrb[1].mxu0 }
  0xd9   :  { %v164_v24 = vadd.f32 %v546_v20, %v163_v23 }
  0xda   :  { %v243_v27 = vmax.f32 %v169_v22, 0.0 }
  0xdb   :  { %v242_v25 = vmax.f32 %v164_v24, 0.0  ;;  %v655_v26 = vpop.f32.mrb[2].mxu0 }
  0xdc   :  { %v179_v28 = vadd.f32 %v655_v26, %v546_v20  ;;  %v173_v29 = vpop.f32.mrb[3].mxu0 }
  0xdd   :  { %v174_v30 = vadd.f32 %v546_v20, %v173_v29  ;;  %678 = vmatprep.mubr.msk.f32.mxu1 %vm267_vm2, %v242_v25 }
  0xde   :  { %679 = vmatmul.mubr.msk.f32.vlgmr.msra.gmra.mrb[0].mxu1 %vm267_vm2, %v243_v27  ;;  %v245_v33 = vmax.f32 %v179_v28, 0.0 }
  0xdf   :  { %v244_v31 = vmax.f32 %v174_v30, 0.0  ;;  %v658_v32 = vpop.f32.mrb[4].mxu0 }
  0xe0   :  { %v189_v34 = vadd.f32 %v658_v32, %v546_v20  ;;  %v183_v35 = vpop.f32.mrb[5].mxu0 }
  0xe1   :  { %v184_v36 = vadd.f32 %v546_v20, %v183_v35  ;;  %681 = vmatprep.mubr.msk.f32.mxu1 %vm267_vm2, %v244_v31 }
  0xe2   :  { %682 = vmatmul.mubr.msk.f32.gmra.mrb[2].mxu1 %vm267_vm2, %v245_v33  ;;  %v247_v39 = vmax.f32 %v189_v34, 0.0 }
  0xe3   :  { %v246_v37 = vmax.f32 %v184_v36, 0.0  ;;  %v661_v38 = vpop.f32.mrb[6].mxu0 }
  0xe4   :  { %v199_v40 = vadd.f32 %v661_v38, %v546_v20  ;;  %v193_v41 = vpop.f32.mrb[7].mxu0 }
  0xe5   :  { %v194_v42 = vadd.f32 %v546_v20, %v193_v41  ;;  %684 = vmatprep.mubr.msk.f32.mxu1 %vm267_vm2, %v246_v37 }
  0xe6   :  { %685 = vmatmul.mubr.msk.f32.gmra.mrb[4].mxu1 %vm267_vm2, %v247_v39  ;;  %v249_v45 = vmax.f32 %v199_v40, 0.0 }
  0xe7   :  { %v248_v43 = vmax.f32 %v194_v42, 0.0  ;;  %v664_v44 = vpop.f32.mrb[8].mxu0 }
  0xe8   :  { %v209_v46 = vadd.f32 %v664_v44, %v546_v20  ;;  %v203_v47 = vpop.f32.mrb[9].mxu0 }
  0xe9   :  { %v204_v48 = vadd.f32 %v546_v20, %v203_v47  ;;  %687 = vmatprep.mubr.msk.f32.mxu1 %vm267_vm2, %v248_v43 }
  0xea   :  { %688 = vmatmul.mubr.msk.f32.gmra.mrb[6].mxu1 %vm267_vm2, %v249_v45  ;;  %v251_v51 = vmax.f32 %v209_v46, 0.0 }
  0xeb   :  { %v250_v49 = vmax.f32 %v204_v48, 0.0  ;;  %v667_v50 = vpop.f32.mrb[10].mxu0 }
  0xec   :  { %v219_v52 = vadd.f32 %v667_v50, %v546_v20  ;;  %v213_v53 = vpop.f32.mrb[11].mxu0 }
  0xed   :  { %v214_v54 = vadd.f32 %v546_v20, %v213_v53  ;;  %690 = vmatprep.mubr.msk.f32.mxu1 %vm267_vm2, %v250_v49 }
  0xee   :  { %691 = vmatmul.mubr.msk.f32.gmra.mrb[8].mxu1 %vm267_vm2, %v251_v51  ;;  %v253_v57 = vmax.f32 %v219_v52, 0.0 }
  0xef   :  { %v252_v55 = vmax.f32 %v214_v54, 0.0  ;;  %v670_v56 = vpop.f32.mrb[12].mxu0 }
  0xf0   :  { %v229_v58 = vadd.f32 %v670_v56, %v546_v20  ;;  %v223_v59 = vpop.f32.mrb[13].mxu0 }
  0xf1   :  { %v224_v60 = vadd.f32 %v546_v20, %v223_v59  ;;  %693 = vmatprep.mubr.msk.f32.mxu1 %vm267_vm2, %v252_v55 }
  0xf2   :  { %694 = vmatmul.mubr.msk.f32.gmra.mrb[10].mxu1 %vm267_vm2, %v253_v57  ;;  %v255_v63 = vmax.f32 %v229_v58, 0.0 }
  0xf3   :  { %v254_v61 = vmax.f32 %v224_v60, 0.0  ;;  %v673_v62 = vpop.f32.mrb[14].mxu0 }
  0xf4   :  { %v239_v0 = vadd.f32 %v673_v62, %v546_v20  ;;  %v233_v1 = vpop.f32.mrb[15].mxu0 }
  0xf5   :  { %v234_v2 = vadd.f32 %v546_v20, %v233_v1  ;;  %696 = vmatprep.mubr.msk.f32.mxu1 %vm267_vm2, %v254_v61 }
  0xf6   :  { %697 = vmatmul.mubr.msk.f32.gmra.mrb[12].mxu1 %vm267_vm2, %v255_v63  ;;  %v257_v4 = vmax.f32 %v239_v0, 0.0 }
  0xf7   :  { %v256_v3 = vmax.f32 %v234_v2, 0.0 }
  0xf9   :  { %699 = vmatprep.mubr.msk.f32.mxu1 %vm267_vm2, %v256_v3 }
  0xfa   :  { %700 = vmatmul.mubr.msk.f32.gmra.mrb[14].mxu1 %vm267_vm2, %v257_v4 }
 0x1b1   :  { %v680_v6 = vpop.f32.mrb[0].mxu1 }
 0x1b2   :  { %v388_v7 = vadd.f32 %v680_v6, %v564_v5  ;;  %v382_v8 = vpop.f32.mrb[1].mxu1 }
 0x1b3   :  { %v383_v9 = vadd.f32 %v564_v5, %v382_v8 }
 0x1b4   :  { %v598_v10 = vpack.c.bf16 %v388_v7, %v388_v7 }
 0x1b5   :  { %v597_v11 = vpack.c.bf16 %v383_v9, %v383_v9  ;;  %v683_v12 = vpop.f32.mrb[2].mxu1 }
 0x1b6   :  { %527 = vst.msk [vmem:[%s900_s5 + $0x4] sm:$0xf] %vm525_vm3, %v598_v10  ;;  %v398_v13 = vadd.f32 %v683_v12, %v564_v5  ;;  %v392_v14 = vpop.f32.mrb[3].mxu1 }
 0x1b7   :  { %526 = vst.msk [vmem:[%s900_s5] sm:$0xf] %vm525_vm3, %v597_v11  ;;  %v393_v15 = vadd.f32 %v564_v5, %v392_v14 }
 0x1b8   :  { %v600_v16 = vpack.c.bf16 %v398_v13, %v398_v13 }
 0x1b9   :  { %v599_v17 = vpack.c.bf16 %v393_v15, %v393_v15  ;;  %v686_v18 = vpop.f32.mrb[4].mxu1 }
 0x1ba   :  { %529 = vst.msk [vmem:[%s900_s5 + $0xc] sm:$0xf] %vm525_vm3, %v600_v16  ;;  %v408_v19 = vadd.f32 %v686_v18, %v564_v5  ;;  %v402_v20 = vpop.f32.mrb[5].mxu1 }
 0x1bb   :  { %528 = vst.msk [vmem:[%s900_s5 + $0x8] sm:$0xf] %vm525_vm3, %v599_v17  ;;  %v403_v21 = vadd.f32 %v564_v5, %v402_v20 }
 0x1bc   :  { %v602_v22 = vpack.c.bf16 %v408_v19, %v408_v19 }
 0x1bd   :  { %v601_v23 = vpack.c.bf16 %v403_v21, %v403_v21  ;;  %v689_v24 = vpop.f32.mrb[6].mxu1 }
 0x1be   :  { %531 = vst.msk [vmem:[%s900_s5 + $0x14] sm:$0xf] %vm525_vm3, %v602_v22  ;;  %v418_v25 = vadd.f32 %v689_v24, %v564_v5  ;;  %v412_v26 = vpop.f32.mrb[7].mxu1 }
 0x1bf   :  { %530 = vst.msk [vmem:[%s900_s5 + $0x10] sm:$0xf] %vm525_vm3, %v601_v23  ;;  %v413_v27 = vadd.f32 %v564_v5, %v412_v26 }
 0x1c0   :  { %v604_v28 = vpack.c.bf16 %v418_v25, %v418_v25 }
 0x1c1   :  { %v603_v29 = vpack.c.bf16 %v413_v27, %v413_v27  ;;  %v692_v30 = vpop.f32.mrb[8].mxu1 }
 0x1c2   :  { %533 = vst.msk [vmem:[%s900_s5 + $0x1c] sm:$0xf] %vm525_vm3, %v604_v28  ;;  %v428_v31 = vadd.f32 %v692_v30, %v564_v5  ;;  %v422_v32 = vpop.f32.mrb[9].mxu1 }
 0x1c3   :  { %532 = vst.msk [vmem:[%s900_s5 + $0x18] sm:$0xf] %vm525_vm3, %v603_v29  ;;  %v423_v33 = vadd.f32 %v564_v5, %v422_v32 }
 0x1c4   :  { %v606_v34 = vpack.c.bf16 %v428_v31, %v428_v31 }
 0x1c5   :  { %v605_v35 = vpack.c.bf16 %v423_v33, %v423_v33  ;;  %v695_v36 = vpop.f32.mrb[10].mxu1 }
 0x1c6   :  { %535 = vst.msk [vmem:[%s900_s5 + $0x24] sm:$0xf] %vm525_vm3, %v606_v34  ;;  %v438_v37 = vadd.f32 %v695_v36, %v564_v5  ;;  %v432_v38 = vpop.f32.mrb[11].mxu1 }
 0x1c7   :  { %534 = vst.msk [vmem:[%s900_s5 + $0x20] sm:$0xf] %vm525_vm3, %v605_v35  ;;  %v433_v39 = vadd.f32 %v564_v5, %v432_v38 }
 0x1c8   :  { %v608_v40 = vpack.c.bf16 %v438_v37, %v438_v37 }
 0x1c9   :  { %v607_v41 = vpack.c.bf16 %v433_v39, %v433_v39  ;;  %v698_v42 = vpop.f32.mrb[12].mxu1 }
 0x1ca   :  { %537 = vst.msk [vmem:[%s900_s5 + $0x2c] sm:$0xf] %vm525_vm3, %v608_v40  ;;  %v448_v43 = vadd.f32 %v698_v42, %v564_v5  ;;  %v442_v44 = vpop.f32.mrb[13].mxu1 }
 0x1cb   :  { %536 = vst.msk [vmem:[%s900_s5 + $0x28] sm:$0xf] %vm525_vm3, %v607_v41  ;;  %v443_v45 = vadd.f32 %v564_v5, %v442_v44 }
 0x1cc   :  { %v610_v46 = vpack.c.bf16 %v448_v43, %v448_v43 }
 0x1cd   :  { %v609_v47 = vpack.c.bf16 %v443_v45, %v443_v45  ;;  %v701_v48 = vpop.f32.mrb[14].mxu1 }
 0x1ce   :  { %539 = vst.msk [vmem:[%s900_s5 + $0x34] sm:$0xf] %vm525_vm3, %v610_v46  ;;  %v458_v49 = vadd.f32 %v701_v48, %v564_v5  ;;  %v452_v50 = vpop.f32.mrb[15].mxu1 }
 0x1cf   :  { %538 = vst.msk [vmem:[%s900_s5 + $0x30] sm:$0xf] %vm525_vm3, %v609_v47  ;;  %v453_v51 = vadd.f32 %v564_v5, %v452_v50 }
 0x1d0   :  { %v612_v52 = vpack.c.bf16 %v458_v49, %v458_v49 }
 0x1d1   :  { %v611_v53 = vpack.c.bf16 %v453_v51, %v453_v51 }
 0x1d2   :  { %541 = vst.msk [vmem:[%s900_s5 + $0x3c] sm:$0xf] %vm525_vm3, %v612_v52 }
 0x1d3   :  { %540 = vst.msk [vmem:[%s900_s5 + $0x38] sm:$0xf] %vm525_vm3, %v611_v53 }

// kernel: forward.4
= control target key start
LH: loop header
LB: loop body
LE: loop exit
PB: predicated region body
PF: predicated region fallthrough
CT: control target
= control target key end

     0   :  { %vm285_vm0 = vcmask 1043456   ;;  %vm92_vm1 = vcmask 31744   ;;  %vm746_vm2 = vcmask 64512   ;;  %vm1580_vm3 = vcmask 257024   ;;  %s2984_s1 = inlined_call_operand.vmem [shape: f32[4,8], index: 1, kind: input, shape index: {}]   ;;  %s2985_s0 = inlined_call_operand.vmem [shape: f32[512,4], index: 0, kind: input, shape index: {}]   ;;  %s2986_s3 = inlined_call_operand.vmem [shape: f32[8,32], index: 3, kind: input, shape index: {}]   ;;  %s2987_s2 = inlined_call_operand.vmem [shape: f32[1,8], index: 2, kind: input, shape index: {}]   ;;  %s2988_s4 = inlined_call_operand.vmem [shape: f32[1,32], index: 4, kind: input, shape index: {}]   ;;  %s2989_s5 = inlined_call_operand.vmem [shape: bf16[512,32], index: 5, kind: output, shape index: {}]  }
   0x1   :  { %v84_v0 = vld [vmem:[%s2984_s1] sm:$0xf]  ;;  %v21_v2 = vld [vmem:[%s2985_s0 + $0x8] sm:$0xff]  ;;  %v22_v3 = vld [vmem:[%s2985_s0 + $0x10] sm:$0xff] }
   0x2   :  { %v20_v1 = vld [vmem:[%s2985_s0] sm:$0xff]  ;;  %2038 = vmatprep.subr.msk.mxu0 %vm285_vm0, %v84_v0  ;;  %v23_v4 = vld [vmem:[%s2985_s0 + $0x18] sm:$0xff]  ;;  %v25_v6 = vld [vmem:[%s2985_s0 + $0x28] sm:$0xff] }
   0x3   :  { %2040 = vmatprep.mubr.msk.f32.mxu0 %vm92_vm1, %v20_v1  ;;  %2039 = vmatpush3.msk.msra.mxu0 %vm285_vm0, %v84_v0  ;;  %v24_v5 = vld [vmem:[%s2985_s0 + $0x20] sm:$0xff]  ;;  %v26_v7 = vld [vmem:[%s2985_s0 + $0x30] sm:$0xff]  ;;  %v27_v8 = vld [vmem:[%s2985_s0 + $0x38] sm:$0xff] }
   0x4   :  { %2041 = vmatmul.mubr.msk.f32.vlgmr.msra.gmra.mrb[0].mxu0 %vm92_vm1, %v21_v2  ;;  %v28_v9 = vld [vmem:[%s2985_s0 + $0x40] sm:$0xff]  ;;  %v29_v10 = vld [vmem:[%s2985_s0 + $0x48] sm:$0xff]  ;;  %v30_v11 = vld [vmem:[%s2985_s0 + $0x50] sm:$0xff] }
   0x5   :  { %2043 = vmatprep.mubr.msk.f32.mxu0 %vm92_vm1, %v22_v3  ;;  %v31_v12 = vld [vmem:[%s2985_s0 + $0x58] sm:$0xff]  ;;  %v32_v13 = vld [vmem:[%s2985_s0 + $0x60] sm:$0xff]  ;;  %v33_v14 = vld [vmem:[%s2985_s0 + $0x68] sm:$0xff] }
   0x6   :  { %v34_v15 = vld [vmem:[%s2985_s0 + $0x70] sm:$0xff]  ;;  %v35_v16 = vld [vmem:[%s2985_s0 + $0x78] sm:$0xff]  ;;  %v36_v17 = vld [vmem:[%s2985_s0 + $0x80] sm:$0xff] }
   0x7   :  { %v37_v18 = vld [vmem:[%s2985_s0 + $0x88] sm:$0xff]  ;;  %v38_v19 = vld [vmem:[%s2985_s0 + $0x90] sm:$0xff]  ;;  %v39_v20 = vld [vmem:[%s2985_s0 + $0x98] sm:$0xff] }
   0x8   :  { %2044 = vmatmul.mubr.msk.f32.gmra.mrb[2].mxu0 %vm92_vm1, %v23_v4  ;;  %v40_v21 = vld [vmem:[%s2985_s0 + $0xa0] sm:$0xff]  ;;  %v41_v22 = vld [vmem:[%s2985_s0 + $0xa8] sm:$0xff]  ;;  %v42_v23 = vld [vmem:[%s2985_s0 + $0xb0] sm:$0xff] }
   0x9   :  { %2046 = vmatprep.mubr.msk.f32.mxu0 %vm92_vm1, %v24_v5  ;;  %v43_v24 = vld [vmem:[%s2985_s0 + $0xb8] sm:$0xff]  ;;  %v44_v25 = vld [vmem:[%s2985_s0 + $0xc0] sm:$0xff]  ;;  %v45_v26 = vld [vmem:[%s2985_s0 + $0xc8] sm:$0xff] }
   0xa   :  { %v46_v27 = vld [vmem:[%s2985_s0 + $0xd0] sm:$0xff]  ;;  %v47_v28 = vld [vmem:[%s2985_s0 + $0xd8] sm:$0xff]  ;;  %v48_v29 = vld [vmem:[%s2985_s0 + $0xe0] sm:$0xff] }
   0xb   :  { %v49_v30 = vld [vmem:[%s2985_s0 + $0xe8] sm:$0xff]  ;;  %v50_v31 = vld [vmem:[%s2985_s0 + $0xf0] sm:$0xff]  ;;  %v51_v32 = vld [vmem:[%s2985_s0 + $0xf8] sm:$0xff] }
   0xc   :  { %2047 = vmatmul.mubr.msk.f32.gmra.mrb[4].mxu0 %vm92_vm1, %v25_v6  ;;  %v52_v33 = vld [vmem:[%s2985_s0 + $0x100] sm:$0xff]  ;;  %v53_v34 = vld [vmem:[%s2985_s0 + $0x108] sm:$0xff]  ;;  %v54_v35 = vld [vmem:[%s2985_s0 + $0x110] sm:$0xff] }
   0xd   :  { %2049 = vmatprep.mubr.msk.f32.mxu0 %vm92_vm1, %v26_v7  ;;  %v55_v36 = vld [vmem:[%s2985_s0 + $0x118] sm:$0xff]  ;;  %v56_v37 = vld [vmem:[%s2985_s0 + $0x120] sm:$0xff]  ;;  %v57_v38 = vld [vmem:[%s2985_s0 + $0x128] sm:$0xff] }
   0xe   :  { %v58_v39 = vld [vmem:[%s2985_s0 + $0x130] sm:$0xff]  ;;  %v59_v40 = vld [vmem:[%s2985_s0 + $0x138] sm:$0xff]  ;;  %v60_v41 = vld [vmem:[%s2985_s0 + $0x140] sm:$0xff] }
   0xf   :  { %v61_v42 = vld [vmem:[%s2985_s0 + $0x148] sm:$0xff]  ;;  %v62_v43 = vld [vmem:[%s2985_s0 + $0x150] sm:$0xff]  ;;  %v63_v44 = vld [vmem:[%s2985_s0 + $0x158] sm:$0xff] }
  0x10   :  { %2050 = vmatmul.mubr.msk.f32.gmra.mrb[6].mxu0 %vm92_vm1, %v27_v8  ;;  %v64_v45 = vld [vmem:[%s2985_s0 + $0x160] sm:$0xff]  ;;  %v65_v46 = vld [vmem:[%s2985_s0 + $0x168] sm:$0xff]  ;;  %v66_v47 = vld [vmem:[%s2985_s0 + $0x170] sm:$0xff] }
  0x11   :  { %2052 = vmatprep.mubr.msk.f32.mxu0 %vm92_vm1, %v28_v9  ;;  %v738_v48 = vld [vmem:[%s2986_s3] sm:$0xff]  ;;  %v67_v49 = vld [vmem:[%s2985_s0 + $0x178] sm:$0xff]  ;;  %v69_v51 = vld [vmem:[%s2985_s0 + $0x188] sm:$0xff] }
  0x12   :  { %2136 = vmatprep.subr.mxu1 %v738_v48  ;;  %v68_v50 = vld [vmem:[%s2985_s0 + $0x180] sm:$0xff]  ;;  %v70_v52 = vld [vmem:[%s2985_s0 + $0x190] sm:$0xff]  ;;  %v71_v53 = vld [vmem:[%s2985_s0 + $0x198] sm:$0xff] }
  0x13   :  { %2137 = vmatpush3.msra.mxu1 %v738_v48  ;;  %v72_v54 = vld [vmem:[%s2985_s0 + $0x1a0] sm:$0xff]  ;;  %v73_v55 = vld [vmem:[%s2985_s0 + $0x1a8] sm:$0xff]  ;;  %v74_v56 = vld [vmem:[%s2985_s0 + $0x1b0] sm:$0xff] }
  0x14   :  { %2053 = vmatmul.mubr.msk.f32.gmra.mrb[8].mxu0 %vm92_vm1, %v29_v10  ;;  %v75_v57 = vld [vmem:[%s2985_s0 + $0x1b8] sm:$0xff]  ;;  %v76_v58 = vld [vmem:[%s2985_s0 + $0x1c0] sm:$0xff]  ;;  %v77_v59 = vld [vmem:[%s2985_s0 + $0x1c8] sm:$0xff] }
  0x15   :  { %2055 = vmatprep.mubr.msk.f32.mxu0 %vm92_vm1, %v30_v11  ;;  %v78_v60 = vld [vmem:[%s2985_s0 + $0x1d0] sm:$0xff]  ;;  %v79_v61 = vld [vmem:[%s2985_s0 + $0x1d8] sm:$0xff]  ;;  %v80_v62 = vld [vmem:[%s2985_s0 + $0x1e0] sm:$0xff] }
  0x16   :  { %v81_v63 = vld [vmem:[%s2985_s0 + $0x1e8] sm:$0xff]  ;;  %v82_v0 = vld [vmem:[%s2985_s0 + $0x1f0] sm:$0xff]  ;;  %v83_v1 = vld [vmem:[%s2985_s0 + $0x1f8] sm:$0xff] }
  0x17   :  { %v2529_v2 = vld [vmem:[%s2987_s2] ss:$0 sm:$0xff] }
  0x18   :  { %2056 = vmatmul.mubr.msk.f32.gmra.mrb[10].mxu0 %vm92_vm1, %v31_v12 }
  0x19   :  { %2058 = vmatprep.mubr.msk.f32.mxu0 %vm92_vm1, %v32_v13 }
  0x1c   :  { %2059 = vmatmul.mubr.msk.f32.gmra.mrb[12].mxu0 %vm92_vm1, %v33_v14 }
  0x1d   :  { %2061 = vmatprep.mubr.msk.f32.mxu0 %vm92_vm1, %v34_v15 }
  0x20   :  { %2062 = vmatmul.mubr.msk.f32.gmra.mrb[14].mxu0 %vm92_vm1, %v35_v16 }
  0x21   :  { %2064 = vmatprep.mubr.msk.f32.mxu0 %vm92_vm1, %v36_v17 }
  0x24   :  { %2065 = vmatmul.mubr.msk.f32.gmra.mrb[16].mxu0 %vm92_vm1, %v37_v18 }
  0x25   :  { %2067 = vmatprep.mubr.msk.f32.mxu0 %vm92_vm1, %v38_v19 }
  0x28   :  { %2068 = vmatmul.mubr.msk.f32.gmra.mrb[18].mxu0 %vm92_vm1, %v39_v20 }
  0x29   :  { %2070 = vmatprep.mubr.msk.f32.mxu0 %vm92_vm1, %v40_v21 }
  0x2c   :  { %2071 = vmatmul.mubr.msk.f32.gmra.mrb[20].mxu0 %vm92_vm1, %v41_v22 }
  0x2d   :  { %2073 = vmatprep.mubr.msk.f32.mxu0 %vm92_vm1, %v42_v23 }
  0x30   :  { %2074 = vmatmul.mubr.msk.f32.gmra.mrb[22].mxu0 %vm92_vm1, %v43_v24 }
  0x31   :  { %2076 = vmatprep.mubr.msk.f32.mxu0 %vm92_vm1, %v44_v25 }
  0x34   :  { %2077 = vmatmul.mubr.msk.f32.gmra.mrb[24].mxu0 %vm92_vm1, %v45_v26 }
  0x35   :  { %2079 = vmatprep.mubr.msk.f32.mxu0 %vm92_vm1, %v46_v27 }
  0x38   :  { %2080 = vmatmul.mubr.msk.f32.gmra.mrb[26].mxu0 %vm92_vm1, %v47_v28 }
  0x39   :  { %2082 = vmatprep.mubr.msk.f32.mxu0 %vm92_vm1, %v48_v29 }
  0x3c   :  { %2083 = vmatmul.mubr.msk.f32.gmra.mrb[28].mxu0 %vm92_vm1, %v49_v30 }
  0x3d   :  { %2085 = vmatprep.mubr.msk.f32.mxu0 %vm92_vm1, %v50_v31 }
  0x40   :  { %2086 = vmatmul.mubr.msk.f32.gmra.mrb[30].mxu0 %vm92_vm1, %v51_v32 }
  0x41   :  { %2088 = vmatprep.mubr.msk.f32.mxu0 %vm92_vm1, %v52_v33 }
  0x44   :  { %2089 = vmatmul.mubr.msk.f32.gmra.mrb[32].mxu0 %vm92_vm1, %v53_v34 }
  0x45   :  { %2091 = vmatprep.mubr.msk.f32.mxu0 %vm92_vm1, %v54_v35 }
  0x48   :  { %2092 = vmatmul.mubr.msk.f32.gmra.mrb[34].mxu0 %vm92_vm1, %v55_v36 }
  0x49   :  { %2094 = vmatprep.mubr.msk.f32.mxu0 %vm92_vm1, %v56_v37 }
  0x4c   :  { %2095 = vmatmul.mubr.msk.f32.gmra.mrb[36].mxu0 %vm92_vm1, %v57_v38 }
  0x4d   :  { %2097 = vmatprep.mubr.msk.f32.mxu0 %vm92_vm1, %v58_v39 }
  0x50   :  { %2098 = vmatmul.mubr.msk.f32.gmra.mrb[38].mxu0 %vm92_vm1, %v59_v40 }
  0x51   :  { %2100 = vmatprep.mubr.msk.f32.mxu0 %vm92_vm1, %v60_v41 }
  0x54   :  { %2101 = vmatmul.mubr.msk.f32.gmra.mrb[40].mxu0 %vm92_vm1, %v61_v42 }
  0x55   :  { %2103 = vmatprep.mubr.msk.f32.mxu0 %vm92_vm1, %v62_v43 }
  0x58   :  { %2104 = vmatmul.mubr.msk.f32.gmra.mrb[42].mxu0 %vm92_vm1, %v63_v44 }
  0x59   :  { %2106 = vmatprep.mubr.msk.f32.mxu0 %vm92_vm1, %v64_v45 }
  0x5c   :  { %2107 = vmatmul.mubr.msk.f32.gmra.mrb[44].mxu0 %vm92_vm1, %v65_v46 }
  0x5d   :  { %2109 = vmatprep.mubr.msk.f32.mxu0 %vm92_vm1, %v66_v47 }
  0x60   :  { %2110 = vmatmul.mubr.msk.f32.gmra.mrb[46].mxu0 %vm92_vm1, %v67_v49 }
  0x61   :  { %2112 = vmatprep.mubr.msk.f32.mxu0 %vm92_vm1, %v68_v50 }
  0x64   :  { %2113 = vmatmul.mubr.msk.f32.gmra.mrb[48].mxu0 %vm92_vm1, %v69_v51 }
  0x65   :  { %2115 = vmatprep.mubr.msk.f32.mxu0 %vm92_vm1, %v70_v52 }
  0x68   :  { %2116 = vmatmul.mubr.msk.f32.gmra.mrb[50].mxu0 %vm92_vm1, %v71_v53 }
  0x69   :  { %2118 = vmatprep.mubr.msk.f32.mxu0 %vm92_vm1, %v72_v54 }
  0x6c   :  { %2119 = vmatmul.mubr.msk.f32.gmra.mrb[52].mxu0 %vm92_vm1, %v73_v55 }
  0x6d   :  { %2121 = vmatprep.mubr.msk.f32.mxu0 %vm92_vm1, %v74_v56 }
  0x70   :  { %2122 = vmatmul.mubr.msk.f32.gmra.mrb[54].mxu0 %vm92_vm1, %v75_v57 }
  0x71   :  { %2124 = vmatprep.mubr.msk.f32.mxu0 %vm92_vm1, %v76_v58 }
  0x74   :  { %2125 = vmatmul.mubr.msk.f32.gmra.mrb[56].mxu0 %vm92_vm1, %v77_v59 }
  0x75   :  { %2127 = vmatprep.mubr.msk.f32.mxu0 %vm92_vm1, %v78_v60 }
  0x78   :  { %2128 = vmatmul.mubr.msk.f32.gmra.mrb[58].mxu0 %vm92_vm1, %v79_v61 }
  0x79   :  { %2130 = vmatprep.mubr.msk.f32.mxu0 %vm92_vm1, %v80_v62 }
  0x7c   :  { %2131 = vmatmul.mubr.msk.f32.gmra.mrb[60].mxu0 %vm92_vm1, %v81_v63 }
  0x7d   :  { %2133 = vmatprep.mubr.msk.f32.mxu0 %vm92_vm1, %v82_v0 }
  0x80   :  { %2134 = vmatmul.mubr.msk.f32.gmra.mrb[62].mxu0 %vm92_vm1, %v83_v1 }
  0xd7   :  { %v2042_v3 = vpop.f32.mrb[0].mxu0 }
  0xd8   :  { %v361_v4 = vadd.f32 %v2042_v3, %v2529_v2  ;;  %v355_v5 = vpop.f32.mrb[1].mxu0 }
  0xd9   :  { %v356_v6 = vadd.f32 %v2529_v2, %v355_v5 }
  0xda   :  { %v675_v9 = vmax.f32 %v361_v4, 0.0 }
  0xdb   :  { %v674_v7 = vmax.f32 %v356_v6, 0.0  ;;  %v2045_v8 = vpop.f32.mrb[2].mxu0 }
  0xdc   :  { %v371_v10 = vadd.f32 %v2045_v8, %v2529_v2  ;;  %v365_v11 = vpop.f32.mrb[3].mxu0 }
  0xdd   :  { %v366_v12 = vadd.f32 %v2529_v2, %v365_v11  ;;  %2138 = vmatprep.mubr.msk.f32.mxu1 %vm746_vm2, %v674_v7 }
  0xde   :  { %2139 = vmatmul.mubr.msk.f32.vlgmr.msra.gmra.mrb[0].mxu1 %vm746_vm2, %v675_v9  ;;  %v677_v15 = vmax.f32 %v371_v10, 0.0 }
  0xdf   :  { %v676_v13 = vmax.f32 %v366_v12, 0.0  ;;  %v2048_v14 = vpop.f32.mrb[4].mxu0 }
  0xe0   :  { %v381_v16 = vadd.f32 %v2048_v14, %v2529_v2  ;;  %v375_v17 = vpop.f32.mrb[5].mxu0 }
  0xe1   :  { %v376_v18 = vadd.f32 %v2529_v2, %v375_v17  ;;  %2141 = vmatprep.mubr.msk.f32.mxu1 %vm746_vm2, %v676_v13 }
  0xe2   :  { %2142 = vmatmul.mubr.msk.f32.gmra.mrb[2].mxu1 %vm746_vm2, %v677_v15  ;;  %v679_v21 = vmax.f32 %v381_v16, 0.0 }
  0xe3   :  { %v678_v19 = vmax.f32 %v376_v18, 0.0  ;;  %v2051_v20 = vpop.f32.mrb[6].mxu0 }
  0xe4   :  { %v391_v22 = vadd.f32 %v2051_v20, %v2529_v2  ;;  %v385_v23 = vpop.f32.mrb[7].mxu0 }
  0xe5   :  { %v386_v24 = vadd.f32 %v2529_v2, %v385_v23  ;;  %2144 = vmatprep.mubr.msk.f32.mxu1 %vm746_vm2, %v678_v19 }
  0xe6   :  { %2145 = vmatmul.mubr.msk.f32.gmra.mrb[4].mxu1 %vm746_vm2, %v679_v21  ;;  %v681_v27 = vmax.f32 %v391_v22, 0.0 }
  0xe7   :  { %v680_v25 = vmax.f32 %v386_v24, 0.0  ;;  %v2054_v26 = vpop.f32.mrb[8].mxu0 }
  0xe8   :  { %v401_v28 = vadd.f32 %v2054_v26, %v2529_v2  ;;  %v395_v29 = vpop.f32.mrb[9].mxu0 }
  0xe9   :  { %v396_v30 = vadd.f32 %v2529_v2, %v395_v29  ;;  %2147 = vmatprep.mubr.msk.f32.mxu1 %vm746_vm2, %v680_v25 }
  0xea   :  { %2148 = vmatmul.mubr.msk.f32.gmra.mrb[6].mxu1 %vm746_vm2, %v681_v27  ;;  %v683_v33 = vmax.f32 %v401_v28, 0.0 }
  0xeb   :  { %v682_v31 = vmax.f32 %v396_v30, 0.0  ;;  %v2057_v32 = vpop.f32.mrb[10].mxu0 }
  0xec   :  { %v411_v34 = vadd.f32 %v2057_v32, %v2529_v2  ;;  %v405_v35 = vpop.f32.mrb[11].mxu0 }
  0xed   :  { %v406_v36 = vadd.f32 %v2529_v2, %v405_v35  ;;  %2150 = vmatprep.mubr.msk.f32.mxu1 %vm746_vm2, %v682_v31 }
  0xee   :  { %2151 = vmatmul.mubr.msk.f32.gmra.mrb[8].mxu1 %vm746_vm2, %v683_v33  ;;  %v685_v39 = vmax.f32 %v411_v34, 0.0 }
  0xef   :  { %v684_v37 = vmax.f32 %v406_v36, 0.0  ;;  %v2060_v38 = vpop.f32.mrb[12].mxu0 }
  0xf0   :  { %v421_v40 = vadd.f32 %v2060_v38, %v2529_v2  ;;  %v415_v41 = vpop.f32.mrb[13].mxu0 }
  0xf1   :  { %v416_v42 = vadd.f32 %v2529_v2, %v415_v41  ;;  %2153 = vmatprep.mubr.msk.f32.mxu1 %vm746_vm2, %v684_v37 }
  0xf2   :  { %2154 = vmatmul.mubr.msk.f32.gmra.mrb[10].mxu1 %vm746_vm2, %v685_v39  ;;  %v687_v45 = vmax.f32 %v421_v40, 0.0 }
  0xf3   :  { %v686_v43 = vmax.f32 %v416_v42, 0.0  ;;  %v2063_v44 = vpop.f32.mrb[14].mxu0 }
  0xf4   :  { %v431_v46 = vadd.f32 %v2063_v44, %v2529_v2  ;;  %v425_v47 = vpop.f32.mrb[15].mxu0 }
  0xf5   :  { %v426_v48 = vadd.f32 %v2529_v2, %v425_v47  ;;  %2156 = vmatprep.mubr.msk.f32.mxu1 %vm746_vm2, %v686_v43 }
  0xf6   :  { %2157 = vmatmul.mubr.msk.f32.gmra.mrb[12].mxu1 %vm746_vm2, %v687_v45  ;;  %v689_v51 = vmax.f32 %v431_v46, 0.0 }
  0xf7   :  { %v688_v49 = vmax.f32 %v426_v48, 0.0  ;;  %v2066_v50 = vpop.f32.mrb[16].mxu0 }
  0xf8   :  { %v441_v52 = vadd.f32 %v2066_v50, %v2529_v2  ;;  %v435_v53 = vpop.f32.mrb[17].mxu0 }
  0xf9   :  { %v436_v54 = vadd.f32 %v2529_v2, %v435_v53  ;;  %2159 = vmatprep.mubr.msk.f32.mxu1 %vm746_vm2, %v688_v49 }
  0xfa   :  { %2160 = vmatmul.mubr.msk.f32.gmra.mrb[14].mxu1 %vm746_vm2, %v689_v51  ;;  %v691_v57 = vmax.f32 %v441_v52, 0.0 }
  0xfb   :  { %v690_v55 = vmax.f32 %v436_v54, 0.0  ;;  %v2069_v56 = vpop.f32.mrb[18].mxu0 }
  0xfc   :  { %v451_v58 = vadd.f32 %v2069_v56, %v2529_v2  ;;  %v445_v59 = vpop.f32.mrb[19].mxu0 }
  0xfd   :  { %v446_v60 = vadd.f32 %v2529_v2, %v445_v59  ;;  %2162 = vmatprep.mubr.msk.f32.mxu1 %vm746_vm2, %v690_v55 }
  0xfe   :  { %2163 = vmatmul.mubr.msk.f32.gmra.mrb[16].mxu1 %vm746_vm2, %v691_v57  ;;  %v693_v63 = vmax.f32 %v451_v58, 0.0 }
  0xff   :  { %v692_v61 = vmax.f32 %v446_v60, 0.0  ;;  %v2072_v62 = vpop.f32.mrb[20].mxu0 }
 0x100   :  { %v461_v0 = vadd.f32 %v2072_v62, %v2529_v2  ;;  %v455_v1 = vpop.f32.mrb[21].mxu0 }
 0x101   :  { %v456_v3 = vadd.f32 %v2529_v2, %v455_v1  ;;  %2165 = vmatprep.mubr.msk.f32.mxu1 %vm746_vm2, %v692_v61 }
 0x102   :  { %2166 = vmatmul.mubr.msk.f32.gmra.mrb[18].mxu1 %vm746_vm2, %v693_v63  ;;  %v695_v6 = vmax.f32 %v461_v0, 0.0 }
 0x103   :  { %v694_v4 = vmax.f32 %v456_v3, 0.0  ;;  %v2075_v5 = vpop.f32.mrb[22].mxu0 }
 0x104   :  { %v471_v7 = vadd.f32 %v2075_v5, %v2529_v2  ;;  %v465_v8 = vpop.f32.mrb[23].mxu0 }
 0x105   :  { %v466_v9 = vadd.f32 %v2529_v2, %v465_v8  ;;  %2168 = vmatprep.mubr.msk.f32.mxu1 %vm746_vm2, %v694_v4 }
 0x106   :  { %2169 = vmatmul.mubr.msk.f32.gmra.mrb[20].mxu1 %vm746_vm2, %v695_v6  ;;  %v697_v12 = vmax.f32 %v471_v7, 0.0 }
 0x107   :  { %v696_v10 = vmax.f32 %v466_v9, 0.0  ;;  %v2078_v11 = vpop.f32.mrb[24].mxu0 }
 0x108   :  { %v481_v13 = vadd.f32 %v2078_v11, %v2529_v2  ;;  %v475_v14 = vpop.f32.mrb[25].mxu0 }
 0x109   :  { %v476_v15 = vadd.f32 %v2529_v2, %v475_v14  ;;  %2171 = vmatprep.mubr.msk.f32.mxu1 %vm746_vm2, %v696_v10 }
 0x10a   :  { %2172 = vmatmul.mubr.msk.f32.gmra.mrb[22].mxu1 %vm746_vm2, %v697_v12  ;;  %v699_v18 = vmax.f32 %v481_v13, 0.0 }
 0x10b   :  { %v698_v16 = vmax.f32 %v476_v15, 0.0  ;;  %v2081_v17 = vpop.f32.mrb[26].mxu0 }
 0x10c   :  { %v491_v19 = vadd.f32 %v2081_v17, %v2529_v2  ;;  %v485_v20 = vpop.f32.mrb[27].mxu0 }
 0x10d   :  { %v486_v21 = vadd.f32 %v2529_v2, %v485_v20  ;;  %2174 = vmatprep.mubr.msk.f32.mxu1 %vm746_vm2, %v698_v16 }
 0x10e   :  { %2175 = vmatmul.mubr.msk.f32.gmra.mrb[24].mxu1 %vm746_vm2, %v699_v18  ;;  %v701_v24 = vmax.f32 %v491_v19, 0.0 }
 0x10f   :  { %v700_v22 = vmax.f32 %v486_v21, 0.0  ;;  %v2084_v23 = vpop.f32.mrb[28].mxu0 }
 0x110   :  { %v501_v25 = vadd.f32 %v2084_v23, %v2529_v2  ;;  %v495_v26 = vpop.f32.mrb[29].mxu0 }
 0x111   :  { %v496_v27 = vadd.f32 %v2529_v2, %v495_v26  ;;  %2177 = vmatprep.mubr.msk.f32.mxu1 %vm746_vm2, %v700_v22 }
 0x112   :  { %2178 = vmatmul.mubr.msk.f32.gmra.mrb[26].mxu1 %vm746_vm2, %v701_v24  ;;  %v703_v30 = vmax.f32 %v501_v25, 0.0 }
 0x113   :  { %v702_v28 = vmax.f32 %v496_v27, 0.0  ;;  %v2087_v29 = vpop.f32.mrb[30].mxu0 }
 0x114   :  { %v511_v31 = vadd.f32 %v2087_v29, %v2529_v2  ;;  %v505_v32 = vpop.f32.mrb[31].mxu0 }
 0x115   :  { %v506_v33 = vadd.f32 %v2529_v2, %v505_v32  ;;  %2180 = vmatprep.mubr.msk.f32.mxu1 %vm746_vm2, %v702_v28 }
 0x116   :  { %2181 = vmatmul.mubr.msk.f32.gmra.mrb[28].mxu1 %vm746_vm2, %v703_v30  ;;  %v705_v36 = vmax.f32 %v511_v31, 0.0 }
 0x117   :  { %v704_v34 = vmax.f32 %v506_v33, 0.0  ;;  %v2090_v35 = vpop.f32.mrb[32].mxu0 }
 0x118   :  { %v521_v37 = vadd.f32 %v2090_v35, %v2529_v2  ;;  %v515_v38 = vpop.f32.mrb[33].mxu0 }
 0x119   :  { %v516_v39 = vadd.f32 %v2529_v2, %v515_v38  ;;  %2183 = vmatprep.mubr.msk.f32.mxu1 %vm746_vm2, %v704_v34 }
 0x11a   :  { %2184 = vmatmul.mubr.msk.f32.gmra.mrb[30].mxu1 %vm746_vm2, %v705_v36  ;;  %v707_v42 = vmax.f32 %v521_v37, 0.0 }
 0x11b   :  { %v706_v40 = vmax.f32 %v516_v39, 0.0  ;;  %v2093_v41 = vpop.f32.mrb[34].mxu0 }
 0x11c   :  { %v531_v43 = vadd.f32 %v2093_v41, %v2529_v2  ;;  %v525_v44 = vpop.f32.mrb[35].mxu0 }
 0x11d   :  { %v526_v45 = vadd.f32 %v2529_v2, %v525_v44  ;;  %2186 = vmatprep.mubr.msk.f32.mxu1 %vm746_vm2, %v706_v40 }
 0x11e   :  { %2187 = vmatmul.mubr.msk.f32.gmra.mrb[32].mxu1 %vm746_vm2, %v707_v42  ;;  %v709_v48 = vmax.f32 %v531_v43, 0.0 }
 0x11f   :  { %v708_v46 = vmax.f32 %v526_v45, 0.0  ;;  %v2096_v47 = vpop.f32.mrb[36].mxu0 }
 0x120   :  { %v541_v49 = vadd.f32 %v2096_v47, %v2529_v2  ;;  %v535_v50 = vpop.f32.mrb[37].mxu0 }
 0x121   :  { %v536_v51 = vadd.f32 %v2529_v2, %v535_v50  ;;  %2189 = vmatprep.mubr.msk.f32.mxu1 %vm746_vm2, %v708_v46 }
 0x122   :  { %2190 = vmatmul.mubr.msk.f32.gmra.mrb[34].mxu1 %vm746_vm2, %v709_v48  ;;  %v711_v54 = vmax.f32 %v541_v49, 0.0 }
 0x123   :  { %v710_v52 = vmax.f32 %v536_v51, 0.0  ;;  %v2099_v53 = vpop.f32.mrb[38].mxu0 }
 0x124   :  { %v551_v55 = vadd.f32 %v2099_v53, %v2529_v2  ;;  %v545_v56 = vpop.f32.mrb[39].mxu0 }
 0x125   :  { %v546_v57 = vadd.f32 %v2529_v2, %v545_v56  ;;  %2192 = vmatprep.mubr.msk.f32.mxu1 %vm746_vm2, %v710_v52 }
 0x126   :  { %2193 = vmatmul.mubr.msk.f32.gmra.mrb[36].mxu1 %vm746_vm2, %v711_v54  ;;  %v713_v60 = vmax.f32 %v551_v55, 0.0 }
 0x127   :  { %v712_v58 = vmax.f32 %v546_v57, 0.0  ;;  %v2102_v59 = vpop.f32.mrb[40].mxu0 }
 0x128   :  { %v561_v61 = vadd.f32 %v2102_v59, %v2529_v2  ;;  %v555_v62 = vpop.f32.mrb[41].mxu0 }
 0x129   :  { %v556_v63 = vadd.f32 %v2529_v2, %v555_v62  ;;  %2195 = vmatprep.mubr.msk.f32.mxu1 %vm746_vm2, %v712_v58 }
 0x12a   :  { %2196 = vmatmul.mubr.msk.f32.gmra.mrb[38].mxu1 %vm746_vm2, %v713_v60  ;;  %v715_v3 = vmax.f32 %v561_v61, 0.0 }
 0x12b   :  { %v714_v0 = vmax.f32 %v556_v63, 0.0  ;;  %v2105_v1 = vpop.f32.mrb[42].mxu0 }
 0x12c   :  { %v571_v4 = vadd.f32 %v2105_v1, %v2529_v2  ;;  %v565_v5 = vpop.f32.mrb[43].mxu0 }
 0x12d   :  { %v566_v6 = vadd.f32 %v2529_v2, %v565_v5  ;;  %2198 = vmatprep.mubr.msk.f32.mxu1 %vm746_vm2, %v714_v0 }
 0x12e   :  { %2199 = vmatmul.mubr.msk.f32.gmra.mrb[40].mxu1 %vm746_vm2, %v715_v3  ;;  %v717_v9 = vmax.f32 %v571_v4, 0.0 }
 0x12f   :  { %v716_v7 = vmax.f32 %v566_v6, 0.0  ;;  %v2108_v8 = vpop.f32.mrb[44].mxu0  ;;  %v2662_v6 = vld [vmem:[%s2988_s4] ss:$0 sm:$0xff] }
 0x130   :  { %v581_v10 = vadd.f32 %v2108_v8, %v2529_v2  ;;  %v575_v11 = vpop.f32.mrb[45].mxu0 }
 0x131   :  { %v576_v12 = vadd.f32 %v2529_v2, %v575_v11  ;;  %2201 = vmatprep.mubr.msk.f32.mxu1 %vm746_vm2, %v716_v7 }
 0x132   :  { %2202 = vmatmul.mubr.msk.f32.gmra.mrb[42].mxu1 %vm746_vm2, %v717_v9  ;;  %v719_v15 = vmax.f32 %v581_v10, 0.0 }
 0x133   :  { %v718_v13 = vmax.f32 %v576_v12, 0.0  ;;  %v2111_v14 = vpop.f32.mrb[46].mxu0 }
 0x134   :  { %v591_v16 = vadd.f32 %v2111_v14, %v2529_v2  ;;  %v585_v17 = vpop.f32.mrb[47].mxu0 }
 0x135   :  { %v586_v18 = vadd.f32 %v2529_v2, %v585_v17  ;;  %2204 = vmatprep.mubr.msk.f32.mxu1 %vm746_vm2, %v718_v13 }
 0x136   :  { %2205 = vmatmul.mubr.msk.f32.gmra.mrb[44].mxu1 %vm746_vm2, %v719_v15  ;;  %v721_v21 = vmax.f32 %v591_v16, 0.0 }
 0x137   :  { %v720_v19 = vmax.f32 %v586_v18, 0.0  ;;  %v2114_v20 = vpop.f32.mrb[48].mxu0 }
 0x138   :  { %v601_v22 = vadd.f32 %v2114_v20, %v2529_v2  ;;  %v595_v23 = vpop.f32.mrb[49].mxu0 }
 0x139   :  { %v596_v24 = vadd.f32 %v2529_v2, %v595_v23  ;;  %2207 = vmatprep.mubr.msk.f32.mxu1 %vm746_vm2, %v720_v19 }
 0x13a   :  { %2208 = vmatmul.mubr.msk.f32.gmra.mrb[46].mxu1 %vm746_vm2, %v721_v21  ;;  %v723_v27 = vmax.f32 %v601_v22, 0.0 }
 0x13b   :  { %v722_v25 = vmax.f32 %v596_v24, 0.0  ;;  %v2117_v26 = vpop.f32.mrb[50].mxu0 }
 0x13c   :  { %v611_v28 = vadd.f32 %v2117_v26, %v2529_v2  ;;  %v605_v29 = vpop.f32.mrb[51].mxu0 }
 0x13d   :  { %v606_v30 = vadd.f32 %v2529_v2, %v605_v29  ;;  %2210 = vmatprep.mubr.msk.f32.mxu1 %vm746_vm2, %v722_v25 }
 0x13e   :  { %2211 = vmatmul.mubr.msk.f32.gmra.mrb[48].mxu1 %vm746_vm2, %v723_v27  ;;  %v725_v33 = vmax.f32 %v611_v28, 0.0 }
 0x13f   :  { %v724_v31 = vmax.f32 %v606_v30, 0.0  ;;  %v2120_v32 = vpop.f32.mrb[52].mxu0 }
 0x140   :  { %v621_v34 = vadd.f32 %v2120_v32, %v2529_v2  ;;  %v615_v35 = vpop.f32.mrb[53].mxu0 }
 0x141   :  { %v616_v36 = vadd.f32 %v2529_v2, %v615_v35  ;;  %2213 = vmatprep.mubr.msk.f32.mxu1 %vm746_vm2, %v724_v31 }
 0x142   :  { %2214 = vmatmul.mubr.msk.f32.gmra.mrb[50].mxu1 %vm746_vm2, %v725_v33  ;;  %v727_v39 = vmax.f32 %v621_v34, 0.0 }
 0x143   :  { %v726_v37 = vmax.f32 %v616_v36, 0.0  ;;  %v2123_v38 = vpop.f32.mrb[54].mxu0 }
 0x144   :  { %v631_v40 = vadd.f32 %v2123_v38, %v2529_v2  ;;  %v625_v41 = vpop.f32.mrb[55].mxu0 }
 0x145   :  { %v626_v42 = vadd.f32 %v2529_v2, %v625_v41  ;;  %2216 = vmatprep.mubr.msk.f32.mxu1 %vm746_vm2, %v726_v37 }
 0x146   :  { %2217 = vmatmul.mubr.msk.f32.gmra.mrb[52].mxu1 %vm746_vm2, %v727_v39  ;;  %v729_v45 = vmax.f32 %v631_v40, 0.0 }
 0x147   :  { %v728_v43 = vmax.f32 %v626_v42, 0.0  ;;  %v2126_v44 = vpop.f32.mrb[56].mxu0 }
 0x148   :  { %v641_v46 = vadd.f32 %v2126_v44, %v2529_v2  ;;  %v635_v47 = vpop.f32.mrb[57].mxu0 }
 0x149   :  { %v636_v48 = vadd.f32 %v2529_v2, %v635_v47  ;;  %2219 = vmatprep.mubr.msk.f32.mxu1 %vm746_vm2, %v728_v43 }
 0x14a   :  { %2220 = vmatmul.mubr.msk.f32.gmra.mrb[54].mxu1 %vm746_vm2, %v729_v45  ;;  %v731_v51 = vmax.f32 %v641_v46, 0.0 }
 0x14b   :  { %v730_v49 = vmax.f32 %v636_v48, 0.0  ;;  %v2129_v50 = vpop.f32.mrb[58].mxu0 }
 0x14c   :  { %v651_v52 = vadd.f32 %v2129_v50, %v2529_v2  ;;  %v645_v53 = vpop.f32.mrb[59].mxu0 }
 0x14d   :  { %v646_v54 = vadd.f32 %v2529_v2, %v645_v53  ;;  %2222 = vmatprep.mubr.msk.f32.mxu1 %vm746_vm2, %v730_v49 }
 0x14e   :  { %2223 = vmatmul.mubr.msk.f32.gmra.mrb[56].mxu1 %vm746_vm2, %v731_v51  ;;  %v733_v57 = vmax.f32 %v651_v52, 0.0 }
 0x14f   :  { %v732_v55 = vmax.f32 %v646_v54, 0.0  ;;  %v2132_v56 = vpop.f32.mrb[60].mxu0 }
 0x150   :  { %v661_v58 = vadd.f32 %v2132_v56, %v2529_v2  ;;  %v655_v59 = vpop.f32.mrb[61].mxu0 }
 0x151   :  { %v656_v60 = vadd.f32 %v2529_v2, %v655_v59  ;;  %2225 = vmatprep.mubr.msk.f32.mxu1 %vm746_vm2, %v732_v55 }
 0x152   :  { %2226 = vmatmul.mubr.msk.f32.gmra.mrb[58].mxu1 %vm746_vm2, %v733_v57  ;;  %v735_v63 = vmax.f32 %v661_v58, 0.0 }
 0x153   :  { %v734_v61 = vmax.f32 %v656_v60, 0.0  ;;  %v2135_v62 = vpop.f32.mrb[62].mxu0 }
 0x154   :  { %v671_v0 = vadd.f32 %v2135_v62, %v2529_v2  ;;  %v665_v1 = vpop.f32.mrb[63].mxu0 }
 0x155   :  { %v666_v3 = vadd.f32 %v2529_v2, %v665_v1  ;;  %2228 = vmatprep.mubr.msk.f32.mxu1 %vm746_vm2, %v734_v61 }
 0x156   :  { %2229 = vmatmul.mubr.msk.f32.gmra.mrb[60].mxu1 %vm746_vm2, %v735_v63  ;;  %v737_v5 = vmax.f32 %v671_v0, 0.0 }
 0x157   :  { %v736_v4 = vmax.f32 %v666_v3, 0.0 }
 0x159   :  { %2231 = vmatprep.mubr.msk.f32.mxu1 %vm746_vm2, %v736_v4 }
 0x15a   :  { %2232 = vmatmul.mubr.msk.f32.gmra.mrb[62].mxu1 %vm746_vm2, %v737_v5 }
 0x1b1   :  { %v2140_v7 = vpop.f32.mrb[0].mxu1 }
 0x1b2   :  { %v1011_v8 = vadd.f32 %v2140_v7, %v2662_v6  ;;  %v1005_v9 = vpop.f32.mrb[1].mxu1 }
 0x1b3   :  { %v1006_v2 = vadd.f32 %v2662_v6, %v1005_v9 }
 0x1b4   :  { %v1845_v10 = vpack.c.bf16 %v1011_v8, %v1011_v8 }
 0x1b5   :  { %v1844_v11 = vpack.c.bf16 %v1006_v2, %v1006_v2  ;;  %v2143_v12 = vpop.f32.mrb[2].mxu1 }
 0x1b6   :  { %1582 = vst.msk [vmem:[%s2989_s5 + $0x4] sm:$0xf] %vm1580_vm3, %v1845_v10  ;;  %v1021_v13 = vadd.f32 %v2143_v12, %v2662_v6  ;;  %v1015_v14 = vpop.f32.mrb[3].mxu1 }
 0x1b7   :  { %1581 = vst.msk [vmem:[%s2989_s5] sm:$0xf] %vm1580_vm3, %v1844_v11  ;;  %v1016_v15 = vadd.f32 %v2662_v6, %v1015_v14 }
 0x1b8   :  { %v1847_v16 = vpack.c.bf16 %v1021_v13, %v1021_v13 }
 0x1b9   :  { %v1846_v17 = vpack.c.bf16 %v1016_v15, %v1016_v15  ;;  %v2146_v18 = vpop.f32.mrb[4].mxu1 }
 0x1ba   :  { %1584 = vst.msk [vmem:[%s2989_s5 + $0xc] sm:$0xf] %vm1580_vm3, %v1847_v16  ;;  %v1031_v19 = vadd.f32 %v2146_v18, %v2662_v6  ;;  %v1025_v20 = vpop.f32.mrb[5].mxu1 }
 0x1bb   :  { %1583 = vst.msk [vmem:[%s2989_s5 + $0x8] sm:$0xf] %vm1580_vm3, %v1846_v17  ;;  %v1026_v21 = vadd.f32 %v2662_v6, %v1025_v20 }
 0x1bc   :  { %v1849_v22 = vpack.c.bf16 %v1031_v19, %v1031_v19 }
 0x1bd   :  { %v1848_v23 = vpack.c.bf16 %v1026_v21, %v1026_v21  ;;  %v2149_v24 = vpop.f32.mrb[6].mxu1 }
 0x1be   :  { %1586 = vst.msk [vmem:[%s2989_s5 + $0x14] sm:$0xf] %vm1580_vm3, %v1849_v22  ;;  %v1041_v25 = vadd.f32 %v2149_v24, %v2662_v6  ;;  %v1035_v26 = vpop.f32.mrb[7].mxu1 }
 0x1bf   :  { %1585 = vst.msk [vmem:[%s2989_s5 + $0x10] sm:$0xf] %vm1580_vm3, %v1848_v23  ;;  %v1036_v27 = vadd.f32 %v2662_v6, %v1035_v26 }
 0x1c0   :  { %v1851_v28 = vpack.c.bf16 %v1041_v25, %v1041_v25 }
 0x1c1   :  { %v1850_v29 = vpack.c.bf16 %v1036_v27, %v1036_v27  ;;  %v2152_v30 = vpop.f32.mrb[8].mxu1 }
 0x1c2   :  { %1588 = vst.msk [vmem:[%s2989_s5 + $0x1c] sm:$0xf] %vm1580_vm3, %v1851_v28  ;;  %v1051_v31 = vadd.f32 %v2152_v30, %v2662_v6  ;;  %v1045_v32 = vpop.f32.mrb[9].mxu1 }
 0x1c3   :  { %1587 = vst.msk [vmem:[%s2989_s5 + $0x18] sm:$0xf] %vm1580_vm3, %v1850_v29  ;;  %v1046_v33 = vadd.f32 %v2662_v6, %v1045_v32 }
 0x1c4   :  { %v1853_v34 = vpack.c.bf16 %v1051_v31, %v1051_v31 }
 0x1c5   :  { %v1852_v35 = vpack.c.bf16 %v1046_v33, %v1046_v33  ;;  %v2155_v36 = vpop.f32.mrb[10].mxu1 }
 0x1c6   :  { %1590 = vst.msk [vmem:[%s2989_s5 + $0x24] sm:$0xf] %vm1580_vm3, %v1853_v34  ;;  %v1061_v37 = vadd.f32 %v2155_v36, %v2662_v6  ;;  %v1055_v38 = vpop.f32.mrb[11].mxu1 }
 0x1c7   :  { %1589 = vst.msk [vmem:[%s2989_s5 + $0x20] sm:$0xf] %vm1580_vm3, %v1852_v35  ;;  %v1056_v39 = vadd.f32 %v2662_v6, %v1055_v38 }
 0x1c8   :  { %v1855_v40 = vpack.c.bf16 %v1061_v37, %v1061_v37 }
 0x1c9   :  { %v1854_v41 = vpack.c.bf16 %v1056_v39, %v1056_v39  ;;  %v2158_v42 = vpop.f32.mrb[12].mxu1 }
 0x1ca   :  { %1592 = vst.msk [vmem:[%s2989_s5 + $0x2c] sm:$0xf] %vm1580_vm3, %v1855_v40  ;;  %v1071_v43 = vadd.f32 %v2158_v42, %v2662_v6  ;;  %v1065_v44 = vpop.f32.mrb[13].mxu1 }
 0x1cb   :  { %1591 = vst.msk [vmem:[%s2989_s5 + $0x28] sm:$0xf] %vm1580_vm3, %v1854_v41  ;;  %v1066_v45 = vadd.f32 %v2662_v6, %v1065_v44 }
 0x1cc   :  { %v1857_v46 = vpack.c.bf16 %v1071_v43, %v1071_v43 }
 0x1cd   :  { %v1856_v47 = vpack.c.bf16 %v1066_v45, %v1066_v45  ;;  %v2161_v48 = vpop.f32.mrb[14].mxu1 }
 0x1ce   :  { %1594 = vst.msk [vmem:[%s2989_s5 + $0x34] sm:$0xf] %vm1580_vm3, %v1857_v46  ;;  %v1081_v49 = vadd.f32 %v2161_v48, %v2662_v6  ;;  %v1075_v50 = vpop.f32.mrb[15].mxu1 }
 0x1cf   :  { %1593 = vst.msk [vmem:[%s2989_s5 + $0x30] sm:$0xf] %vm1580_vm3, %v1856_v47  ;;  %v1076_v51 = vadd.f32 %v2662_v6, %v1075_v50 }
 0x1d0   :  { %v1859_v52 = vpack.c.bf16 %v1081_v49, %v1081_v49 }
 0x1d1   :  { %v1858_v53 = vpack.c.bf16 %v1076_v51, %v1076_v51  ;;  %v2164_v54 = vpop.f32.mrb[16].mxu1 }
 0x1d2   :  { %1596 = vst.msk [vmem:[%s2989_s5 + $0x3c] sm:$0xf] %vm1580_vm3, %v1859_v52  ;;  %v1091_v55 = vadd.f32 %v2164_v54, %v2662_v6  ;;  %v1085_v56 = vpop.f32.mrb[17].mxu1 }
 0x1d3   :  { %1595 = vst.msk [vmem:[%s2989_s5 + $0x38] sm:$0xf] %vm1580_vm3, %v1858_v53  ;;  %v1086_v57 = vadd.f32 %v2662_v6, %v1085_v56 }
 0x1d4   :  { %v1861_v58 = vpack.c.bf16 %v1091_v55, %v1091_v55 }
 0x1d5   :  { %v1860_v59 = vpack.c.bf16 %v1086_v57, %v1086_v57  ;;  %v2167_v60 = vpop.f32.mrb[18].mxu1 }
 0x1d6   :  { %1598 = vst.msk [vmem:[%s2989_s5 + $0x44] sm:$0xf] %vm1580_vm3, %v1861_v58  ;;  %v1101_v61 = vadd.f32 %v2167_v60, %v2662_v6  ;;  %v1095_v62 = vpop.f32.mrb[19].mxu1 }
 0x1d7   :  { %1597 = vst.msk [vmem:[%s2989_s5 + $0x40] sm:$0xf] %vm1580_vm3, %v1860_v59  ;;  %v1096_v63 = vadd.f32 %v2662_v6, %v1095_v62 }
 0x1d8   :  { %v1863_v0 = vpack.c.bf16 %v1101_v61, %v1101_v61 }
 0x1d9   :  { %v1862_v1 = vpack.c.bf16 %v1096_v63, %v1096_v63  ;;  %v2170_v3 = vpop.f32.mrb[20].mxu1 }
 0x1da   :  { %1600 = vst.msk [vmem:[%s2989_s5 + $0x4c] sm:$0xf] %vm1580_vm3, %v1863_v0  ;;  %v1111_v4 = vadd.f32 %v2170_v3, %v2662_v6  ;;  %v1105_v5 = vpop.f32.mrb[21].mxu1 }
 0x1db   :  { %1599 = vst.msk [vmem:[%s2989_s5 + $0x48] sm:$0xf] %vm1580_vm3, %v1862_v1  ;;  %v1106_v7 = vadd.f32 %v2662_v6, %v1105_v5 }
 0x1dc   :  { %v1865_v8 = vpack.c.bf16 %v1111_v4, %v1111_v4 }
 0x1dd   :  { %v1864_v9 = vpack.c.bf16 %v1106_v7, %v1106_v7  ;;  %v2173_v2 = vpop.f32.mrb[22].mxu1 }
 0x1de   :  { %1602 = vst.msk [vmem:[%s2989_s5 + $0x54] sm:$0xf] %vm1580_vm3, %v1865_v8  ;;  %v1121_v10 = vadd.f32 %v2173_v2, %v2662_v6  ;;  %v1115_v11 = vpop.f32.mrb[23].mxu1 }
 0x1df   :  { %1601 = vst.msk [vmem:[%s2989_s5 + $0x50] sm:$0xf] %vm1580_vm3, %v1864_v9  ;;  %v1116_v12 = vadd.f32 %v2662_v6, %v1115_v11 }
 0x1e0   :  { %v1867_v13 = vpack.c.bf16 %v1121_v10, %v1121_v10 }
 0x1e1   :  { %v1866_v14 = vpack.c.bf16 %v1116_v12, %v1116_v12  ;;  %v2176_v15 = vpop.f32.mrb[24].mxu1 }
 0x1e2   :  { %1604 = vst.msk [vmem:[%s2989_s5 + $0x5c] sm:$0xf] %vm1580_vm3, %v1867_v13  ;;  %v1131_v16 = vadd.f32 %v2176_v15, %v2662_v6  ;;  %v1125_v17 = vpop.f32.mrb[25].mxu1 }
 0x1e3   :  { %1603 = vst.msk [vmem:[%s2989_s5 + $0x58] sm:$0xf] %vm1580_vm3, %v1866_v14  ;;  %v1126_v18 = vadd.f32 %v2662_v6, %v1125_v17 }
 0x1e4   :  { %v1869_v19 = vpack.c.bf16 %v1131_v16, %v1131_v16 }
 0x1e5   :  { %v1868_v20 = vpack.c.bf16 %v1126_v18, %v1126_v18  ;;  %v2179_v21 = vpop.f32.mrb[26].mxu1 }
 0x1e6   :  { %1606 = vst.msk [vmem:[%s2989_s5 + $0x64] sm:$0xf] %vm1580_vm3, %v1869_v19  ;;  %v1141_v22 = vadd.f32 %v2179_v21, %v2662_v6  ;;  %v1135_v23 = vpop.f32.mrb[27].mxu1 }
 0x1e7   :  { %1605 = vst.msk [vmem:[%s2989_s5 + $0x60] sm:$0xf] %vm1580_vm3, %v1868_v20  ;;  %v1136_v24 = vadd.f32 %v2662_v6, %v1135_v23 }
 0x1e8   :  { %v1871_v25 = vpack.c.bf16 %v1141_v22, %v1141_v22 }
 0x1e9   :  { %v1870_v26 = vpack.c.bf16 %v1136_v24, %v1136_v24  ;;  %v2182_v27 = vpop.f32.mrb[28].mxu1 }
 0x1ea   :  { %1608 = vst.msk [vmem:[%s2989_s5 + $0x6c] sm:$0xf] %vm1580_vm3, %v1871_v25  ;;  %v1151_v28 = vadd.f32 %v2182_v27, %v2662_v6  ;;  %v1145_v29 = vpop.f32.mrb[29].mxu1 }
 0x1eb   :  { %1607 = vst.msk [vmem:[%s2989_s5 + $0x68] sm:$0xf] %vm1580_vm3, %v1870_v26  ;;  %v1146_v30 = vadd.f32 %v2662_v6, %v1145_v29 }
 0x1ec   :  { %v1873_v31 = vpack.c.bf16 %v1151_v28, %v1151_v28 }
 0x1ed   :  { %v1872_v32 = vpack.c.bf16 %v1146_v30, %v1146_v30  ;;  %v2185_v33 = vpop.f32.mrb[30].mxu1 }
 0x1ee   :  { %1610 = vst.msk [vmem:[%s2989_s5 + $0x74] sm:$0xf] %vm1580_vm3, %v1873_v31  ;;  %v1161_v34 = vadd.f32 %v2185_v33, %v2662_v6  ;;  %v1155_v35 = vpop.f32.mrb[31].mxu1 }
 0x1ef   :  { %1609 = vst.msk [vmem:[%s2989_s5 + $0x70] sm:$0xf] %vm1580_vm3, %v1872_v32  ;;  %v1156_v36 = vadd.f32 %v2662_v6, %v1155_v35 }
 0x1f0   :  { %v1875_v37 = vpack.c.bf16 %v1161_v34, %v1161_v34 }
 0x1f1   :  { %v1874_v38 = vpack.c.bf16 %v1156_v36, %v1156_v36  ;;  %v2188_v39 = vpop.f32.mrb[32].mxu1 }
 0x1f2   :  { %1612 = vst.msk [vmem:[%s2989_s5 + $0x7c] sm:$0xf] %vm1580_vm3, %v1875_v37  ;;  %v1171_v40 = vadd.f32 %v2188_v39, %v2662_v6  ;;  %v1165_v41 = vpop.f32.mrb[33].mxu1 }
 0x1f3   :  { %1611 = vst.msk [vmem:[%s2989_s5 + $0x78] sm:$0xf] %vm1580_vm3, %v1874_v38  ;;  %v1166_v42 = vadd.f32 %v2662_v6, %v1165_v41 }
 0x1f4   :  { %v1877_v43 = vpack.c.bf16 %v1171_v40, %v1171_v40 }
 0x1f5   :  { %v1876_v44 = vpack.c.bf16 %v1166_v42, %v1166_v42  ;;  %v2191_v45 = vpop.f32.mrb[34].mxu1 }
 0x1f6   :  { %1614 = vst.msk [vmem:[%s2989_s5 + $0x84] sm:$0xf] %vm1580_vm3, %v1877_v43  ;;  %v1181_v46 = vadd.f32 %v2191_v45, %v2662_v6  ;;  %v1175_v47 = vpop.f32.mrb[35].mxu1 }
 0x1f7   :  { %1613 = vst.msk [vmem:[%s2989_s5 + $0x80] sm:$0xf] %vm1580_vm3, %v1876_v44  ;;  %v1176_v48 = vadd.f32 %v2662_v6, %v1175_v47 }
 0x1f8   :  { %v1879_v49 = vpack.c.bf16 %v1181_v46, %v1181_v46 }
 0x1f9   :  { %v1878_v50 = vpack.c.bf16 %v1176_v48, %v1176_v48  ;;  %v2194_v51 = vpop.f32.mrb[36].mxu1 }
 0x1fa   :  { %1616 = vst.msk [vmem:[%s2989_s5 + $0x8c] sm:$0xf] %vm1580_vm3, %v1879_v49  ;;  %v1191_v52 = vadd.f32 %v2194_v51, %v2662_v6  ;;  %v1185_v53 = vpop.f32.mrb[37].mxu1 }
 0x1fb   :  { %1615 = vst.msk [vmem:[%s2989_s5 + $0x88] sm:$0xf] %vm1580_vm3, %v1878_v50  ;;  %v1186_v54 = vadd.f32 %v2662_v6, %v1185_v53 }
 0x1fc   :  { %v1881_v55 = vpack.c.bf16 %v1191_v52, %v1191_v52 }
 0x1fd   :  { %v1880_v56 = vpack.c.bf16 %v1186_v54, %v1186_v54  ;;  %v2197_v57 = vpop.f32.mrb[38].mxu1 }
 0x1fe   :  { %1618 = vst.msk [vmem:[%s2989_s5 + $0x94] sm:$0xf] %vm1580_vm3, %v1881_v55  ;;  %v1201_v58 = vadd.f32 %v2197_v57, %v2662_v6  ;;  %v1195_v59 = vpop.f32.mrb[39].mxu1 }
 0x1ff   :  { %1617 = vst.msk [vmem:[%s2989_s5 + $0x90] sm:$0xf] %vm1580_vm3, %v1880_v56  ;;  %v1196_v60 = vadd.f32 %v2662_v6, %v1195_v59 }
 0x200   :  { %v1883_v61 = vpack.c.bf16 %v1201_v58, %v1201_v58 }
 0x201   :  { %v1882_v62 = vpack.c.bf16 %v1196_v60, %v1196_v60  ;;  %v2200_v63 = vpop.f32.mrb[40].mxu1 }
 0x202   :  { %1620 = vst.msk [vmem:[%s2989_s5 + $0x9c] sm:$0xf] %vm1580_vm3, %v1883_v61  ;;  %v1211_v0 = vadd.f32 %v2200_v63, %v2662_v6  ;;  %v1205_v1 = vpop.f32.mrb[41].mxu1 }
 0x203   :  { %1619 = vst.msk [vmem:[%s2989_s5 + $0x98] sm:$0xf] %vm1580_vm3, %v1882_v62  ;;  %v1206_v3 = vadd.f32 %v2662_v6, %v1205_v1 }
 0x204   :  { %v1885_v4 = vpack.c.bf16 %v1211_v0, %v1211_v0 }
 0x205   :  { %v1884_v5 = vpack.c.bf16 %v1206_v3, %v1206_v3  ;;  %v2203_v7 = vpop.f32.mrb[42].mxu1 }
 0x206   :  { %1622 = vst.msk [vmem:[%s2989_s5 + $0xa4] sm:$0xf] %vm1580_vm3, %v1885_v4  ;;  %v1221_v8 = vadd.f32 %v2203_v7, %v2662_v6  ;;  %v1215_v9 = vpop.f32.mrb[43].mxu1 }
 0x207   :  { %1621 = vst.msk [vmem:[%s2989_s5 + $0xa0] sm:$0xf] %vm1580_vm3, %v1884_v5  ;;  %v1216_v2 = vadd.f32 %v2662_v6, %v1215_v9 }
 0x208   :  { %v1887_v10 = vpack.c.bf16 %v1221_v8, %v1221_v8 }
 0x209   :  { %v1886_v11 = vpack.c.bf16 %v1216_v2, %v1216_v2  ;;  %v2206_v12 = vpop.f32.mrb[44].mxu1 }
 0x20a   :  { %1624 = vst.msk [vmem:[%s2989_s5 + $0xac] sm:$0xf] %vm1580_vm3, %v1887_v10  ;;  %v1231_v13 = vadd.f32 %v2206_v12, %v2662_v6  ;;  %v1225_v14 = vpop.f32.mrb[45].mxu1 }
 0x20b   :  { %1623 = vst.msk [vmem:[%s2989_s5 + $0xa8] sm:$0xf] %vm1580_vm3, %v1886_v11  ;;  %v1226_v15 = vadd.f32 %v2662_v6, %v1225_v14 }
 0x20c   :  { %v1889_v16 = vpack.c.bf16 %v1231_v13, %v1231_v13 }
 0x20d   :  { %v1888_v17 = vpack.c.bf16 %v1226_v15, %v1226_v15  ;;  %v2209_v18 = vpop.f32.mrb[46].mxu1 }
 0x20e   :  { %1626 = vst.msk [vmem:[%s2989_s5 + $0xb4] sm:$0xf] %vm1580_vm3, %v1889_v16  ;;  %v1241_v19 = vadd.f32 %v2209_v18, %v2662_v6  ;;  %v1235_v20 = vpop.f32.mrb[47].mxu1 }
 0x20f   :  { %1625 = vst.msk [vmem:[%s2989_s5 + $0xb0] sm:$0xf] %vm1580_vm3, %v1888_v17  ;;  %v1236_v21 = vadd.f32 %v2662_v6, %v1235_v20 }
 0x210   :  { %v1891_v22 = vpack.c.bf16 %v1241_v19, %v1241_v19 }
 0x211   :  { %v1890_v23 = vpack.c.bf16 %v1236_v21, %v1236_v21  ;;  %v2212_v24 = vpop.f32.mrb[48].mxu1 }
 0x212   :  { %1628 = vst.msk [vmem:[%s2989_s5 + $0xbc] sm:$0xf] %vm1580_vm3, %v1891_v22  ;;  %v1251_v25 = vadd.f32 %v2212_v24, %v2662_v6  ;;  %v1245_v26 = vpop.f32.mrb[49].mxu1 }
 0x213   :  { %1627 = vst.msk [vmem:[%s2989_s5 + $0xb8] sm:$0xf] %vm1580_vm3, %v1890_v23  ;;  %v1246_v27 = vadd.f32 %v2662_v6, %v1245_v26 }
 0x214   :  { %v1893_v28 = vpack.c.bf16 %v1251_v25, %v1251_v25 }
 0x215   :  { %v1892_v29 = vpack.c.bf16 %v1246_v27, %v1246_v27  ;;  %v2215_v30 = vpop.f32.mrb[50].mxu1 }
 0x216   :  { %1630 = vst.msk [vmem:[%s2989_s5 + $0xc4] sm:$0xf] %vm1580_vm3, %v1893_v28  ;;  %v1261_v31 = vadd.f32 %v2215_v30, %v2662_v6  ;;  %v1255_v32 = vpop.f32.mrb[51].mxu1 }
 0x217   :  { %1629 = vst.msk [vmem:[%s2989_s5 + $0xc0] sm:$0xf] %vm1580_vm3, %v1892_v29  ;;  %v1256_v33 = vadd.f32 %v2662_v6, %v1255_v32 }
 0x218   :  { %v1895_v34 = vpack.c.bf16 %v1261_v31, %v1261_v31 }
 0x219   :  { %v1894_v35 = vpack.c.bf16 %v1256_v33, %v1256_v33  ;;  %v2218_v36 = vpop.f32.mrb[52].mxu1 }
 0x21a   :  { %1632 = vst.msk [vmem:[%s2989_s5 + $0xcc] sm:$0xf] %vm1580_vm3, %v1895_v34  ;;  %v1271_v37 = vadd.f32 %v2218_v36, %v2662_v6  ;;  %v1265_v38 = vpop.f32.mrb[53].mxu1 }
 0x21b   :  { %1631 = vst.msk [vmem:[%s2989_s5 + $0xc8] sm:$0xf] %vm1580_vm3, %v1894_v35  ;;  %v1266_v39 = vadd.f32 %v2662_v6, %v1265_v38 }
 0x21c   :  { %v1897_v40 = vpack.c.bf16 %v1271_v37, %v1271_v37 }
 0x21d   :  { %v1896_v41 = vpack.c.bf16 %v1266_v39, %v1266_v39  ;;  %v2221_v42 = vpop.f32.mrb[54].mxu1 }
 0x21e   :  { %1634 = vst.msk [vmem:[%s2989_s5 + $0xd4] sm:$0xf] %vm1580_vm3, %v1897_v40  ;;  %v1281_v43 = vadd.f32 %v2221_v42, %v2662_v6  ;;  %v1275_v44 = vpop.f32.mrb[55].mxu1 }
 0x21f   :  { %1633 = vst.msk [vmem:[%s2989_s5 + $0xd0] sm:$0xf] %vm1580_vm3, %v1896_v41  ;;  %v1276_v45 = vadd.f32 %v2662_v6, %v1275_v44 }
 0x220   :  { %v1899_v46 = vpack.c.bf16 %v1281_v43, %v1281_v43 }
 0x221   :  { %v1898_v47 = vpack.c.bf16 %v1276_v45, %v1276_v45  ;;  %v2224_v48 = vpop.f32.mrb[56].mxu1 }
 0x222   :  { %1636 = vst.msk [vmem:[%s2989_s5 + $0xdc] sm:$0xf] %vm1580_vm3, %v1899_v46  ;;  %v1291_v49 = vadd.f32 %v2224_v48, %v2662_v6  ;;  %v1285_v50 = vpop.f32.mrb[57].mxu1 }
 0x223   :  { %1635 = vst.msk [vmem:[%s2989_s5 + $0xd8] sm:$0xf] %vm1580_vm3, %v1898_v47  ;;  %v1286_v51 = vadd.f32 %v2662_v6, %v1285_v50 }
 0x224   :  { %v1901_v52 = vpack.c.bf16 %v1291_v49, %v1291_v49 }
 0x225   :  { %v1900_v53 = vpack.c.bf16 %v1286_v51, %v1286_v51  ;;  %v2227_v54 = vpop.f32.mrb[58].mxu1 }
 0x226   :  { %1638 = vst.msk [vmem:[%s2989_s5 + $0xe4] sm:$0xf] %vm1580_vm3, %v1901_v52  ;;  %v1301_v55 = vadd.f32 %v2227_v54, %v2662_v6  ;;  %v1295_v56 = vpop.f32.mrb[59].mxu1 }
 0x227   :  { %1637 = vst.msk [vmem:[%s2989_s5 + $0xe0] sm:$0xf] %vm1580_vm3, %v1900_v53  ;;  %v1296_v57 = vadd.f32 %v2662_v6, %v1295_v56 }
 0x228   :  { %v1903_v58 = vpack.c.bf16 %v1301_v55, %v1301_v55 }
 0x229   :  { %v1902_v59 = vpack.c.bf16 %v1296_v57, %v1296_v57  ;;  %v2230_v60 = vpop.f32.mrb[60].mxu1 }
 0x22a   :  { %1640 = vst.msk [vmem:[%s2989_s5 + $0xec] sm:$0xf] %vm1580_vm3, %v1903_v58  ;;  %v1311_v61 = vadd.f32 %v2230_v60, %v2662_v6  ;;  %v1305_v62 = vpop.f32.mrb[61].mxu1 }
 0x22b   :  { %1639 = vst.msk [vmem:[%s2989_s5 + $0xe8] sm:$0xf] %vm1580_vm3, %v1902_v59  ;;  %v1306_v63 = vadd.f32 %v2662_v6, %v1305_v62 }
 0x22c   :  { %v1905_v0 = vpack.c.bf16 %v1311_v61, %v1311_v61 }
 0x22d   :  { %v1904_v1 = vpack.c.bf16 %v1306_v63, %v1306_v63  ;;  %v2233_v3 = vpop.f32.mrb[62].mxu1 }
 0x22e   :  { %1642 = vst.msk [vmem:[%s2989_s5 + $0xf4] sm:$0xf] %vm1580_vm3, %v1905_v0  ;;  %v1321_v4 = vadd.f32 %v2233_v3, %v2662_v6  ;;  %v1315_v5 = vpop.f32.mrb[63].mxu1 }
 0x22f   :  { %1641 = vst.msk [vmem:[%s2989_s5 + $0xf0] sm:$0xf] %vm1580_vm3, %v1904_v1  ;;  %v1316_v7 = vadd.f32 %v2662_v6, %v1315_v5 }
 0x230   :  { %v1907_v8 = vpack.c.bf16 %v1321_v4, %v1321_v4 }
 0x231   :  { %v1906_v9 = vpack.c.bf16 %v1316_v7, %v1316_v7 }
 0x232   :  { %1644 = vst.msk [vmem:[%s2989_s5 + $0xfc] sm:$0xf] %vm1580_vm3, %v1907_v8 }
 0x233   :  { %1643 = vst.msk [vmem:[%s2989_s5 + $0xf8] sm:$0xf] %vm1580_vm3, %v1906_v9 }

// kernel: forward.6
= control target key start
LH: loop header
LB: loop body
LE: loop exit
PB: predicated region body
PF: predicated region fallthrough
CT: control target
= control target key end

     0   :  { %vm45_vm0 = vcmask 1043456   ;;  %vm32_vm1 = vcmask 31744   ;;  %vm149_vm2 = vcmask 261120   ;;  %vm263_vm3 = vcmask 257024   ;;  %s417_s1 = inlined_call_operand.vmem [shape: f32[4,32], index: 1, kind: input, shape index: {}]   ;;  %s418_s0 = inlined_call_operand.vmem [shape: f32[32,4], index: 0, kind: input, shape index: {}]   ;;  %s419_s3 = inlined_call_operand.vmem [shape: f32[32,32], index: 3, kind: input, shape index: {}]   ;;  %s420_s2 = inlined_call_operand.vmem [shape: f32[1,32], index: 2, kind: input, shape index: {}]   ;;  %s421_s4 = inlined_call_operand.vmem [shape: f32[1,32], index: 4, kind: input, shape index: {}]   ;;  %s422_s5 = inlined_call_operand.vmem [shape: bf16[32,32], index: 5, kind: output, shape index: {}]  }
   0x1   :  { %v24_v0 = vld [vmem:[%s417_s1] sm:$0xf]  ;;  %v21_v2 = vld [vmem:[%s418_s0 + $0x8] sm:$0xff]  ;;  %v22_v3 = vld [vmem:[%s418_s0 + $0x10] sm:$0xff] }
   0x2   :  { %v20_v1 = vld [vmem:[%s418_s0] sm:$0xff]  ;;  %304 = vmatprep.subr.msk.mxu0 %vm45_vm0, %v24_v0  ;;  %v139_v5 = vld [vmem:[%s419_s3 + $0x8] sm:$0xff]  ;;  %v23_v7 = vld [vmem:[%s418_s0 + $0x18] sm:$0xff] }
   0x3   :  { %306 = vmatprep.mubr.msk.f32.mxu0 %vm32_vm1, %v20_v1  ;;  %v138_v4 = vld [vmem:[%s419_s3] sm:$0xff]  ;;  %305 = vmatpush3.msk.msra.mxu0 %vm45_vm0, %v24_v0  ;;  %v140_v8 = vld [vmem:[%s419_s3 + $0x10] sm:$0xff]  ;;  %v141_v9 = vld [vmem:[%s419_s3 + $0x18] sm:$0xff] }
   0x4   :  { %307 = vmatmul.mubr.msk.f32.vlgmr.msra.gmra.mrb[0].mxu0 %vm32_vm1, %v21_v2  ;;  %v326_v6 = vpack.c.bf16 %v139_v5, %v138_v4  ;;  %v330_v10 = vpack.c.bf16 %v141_v9, %v140_v8  ;;  %v272_v11 = vld [vmem:[%s420_s2] ss:$0 sm:$0xff] }
   0x5   :  { %309 = vmatprep.mubr.msk.f32.mxu0 %vm32_vm1, %v22_v3  ;;  %v278_v24 = vld [vmem:[%s421_s4] ss:$0 sm:$0xff] }
   0x6   :  { %327 = vmatprep.subr.bf16.mxu0 %v326_v6  ;;  %334 = vmatprep.subr.bf16.mxu1 %v326_v6 }
   0x7   :  { %329 = vmatpush3.bf16.msra.mxu0 %v326_v6  ;;  %336 = vmatpush3.bf16.msra.mxu1 %v326_v6 }
   0x8   :  { %310 = vmatmul.mubr.msk.f32.gmra.mrb[2].mxu0 %vm32_vm1, %v23_v7  ;;  %331 = vmatprep.subr.bf16.mxu0 %v330_v10 }
   0x9   :  { %335 = vmatprep.subr.bf16.mxu1 %v330_v10 }
   0xb   :  { %333 = vmatpush3.bf16.msra.mxu0 %v330_v10  ;;  %337 = vmatpush3.bf16.msra.mxu1 %v330_v10 }
  0xd7   :  { %v308_v12 = vpop.f32.mrb[0].mxu0 }
  0xd8   :  { %v121_v13 = vadd.f32 %v308_v12, %v272_v11  ;;  %v115_v14 = vpop.f32.mrb[1].mxu0 }
  0xd9   :  { %v116_v15 = vadd.f32 %v272_v11, %v115_v14 }
  0xda   :  { %v135_v18 = vmax.f32 %v121_v13, 0.0 }
  0xdb   :  { %v134_v16 = vmax.f32 %v116_v15, 0.0  ;;  %v311_v17 = vpop.f32.mrb[2].mxu0 }
  0xdc   :  { %v131_v19 = vadd.f32 %v311_v17, %v272_v11  ;;  %v125_v20 = vpop.f32.mrb[3].mxu0 }
  0xdd   :  { %v126_v21 = vadd.f32 %v272_v11, %v125_v20  ;;  %320 = vmatprep.mubr.msk.f32.mxu0 %vm149_vm2, %v134_v16 }
  0xde   :  { %321 = vmatmul.mubr.msk.f32.vlgmr.msra.gmra.mrb[4].mxu0 %vm149_vm2, %v135_v18  ;;  %v137_v23 = vmax.f32 %v131_v19, 0.0 }
  0xdf   :  { %v136_v22 = vmax.f32 %v126_v21, 0.0 }
  0xe1   :  { %323 = vmatprep.mubr.msk.f32.mxu1 %vm149_vm2, %v136_v22 }
  0xe2   :  { %324 = vmatmul.mubr.msk.f32.vlgmr.msra.gmra.mrb[0].mxu1 %vm149_vm2, %v137_v23 }
 0x1b1   :  { %v322_v25 = vpop.f32.mrb[4].mxu0 }
 0x1b2   :  { %v234_v26 = vadd.f32 %v322_v25, %v278_v24  ;;  %v228_v27 = vpop.f32.mrb[5].mxu0 }
 0x1b3   :  { %v229_v28 = vadd.f32 %v278_v24, %v228_v27 }
 0x1b4   :  { %v288_v29 = vpack.c.bf16 %v234_v26, %v234_v26 }
 0x1b5   :  { %v287_v30 = vpack.c.bf16 %v229_v28, %v229_v28  ;;  %v325_v31 = vpop.f32.mrb[0].mxu1 }
 0x1b6   :  { %265 = vst.msk [vmem:[%s422_s5 + $0x4] sm:$0xf] %vm263_vm3, %v288_v29  ;;  %v244_v32 = vadd.f32 %v325_v31, %v278_v24  ;;  %v238_v33 = vpop.f32.mrb[1].mxu1 }
 0x1b7   :  { %264 = vst.msk [vmem:[%s422_s5] sm:$0xf] %vm263_vm3, %v287_v30  ;;  %v239_v34 = vadd.f32 %v278_v24, %v238_v33 }
 0x1b8   :  { %v290_v35 = vpack.c.bf16 %v244_v32, %v244_v32 }
 0x1b9   :  { %v289_v36 = vpack.c.bf16 %v239_v34, %v239_v34 }
 0x1ba   :  { %267 = vst.msk [vmem:[%s422_s5 + $0xc] sm:$0xf] %vm263_vm3, %v290_v35 }
 0x1bb   :  { %266 = vst.msk [vmem:[%s422_s5 + $0x8] sm:$0xf] %vm263_vm3, %v289_v36 }

// kernel: forward.7
= control target key start
LH: loop header
LB: loop body
LE: loop exit
PB: predicated region body
PF: predicated region fallthrough
CT: control target
= control target key end

     0   :  { %s2828_s21 = smov 0   ;;  %s2830_s22 = smov 0   ;;  %s3535_s0 = inlined_call_operand.vmem [shape: f32[2,3,32], index: 0, kind: input, shape index: {}]   ;;  %s3536_s1 = inlined_call_operand.vmem [shape: bf16[2,256,32], index: 1, kind: input, shape index: {}]   ;;  %s3537_s2 = inlined_call_operand.vmem [shape: bf16[2,256,32], index: 2, kind: input, shape index: {}]   ;;  %s3538_s3 = inlined_call_operand.vmem [shape: bf16[2,256,32], index: 3, kind: input, shape index: {}]   ;;  %s3539_s4 = inlined_call_operand.vmem [shape: bf16[4,32,128], index: 4, kind: input, shape index: {}]   ;;  %s3540_s5 = inlined_call_operand.vmem [shape: f32[1,128], index: 5, kind: input, shape index: {}]   ;;  %s3541_s6 = inlined_call_operand.vmem [shape: f32[2,256,128], index: 6, kind: output, shape index: {}]  }
   0x1   :  { %s2832_s23 = smov 0  }
   0x2 LB: > { %s28_s24 = sadd.s32 1, %s2787_s22  ;;  %p2180_p0 = scmp.ge.s32.totalorder %s2791_s23, 1  ;;  %s2791_s23 = sphi %s2832_s23, %s16_s23   ;;  %s2787_s22 = sphi %s2830_s22, %s3560_s22   ;;  %s2783_s21 = sphi %s2828_s21, %s3559_s21  }
   0x3   : > { %p30_p1 = scmp.ge.s32.totalorder %s28_s24, 2  ;;  %p276_p2 = scmp.lt.s32.totalorder %s2791_s23, 3 }
   0x5   : > { %s3562_s24 = smov (%p30_p1, %s28_s24), 0  ;;  %p277_p3 = pnand %p2180_p0, %p276_p2 }
   0x6   : > { %v2665_v0 = vld [vmem:[%s3539_s4 + $0x10] sm:$0xff] (!%p277_p3)   ;;  %p336_p4 = scmp.lt.s32.totalorder (!%p277_p3), %s2783_s21, 1  ;;  %v2666_v1 = vld [vmem:[%s3539_s4 + $0x20] sm:$0xff] (!%p277_p3)   ;;  %v2667_v2 = vld [vmem:[%s3539_s4 + $0x18] sm:$0xff] (!%p277_p3)   ;;  %vm615_vm0 = vcmask (!%p277_p3), 261120   ;;  %v450_v22 = vlaneseq (!%p277_p3) }
   0x7   : > { %280 = sbr.rel (%p277_p3) target bundleno = 360 (0x168), region = 44  ;;  %2401 = vmatprep.subr.bf16.mxu1 (!%p277_p3), %v2665_v0  ;;  %2473 = vmatprep.subr.bf16.mxu0 (!%p277_p3), %v2666_v1  ;;  %v2668_v3 = vld [vmem:[%s3539_s4 + $0x28] sm:$0xff] (!%p277_p3)   ;;  %v2672_v4 = vld [vmem:[%s3539_s4] sm:$0xff] (!%p277_p3)   ;;  %v2674_v8 = vld [vmem:[%s3539_s4 + $0x30] sm:$0xff] (!%p277_p3)  }
   0x8   : > { %2402 = vmatpush3.bf16.msra.mxu1 (!%p277_p3), %v2665_v0  ;;  %2474 = vmatpush3.bf16.msra.mxu0 (!%p277_p3), %v2666_v1  ;;  %v2690_v12 = vld [vmem:[%s3539_s4 + $0x8] sm:$0xff] (!%p277_p3)   ;;  %v2692_v15 = vld [vmem:[%s3539_s4 + $0x38] sm:$0xff] (!%p277_p3)   ;;  %v451_v23 = vshrl.u32 (!%p277_p3), %v450_v22, 7 }
   0x9   : > { %2403 = vmatprep.subr.bf16.mxu1 (!%p277_p3), %v2667_v2  ;;  %2475 = vmatprep.subr.bf16.mxu0 (!%p277_p3), %v2668_v3 }
   0xa   : > { %v452_v28 = vsub.s32 (!%p277_p3), 0, %v451_v23  ;;  %v1160_v31 = vsub.s32 (!%p277_p3), 1, %v451_v23  ;;  %v1630_v35 = vsub.s32 (!%p277_p3), 2, %v451_v23 }
   0xc   : > { %2404 = vmatpush3.bf16.msra.mxu1 (!%p277_p3), %v2667_v2  ;;  %2476 = vmatpush3.bf16.msra.mxu0 (!%p277_p3), %v2668_v3 }
   0xd   : > { %2437 = vmatprep.subr.bf16.mxu1 (!%p277_p3), %v2672_v4  ;;  %2509 = vmatprep.subr.bf16.mxu0 (!%p277_p3), %v2674_v8 }
   0xe   : > { %s3564_s21 = smov (!%p336_p4, %s2783_s21), 1 }
   0xf   : > { %s2861_s9 = sshll.u32 %s3564_s21, 7  ;;  %s2181_s28 = sshll.u32 %s3564_s21, 2 }
  0x10   : > { %s2870_s14 = scalar_lea.vmem %s3537_s2, %s2861_s9  ;;  %s2876_s17 = scalar_lea.vmem %s3538_s3, %s2861_s9 }
  0x11   : > { %v2879_v5 = vld [vmem:[%s2870_s14] sm:$0xff]   ;;  %v2885_v7 = vld [vmem:[%s2870_s14 + $0x8] sm:$0xff]   ;;  %v2898_v10 = vld [vmem:[%s2870_s14 + $0x10] sm:$0xff]   ;;  %s339_s7 = scalar_lea.vmem %s3535_s0, %s2181_s28  ;;  %s2969_s11 = scalar_lea.vmem %s3536_s1, %s2861_s9 }
  0x12   : > { %v2882_v6 = vld [vmem:[%s2876_s17] sm:$0xff]   ;;  %2405 = vmatprep.mubr.msk.bf16.mxu1 %vm615_vm0, %v2879_v5  ;;  %v2893_v9 = vld [vmem:[%s2876_s17 + $0x8] sm:$0xff]   ;;  %v2903_v11 = vld [vmem:[%s2876_s17 + $0x10] sm:$0xff]   ;;  %v1128_v39 = vunpack.c.l.bf16 %v2885_v7  ;;  %v1129_v42 = vunpack.c.h.bf16 %v2885_v7  ;;  %v1126_v45 = vunpack.c.l.bf16 %v2879_v5  ;;  %v1127_v46 = vunpack.c.h.bf16 %v2879_v5  ;;  %s2328_s9 = sshll.u32 %s3564_s21, 8 }
  0x13   : > { %2477 = vmatprep.mubr.msk.bf16.mxu0 %vm615_vm0, %v2882_v6  ;;  %2406 = vmatmul.mubr.msk.bf16.vlgmr.msra.gmra.mrb[0].mxu1 %vm615_vm0, %v2885_v7  ;;  %v2911_v13 = vld [vmem:[%s2870_s14 + $0x18] sm:$0xff]   ;;  %v2922_v16 = vld [vmem:[%s2870_s14 + $0x20] sm:$0xff]   ;;  %v2934_v18 = vld [vmem:[%s2870_s14 + $0x28] sm:$0xff]   ;;  %v1596_v50 = vunpack.c.l.bf16 %v2882_v6  ;;  %v1598_v53 = vunpack.c.l.bf16 %v2893_v9  ;;  %v1599_v56 = vunpack.c.h.bf16 %v2893_v9  ;;  %v1597_v60 = vunpack.c.h.bf16 %v2882_v6  ;;  %s3460_s16 = scalar_lea.vmem %s3541_s6, %s2328_s9 }
  0x14   : > { %2438 = vmatpush3.bf16.msra.mxu1 %v2672_v4  ;;  %2478 = vmatmul.mubr.msk.bf16.vlgmr.msra.gmra.mrb[0].mxu0 %vm615_vm0, %v2893_v9  ;;  %v2914_v14 = vld [vmem:[%s2876_s17 + $0x18] sm:$0xff]   ;;  %v2927_v17 = vld [vmem:[%s2876_s17 + $0x20] sm:$0xff]   ;;  %v2939_v19 = vld [vmem:[%s2870_s14 + $0x30] sm:$0xff]   ;;  %v1130_v9 = vunpack.c.l.bf16 %v2898_v10  ;;  %v1132_v22 = vunpack.c.l.bf16 %v2911_v13 }
  0x15   : > { %2510 = vmatpush3.bf16.msra.mxu0 %v2674_v8  ;;  %2439 = vmatprep.subr.bf16.mxu1 %v2690_v12  ;;  %v2944_v20 = vld [vmem:[%s2876_s17 + $0x28] sm:$0xff]   ;;  %v2947_v21 = vld [vmem:[%s2876_s17 + $0x30] sm:$0xff]   ;;  %v2955_v24 = vld [vmem:[%s2870_s14 + $0x38] sm:$0xff]  }
  0x16   : > { %2409 = vmatprep.mubr.msk.bf16.mxu1 %vm615_vm0, %v2898_v10  ;;  %2481 = vmatprep.mubr.msk.bf16.mxu0 %vm615_vm0, %v2903_v11  ;;  %v2960_v25 = vld [vmem:[%s2870_s14 + $0x40] sm:$0xff]   ;;  %v2974_v26 = vld [vmem:[%s2876_s17 + $0x38] sm:$0xff]   ;;  %v2983_v32 = vld [vmem:[%s2969_s11 + $0x8] sm:$0xff]  }
  0x17   : > { %2511 = vmatprep.subr.bf16.mxu0 %v2692_v15  ;;  %v2977_v27 = vld [vmem:[%s2876_s17 + $0x40] sm:$0xff]   ;;  %v2993_v36 = vld [vmem:[%s2870_s14 + $0x48] sm:$0xff]   ;;  %v420_v38 = vunpack.c.l.bf16 %v2983_v32  ;;  %v3002_v40 = vld [vmem:[%s2870_s14 + $0x50] sm:$0xff]   ;;  %v421_v41 = vunpack.c.h.bf16 %v2983_v32 }
  0x18   : > { %2440 = vmatpush3.bf16.msra.mxu1 %v2690_v12  ;;  %v381_v29 = vld [vmem:[%s339_s7] sm:$0x7]  ;;  %v3009_v43 = vld [vmem:[%s2876_s17 + $0x48] sm:$0xff]   ;;  %v3015_v47 = vld [vmem:[%s2876_s17 + $0x50] sm:$0xff]  }
  0x19   : > { %2512 = vmatpush3.bf16.msra.mxu0 %v2692_v15  ;;  %v2980_v30 = vld [vmem:[%s2969_s11] sm:$0xff]   ;;  %v2988_v34 = vrot.slane %v381_v29, %v452_v28  ;;  %v2995_v37 = vrot.slane %v381_v29, %v1160_v31  ;;  %v3018_v49 = vrot.slane %v381_v29, %v1630_v35  ;;  %v3036_v61 = vld [vmem:[%s2870_s14 + $0x58] sm:$0xff]   ;;  %v1131_v15 = vunpack.c.h.bf16 %v2898_v10 }
  0x1a   : > { %v418_v33 = vunpack.c.l.bf16 %v2980_v30  ;;  %v419_v44 = vunpack.c.h.bf16 %v2980_v30  ;;  %v3042_v0 = vld [vmem:[%s2870_s14 + $0x60] sm:$0xff]   ;;  %v3049_v4 = vld [vmem:[%s2876_s17 + $0x58] sm:$0xff]   ;;  %v1133_v28 = vunpack.c.h.bf16 %v2911_v13  ;;  %v1134_v29 = vunpack.c.l.bf16 %v2922_v16 }
  0x1b   : > { %2410 = vmatmul.mubr.msk.bf16.gmra.mrb[4].mxu1 %vm615_vm0, %v2911_v13  ;;  %v456_v51 = vmul.f32 %v2988_v34, %v420_v38  ;;  %v1164_v52 = vmul.f32 %v2995_v37, %v1128_v39  ;;  %v457_v54 = vmul.f32 %v2988_v34, %v421_v41  ;;  %v1165_v55 = vmul.f32 %v2995_v37, %v1129_v42  ;;  %v3053_v8 = vld [vmem:[%s2876_s17 + $0x60] sm:$0xff]   ;;  %v3079_v39 = vld [vmem:[%s2870_s14 + $0x68] sm:$0xff]  }
  0x1c   : > { %2413 = vmatprep.mubr.msk.bf16.mxu1 %vm615_vm0, %v2922_v16  ;;  %2482 = vmatmul.mubr.msk.bf16.gmra.mrb[4].mxu0 %vm615_vm0, %v2914_v14  ;;  %v454_v48 = vmul.f32 %v2988_v34, %v418_v33  ;;  %v455_v57 = vmul.f32 %v2988_v34, %v419_v44  ;;  %v1162_v58 = vmul.f32 %v2995_v37, %v1126_v45  ;;  %v1600_v10 = vunpack.c.l.bf16 %v2903_v11 }
  0x1d   : > { %2485 = vmatprep.mubr.msk.bf16.mxu0 %vm615_vm0, %v2927_v17  ;;  %v1163_v59 = vmul.f32 %v2995_v37, %v1127_v46  ;;  %v1196_v62 = vadd.f32 %v1164_v52, %v456_v51  ;;  %v1634_v63 = vmul.f32 %v3018_v49, %v1598_v53  ;;  %v1632_v1 = vmul.f32 %v3018_v49, %v1596_v50  ;;  %v3104_v52 = vld [vmem:[%s2876_s17 + $0x68] sm:$0xff]  }
  0x1e   : > { %v1197_v2 = vadd.f32 %v1165_v55, %v457_v54  ;;  %v1635_v3 = vmul.f32 %v3018_v49, %v1599_v56  ;;  %v1194_v5 = vadd.f32 %v1162_v58, %v454_v48  ;;  %v1633_v7 = vmul.f32 %v3018_v49, %v1597_v60  ;;  %v3110_v56 = vld [vmem:[%s2876_s17 + $0x70] sm:$0xff]  }
  0x1f   : > { %v1195_v6 = vadd.f32 %v1163_v59, %v455_v57  ;;  %v3056_v12 = vadd.f32 %v1634_v63, %v1196_v62  ;;  %v3071_v35 = vmul.f32 %v2995_v37, %v1130_v9  ;;  %v1601_v38 = vunpack.c.h.bf16 %v2903_v11  ;;  %v3113_v57 = vld [vmem:[%s2969_s11 + $0x10] sm:$0xff]  }
  0x20   : > { %v3060_v23 = vadd.f32 %v1635_v3, %v1197_v2  ;;  %v3064_v31 = vadd.f32 %v1632_v1, %v1194_v5  ;;  %v1135_v13 = vunpack.c.h.bf16 %v2922_v16  ;;  %v1167_v41 = vmul.f32 %v2995_v37, %v1131_v15  ;;  %v3090_v16 = vld [vmem:[%s2870_s14 + $0x70] sm:$0xff]  }
  0x21   : > { %v3066_v33 = vadd.f32 %v1633_v7, %v1195_v6  ;;  %v3083_v42 = vmul.f32 %v2995_v37, %v1132_v22  ;;  %v3095_v48 = vmul.f32 %v2995_v37, %v1133_v28  ;;  %v3098_v50 = vmul.f32 %v2995_v37, %v1134_v29  ;;  %v3147_v28 = vld [vmem:[%s2870_s14 + $0x78] sm:$0xff]  }
  0x22   : > { %v1136_v53 = vunpack.c.l.bf16 %v2934_v18  ;;  %v1137_v54 = vunpack.c.h.bf16 %v2934_v18  ;;  %v1138_v55 = vunpack.c.l.bf16 %v2939_v19  ;;  %v3116_v58 = vmul.f32 %v2995_v37, %v1135_v13  ;;  %v3150_v29 = vld [vmem:[%s2969_s11 + $0x18] sm:$0xff]  }
  0x23   : > { %2414 = vmatmul.mubr.msk.bf16.gmra.mrb[8].mxu1 %vm615_vm0, %v2934_v18  ;;  %v1139_v60 = vunpack.c.h.bf16 %v2939_v19  ;;  %v1140_v63 = vunpack.c.l.bf16 %v2955_v24  ;;  %v1141_v18 = vunpack.c.h.bf16 %v2955_v24  ;;  %v1142_v1 = vunpack.c.l.bf16 %v2960_v25 }
  0x24   : > { %2417 = vmatprep.mubr.msk.bf16.mxu1 %vm615_vm0, %v2939_v19  ;;  %2486 = vmatmul.mubr.msk.bf16.gmra.mrb[8].mxu0 %vm615_vm0, %v2944_v20  ;;  %v422_v2 = vunpack.c.l.bf16 %v3113_v57  ;;  %v423_v3 = vunpack.c.h.bf16 %v3113_v57  ;;  %v3127_v5 = vmul.f32 %v2995_v37, %v1136_v53  ;;  %v3130_v6 = vmul.f32 %v2995_v37, %v1137_v54 }
  0x25   : > { %2489 = vmatprep.mubr.msk.bf16.mxu0 %vm615_vm0, %v2947_v21  ;;  %v3134_v7 = vmul.f32 %v2995_v37, %v1138_v55  ;;  %v3153_v13 = vmul.f32 %v2995_v37, %v1140_v63  ;;  %v3156_v53 = vmul.f32 %v2995_v37, %v1141_v18  ;;  %v1143_v55 = vunpack.c.h.bf16 %v2960_v25  ;;  %v3172_v63 = vld [vmem:[%s2876_s17 + $0x78] sm:$0xff]  }
  0x26   : > { %v3166_v22 = vmul.f32 %v2995_v37, %v1142_v1  ;;  %v458_v18 = vmul.f32 %v2988_v34, %v422_v2  ;;  %v459_v54 = vmul.f32 %v2988_v34, %v423_v3  ;;  %v424_v9 = vunpack.c.l.bf16 %v3150_v29 }
  0x27   : > { %v425_v19 = vunpack.c.h.bf16 %v3150_v29  ;;  %v1144_v1 = vunpack.c.l.bf16 %v2993_v36  ;;  %v3183_v46 = vmul.f32 %v2995_v37, %v1143_v55  ;;  %v1145_v59 = vunpack.c.h.bf16 %v2993_v36 }
  0x28   : > { %v1696_v2 = vpack.c.bf16 %v3066_v33, %v3064_v31  ;;  %v1198_v3 = vadd.f32 %v3071_v35, %v458_v18  ;;  %v1636_v51 = vmul.f32 %v3018_v49, %v1600_v10  ;;  %v1637_v45 = vmul.f32 %v3018_v49, %v1601_v38  ;;  %v3210_v38 = vld [vmem:[%s2969_s11 + $0x28] sm:$0xff]  }
  0x29   : > { %v461_v31 = vmul.f32 %v2988_v34, %v425_v19  ;;  %v3202_v33 = vmul.f32 %v2995_v37, %v1144_v1  ;;  %v1146_v35 = vunpack.c.l.bf16 %v3002_v40  ;;  %v3226_v1 = vld [vmem:[%s2969_s11 + $0x30] sm:$0xff]   ;;  %v3544_v55 = vunpack.c.l.bf16 %v2927_v17 }
  0x2a   : > { %v1668_v19 = vadd.f32 %v1636_v51, %v1198_v3 }
  0x2b   : > { %2418 = vmatmul.mubr.msk.bf16.gmra.mrb[12].mxu1 %vm615_vm0, %v2955_v24  ;;  %v3139_v24 = vmul.f32 %v2995_v37, %v1139_v60  ;;  %v3163_v60 = vld [vmem:[%s2969_s11 + $0x20] sm:$0xff]   ;;  %v1201_v44 = vadd.f32 %v3095_v48, %v461_v31  ;;  %v1157_v48 = vunpack.c.h.bf16 %v3147_v28  ;;  %v3245_v31 = vmul.f32 %v2995_v37, %v1146_v35 }
  0x2c   : > { %2421 = vmatprep.mubr.msk.bf16.mxu1 %vm615_vm0, %v2960_v25  ;;  %2490 = vmatmul.mubr.msk.bf16.gmra.mrb[12].mxu0 %vm615_vm0, %v2974_v26  ;;  %v426_v62 = vunpack.c.l.bf16 %v3163_v60  ;;  %v427_v15 = vunpack.c.h.bf16 %v3163_v60  ;;  %v1199_v25 = vadd.f32 %v1167_v41, %v459_v54  ;;  %v3213_v41 = vmul.f32 %v2995_v37, %v1145_v59 }
  0x2d   : > { %2493 = vmatprep.mubr.msk.bf16.mxu0 %vm615_vm0, %v2977_v27  ;;  %v1627_v35 = vunpack.c.h.bf16 %v3172_v63 }
  0x2e   : > { %v462_v11 = vmul.f32 %v2988_v34, %v426_v62  ;;  %v463_v10 = vmul.f32 %v2988_v34, %v427_v15  ;;  %v1669_v54 = vadd.f32 %v1637_v45, %v1199_v25  ;;  %v3543_v15 = vunpack.c.h.bf16 %v2914_v14 }
  0x2f   : > { %v428_v45 = vunpack.c.l.bf16 %v3210_v38 }
  0x30   : > { %v1639_v18 = vmul.f32 %v3018_v49, %v3543_v15  ;;  %v1202_v51 = vadd.f32 %v3098_v50, %v462_v11  ;;  %v1203_v25 = vadd.f32 %v3116_v58, %v463_v10  ;;  %v1698_v58 = vpack.c.bf16 %v1669_v54, %v1668_v19 }
  0x31   : > { %v1626_v11 = vunpack.c.l.bf16 %v3172_v63 }
  0x32   : > { %v1671_v15 = vadd.f32 %v1639_v18, %v1201_v44  ;;  %v3546_v44 = vpack.c.bf16 %v3060_v23, %v3056_v12  ;;  %v3548_v23 = vunpack.c.h.bf16 %v2944_v20 }
  0x33   : > { %2422 = vmatmul.mubr.msk.bf16.gmra.mrb[16].mxu1 %vm615_vm0, %v2993_v36  ;;  %v460_v36 = vmul.f32 %v2988_v34, %v424_v9  ;;  %v1147_v9 = vunpack.c.h.bf16 %v3002_v40 }
  0x34   : > { %2425 = vmatprep.mubr.msk.bf16.mxu1 %vm615_vm0, %v3002_v40  ;;  %2494 = vmatmul.mubr.msk.bf16.gmra.mrb[16].mxu0 %vm615_vm0, %v3009_v43 }
  0x35   : > { %2497 = vmatprep.mubr.msk.bf16.mxu0 %vm615_vm0, %v3015_v47  ;;  %v1200_v59 = vadd.f32 %v3083_v42, %v460_v36  ;;  %v1156_v42 = vunpack.c.l.bf16 %v3147_v28  ;;  %v430_v36 = vunpack.c.l.bf16 %v3226_v1 }
  0x3b   : > { %2426 = vmatmul.mubr.msk.bf16.gmra.mrb[20].mxu1 %vm615_vm0, %v3036_v61 }
  0x3c   : > { %2429 = vmatprep.mubr.msk.bf16.mxu1 %vm615_vm0, %v3042_v0  ;;  %2498 = vmatmul.mubr.msk.bf16.gmra.mrb[20].mxu0 %vm615_vm0, %v3049_v4 }
  0x3d   : > { %2501 = vmatprep.mubr.msk.bf16.mxu0 %vm615_vm0, %v3053_v8 }
  0x43   : > { %2430 = vmatmul.mubr.msk.bf16.gmra.mrb[24].mxu1 %vm615_vm0, %v3079_v39 }
  0x44   : > { %2433 = vmatprep.mubr.msk.bf16.mxu1 %vm615_vm0, %v3090_v16  ;;  %2502 = vmatmul.mubr.msk.bf16.gmra.mrb[24].mxu0 %vm615_vm0, %v3104_v52 }
  0x45   : > { %2505 = vmatprep.mubr.msk.bf16.mxu0 %vm615_vm0, %v3110_v56 }
  0x4b   : > { %2434 = vmatmul.mubr.msk.bf16.gmra.mrb[28].mxu1 %vm615_vm0, %v3147_v28  ;;  %v464_v28 = vmul.f32 %v2988_v34, %v428_v45 }
  0x4c   : > { %2441 = vmatprep.mubr.msk.bf16.mxu1 %vm615_vm0, %v2980_v30  ;;  %2506 = vmatmul.mubr.msk.bf16.gmra.mrb[28].mxu0 %vm615_vm0, %v3172_v63  ;;  %v3542_v30 = vunpack.c.l.bf16 %v2914_v14  ;;  %v3545_v14 = vunpack.c.h.bf16 %v2927_v17  ;;  %v1192_v17 = vmul.f32 %v2995_v37, %v1156_v42 }
  0x4d   : > { %2513 = vmatprep.mubr.msk.bf16.mxu0 %vm615_vm0, %v1696_v2  ;;  %v1640_v2 = vmul.f32 %v3018_v49, %v3544_v55  ;;  %v431_v55 = vunpack.c.h.bf16 %v3226_v1  ;;  %v1204_v45 = vadd.f32 %v3127_v5, %v464_v28 }
  0x4e   : > { %v1638_v62 = vmul.f32 %v3018_v49, %v3542_v30  ;;  %v1641_v3 = vmul.f32 %v3018_v49, %v3545_v14  ;;  %v429_v30 = vunpack.c.h.bf16 %v3210_v38  ;;  %v3254_v14 = vld [vmem:[%s2969_s11 + $0x38] sm:$0xff]  }
  0x4f   : > { %v1672_v50 = vadd.f32 %v1640_v2, %v1202_v51  ;;  %v467_v63 = vmul.f32 %v2988_v34, %v431_v55  ;;  %v433_v18 = vunpack.c.h.bf16 %v3254_v14  ;;  %v3547_v51 = vunpack.c.l.bf16 %v2944_v20 }
  0x50   : > { %v1670_v10 = vadd.f32 %v1638_v62, %v1200_v59  ;;  %v1673_v19 = vadd.f32 %v1641_v3, %v1203_v25  ;;  %v465_v54 = vmul.f32 %v2988_v34, %v429_v30  ;;  %v466_v62 = vmul.f32 %v2988_v34, %v430_v36  ;;  %v3272_v59 = vld [vmem:[%s2969_s11 + $0x78] sm:$0xff]   ;;  %v3282_v3 = vld [vmem:[%s2969_s11 + $0x40] sm:$0xff]  }
  0x51   : > { %v1642_v12 = vmul.f32 %v3018_v49, %v3547_v51  ;;  %v1643_v25 = vmul.f32 %v3018_v49, %v3548_v23  ;;  %v3550_v55 = vunpack.c.h.bf16 %v2947_v21  ;;  %v448_v20 = vunpack.c.l.bf16 %v3272_v59  ;;  %v3316_v51 = vld [vmem:[%s2969_s11 + $0x48] sm:$0xff]  }
  0x52   : > { %v1699_v2 = vpack.c.bf16 %v1671_v15, %v1670_v10  ;;  %v1700_v30 = vpack.c.bf16 %v1673_v19, %v1672_v50  ;;  %v1205_v42 = vadd.f32 %v3130_v6, %v465_v54  ;;  %v1207_v10 = vadd.f32 %v3139_v24, %v467_v63 }
  0x53   : > { %2442 = vmatmul.mubr.msk.bf16.vlgmr.msra.gmra.mrb[0].mxu1 %vm615_vm0, %v2983_v32  ;;  %v1193_v32 = vmul.f32 %v2995_v37, %v1157_v48  ;;  %v3549_v48 = vunpack.c.l.bf16 %v2947_v21  ;;  %v1645_v5 = vmul.f32 %v3018_v49, %v3550_v55  ;;  %v449_v15 = vunpack.c.h.bf16 %v3272_v59 }
  0x54   : > { %2445 = vmatprep.mubr.msk.bf16.mxu1 %vm615_vm0, %v3113_v57  ;;  %2514 = vmatmul.mubr.msk.bf16.vlgmr.msra.gmra.mrb[0].mxu0 %vm615_vm0, %v3546_v44  ;;  %v432_v57 = vunpack.c.l.bf16 %v3254_v14  ;;  %v469_v6 = vmul.f32 %v2988_v34, %v433_v18  ;;  %v434_v28 = vunpack.c.l.bf16 %v3282_v3  ;;  %v435_v19 = vunpack.c.h.bf16 %v3282_v3 }
  0x55   : > { %2517 = vmatprep.mubr.msk.bf16.mxu0 %vm615_vm0, %v1698_v58  ;;  %v1644_v36 = vmul.f32 %v3018_v49, %v3549_v48  ;;  %v1206_v58 = vadd.f32 %v3134_v7, %v466_v62  ;;  %v484_v21 = vmul.f32 %v2988_v34, %v448_v20  ;;  %v485_v7 = vmul.f32 %v2988_v34, %v449_v15 }
  0x56   : > { %v468_v50 = vmul.f32 %v2988_v34, %v432_v57  ;;  %v1662_v24 = vmul.f32 %v3018_v49, %v1626_v11  ;;  %v1663_v54 = vmul.f32 %v3018_v49, %v1627_v35  ;;  %v1148_v44 = vunpack.c.l.bf16 %v3036_v61 }
  0x57   : > { %v1674_v62 = vadd.f32 %v1642_v12, %v1204_v45  ;;  %v1675_v63 = vadd.f32 %v1643_v25, %v1205_v42  ;;  %v3552_v18 = vunpack.c.h.bf16 %v2974_v26  ;;  %v1224_v35 = vadd.f32 %v1192_v17, %v484_v21  ;;  %v3322_v12 = vld [vmem:[%s2969_s11 + $0x50] sm:$0xff]  }
  0x58   : > { %v1225_v23 = vadd.f32 %v1193_v32, %v485_v7  ;;  %v1676_v48 = vadd.f32 %v1644_v36, %v1206_v58  ;;  %v470_v45 = vmul.f32 %v2988_v34, %v434_v28  ;;  %v1208_v25 = vadd.f32 %v3153_v13, %v468_v50 }
  0x59   : > { %v1647_v11 = vmul.f32 %v3018_v49, %v3552_v18  ;;  %v3326_v42 = vadd.f32 %v1662_v24, %v1224_v35  ;;  %v1701_v17 = vpack.c.bf16 %v1675_v63, %v1674_v62  ;;  %v436_v32 = vunpack.c.l.bf16 %v3316_v51 }
  0x5a   : > { %v3328_v55 = vadd.f32 %v1663_v54, %v1225_v23  ;;  %v3553_v36 = vunpack.c.l.bf16 %v2977_v27  ;;  %v438_v58 = vunpack.c.l.bf16 %v3322_v12  ;;  %v1210_v20 = vadd.f32 %v3166_v22, %v470_v45  ;;  %v3362_v54 = vld [vmem:[%s2969_s11 + $0x58] sm:$0xff]  }
  0x5b   : > { %2446 = vmatmul.mubr.msk.bf16.gmra.mrb[4].mxu1 %vm615_vm0, %v3150_v29  ;;  %v3551_v29 = vunpack.c.l.bf16 %v2974_v26  ;;  %v1209_v26 = vadd.f32 %v3156_v53, %v469_v6  ;;  %v3554_v50 = vunpack.c.h.bf16 %v2977_v27  ;;  %v1183_v28 = vmul.f32 %v2995_v37, %v1147_v9 }
  0x5c   : > { %2449 = vmatprep.mubr.msk.bf16.mxu1 %vm615_vm0, %v3163_v60  ;;  %2518 = vmatmul.mubr.msk.bf16.gmra.mrb[4].mxu0 %vm615_vm0, %v1699_v2  ;;  %v1677_v60 = vadd.f32 %v1645_v5, %v1207_v10  ;;  %v471_v2 = vmul.f32 %v2988_v34, %v435_v19  ;;  %v1648_v5 = vmul.f32 %v3018_v49, %v3553_v36  ;;  %v439_v10 = vunpack.c.h.bf16 %v3322_v12 }
  0x5d   : > { %v1646_v57 = vmul.f32 %v3018_v49, %v3551_v29  ;;  %2521 = vmatprep.mubr.msk.bf16.mxu0 %vm615_vm0, %v1700_v30  ;;  %v437_v30 = vunpack.c.h.bf16 %v3316_v51  ;;  %v1711_v13 = vpack.c.bf16 %v3328_v55, %v3326_v42  ;;  %v1649_v6 = vmul.f32 %v3018_v49, %v3554_v50 }
  0x5e   : > { %v1702_v53 = vpack.c.bf16 %v1677_v60, %v1676_v48  ;;  %v1211_v15 = vadd.f32 %v3183_v46, %v471_v2  ;;  %v1149_v19 = vunpack.c.h.bf16 %v3036_v61  ;;  %v1679_v7 = vadd.f32 %v1647_v11, %v1209_v26  ;;  %v3373_v11 = vld [vmem:[%s2969_s11 + $0x60] sm:$0xff]  }
  0x5f   : > { %v1678_v21 = vadd.f32 %v1646_v57, %v1208_v25  ;;  %v1618_v22 = vunpack.c.l.bf16 %v3049_v4  ;;  %v1619_v46 = vunpack.c.h.bf16 %v3049_v4  ;;  %v472_v27 = vmul.f32 %v2988_v34, %v436_v32 }
  0x60   : > { %v473_v40 = vmul.f32 %v2988_v34, %v437_v30  ;;  %v1184_v9 = vmul.f32 %v2995_v37, %v1148_v44  ;;  %v1150_v61 = vunpack.c.l.bf16 %v3042_v0  ;;  %v475_v24 = vmul.f32 %v2988_v34, %v439_v10 }
  0x61   : > { %v1151_v4 = vunpack.c.h.bf16 %v3042_v0  ;;  %v1681_v62 = vadd.f32 %v1649_v6, %v1211_v15  ;;  %v1703_v63 = vpack.c.bf16 %v1679_v7, %v1678_v21  ;;  %v3555_v29 = vunpack.c.l.bf16 %v3009_v43 }
  0x62   : > { %v3556_v57 = vunpack.c.h.bf16 %v3009_v43  ;;  %v1212_v35 = vadd.f32 %v3202_v33, %v472_v27  ;;  %v1213_v23 = vadd.f32 %v3213_v41, %v473_v40  ;;  %v440_v0 = vunpack.c.l.bf16 %v3362_v54 }
  0x63   : > { %2450 = vmatmul.mubr.msk.bf16.gmra.mrb[8].mxu1 %vm615_vm0, %v3210_v38  ;;  %v474_v38 = vmul.f32 %v2988_v34, %v438_v58  ;;  %v1650_v44 = vmul.f32 %v3018_v49, %v3555_v29  ;;  %v441_v48 = vunpack.c.h.bf16 %v3362_v54  ;;  %v1215_v45 = vadd.f32 %v1183_v28, %v475_v24 }
  0x64   : > { %2453 = vmatprep.mubr.msk.bf16.mxu1 %vm615_vm0, %v3226_v1  ;;  %2522 = vmatmul.mubr.msk.bf16.gmra.mrb[8].mxu0 %vm615_vm0, %v1701_v17  ;;  %v1680_v1 = vadd.f32 %v1648_v5, %v1210_v20  ;;  %v1651_v18 = vmul.f32 %v3018_v49, %v3556_v57  ;;  %v3557_v2 = vunpack.c.l.bf16 %v3015_v47  ;;  %v3558_v43 = vunpack.c.h.bf16 %v3015_v47 }
  0x65   : > { %2525 = vmatprep.mubr.msk.bf16.mxu0 %vm615_vm0, %v1702_v53  ;;  %v1214_v60 = vadd.f32 %v3245_v31, %v474_v38  ;;  %v1185_v17 = vmul.f32 %v2995_v37, %v1149_v19  ;;  %v442_v41 = vunpack.c.l.bf16 %v3373_v11  ;;  %v443_v32 = vunpack.c.h.bf16 %v3373_v11  ;;  %v408_v19 = vld [vmem:[%s2969_s11 + $0x68] sm:$0xff]  }
  0x66   : > { %v1652_v25 = vmul.f32 %v3018_v49, %v3557_v2  ;;  %v1653_v26 = vmul.f32 %v3018_v49, %v3558_v43  ;;  %v1704_v33 = vpack.c.bf16 %v1681_v62, %v1680_v1  ;;  %v1186_v30 = vmul.f32 %v2995_v37, %v1150_v61 }
  0x67   : > { %v1187_v31 = vmul.f32 %v2995_v37, %v1151_v4  ;;  %v1620_v36 = vunpack.c.l.bf16 %v3053_v8  ;;  %v1621_v5 = vunpack.c.h.bf16 %v3053_v8  ;;  %v1682_v47 = vadd.f32 %v1650_v44, %v1212_v35 }
  0x68   : > { %v1683_v58 = vadd.f32 %v1651_v18, %v1213_v23  ;;  %v476_v10 = vmul.f32 %v2988_v34, %v440_v0  ;;  %v477_v53 = vmul.f32 %v2988_v34, %v441_v48  ;;  %v1152_v20 = vunpack.c.l.bf16 %v3079_v39 }
  0x69   : > { %v1153_v15 = vunpack.c.h.bf16 %v3079_v39  ;;  %v1684_v8 = vadd.f32 %v1652_v25, %v1214_v60  ;;  %v1685_v50 = vadd.f32 %v1653_v26, %v1215_v45  ;;  %v1155_v6 = vunpack.c.h.bf16 %v3090_v16  ;;  %v410_v39 = vld [vmem:[%s2969_s11 + $0x70] sm:$0xff]  }
  0x6a   : > { %v479_v28 = vmul.f32 %v2988_v34, %v443_v32  ;;  %v1654_v21 = vmul.f32 %v3018_v49, %v1618_v22  ;;  %v1655_v7 = vmul.f32 %v3018_v49, %v1619_v46  ;;  %v1705_v27 = vpack.c.bf16 %v1683_v58, %v1682_v47 }
  0x6b   : > { %2454 = vmatmul.mubr.msk.bf16.gmra.mrb[12].mxu1 %vm615_vm0, %v3254_v14  ;;  %v1154_v14 = vunpack.c.l.bf16 %v3090_v16  ;;  %v1216_v40 = vadd.f32 %v1184_v9, %v476_v10  ;;  %v1217_v61 = vadd.f32 %v1185_v17, %v477_v53  ;;  %v1656_v38 = vmul.f32 %v3018_v49, %v1620_v36  ;;  %v3455_v53 = vld [vmem:[%s3540_s5] ss:$0 sm:$0xff] }
  0x6c   : > { %2457 = vmatprep.mubr.msk.bf16.mxu1 %vm615_vm0, %v3282_v3  ;;  %2526 = vmatmul.mubr.msk.bf16.gmra.mrb[12].mxu0 %vm615_vm0, %v1703_v63  ;;  %v478_v3 = vmul.f32 %v2988_v34, %v442_v41  ;;  %v1706_v24 = vpack.c.bf16 %v1685_v50, %v1684_v8  ;;  %v1657_v16 = vmul.f32 %v3018_v49, %v1621_v5  ;;  %v444_v4 = vunpack.c.l.bf16 %v408_v19 }
  0x6d   : > { %2529 = vmatprep.mubr.msk.bf16.mxu0 %vm615_vm0, %v1704_v33  ;;  %v445_v1 = vunpack.c.h.bf16 %v408_v19  ;;  %v1219_v63 = vadd.f32 %v1187_v31, %v479_v28  ;;  %v446_v29 = vunpack.c.l.bf16 %v410_v39  ;;  %v447_v44 = vunpack.c.h.bf16 %v410_v39 }
  0x6e   : > { %v1218_v62 = vadd.f32 %v1186_v30, %v478_v3  ;;  %v1188_v57 = vmul.f32 %v2995_v37, %v1152_v20  ;;  %v1189_v22 = vmul.f32 %v2995_v37, %v1153_v15  ;;  %v1622_v46 = vunpack.c.l.bf16 %v3104_v52 }
  0x6f   : > { %v1623_v9 = vunpack.c.h.bf16 %v3104_v52  ;;  %v1190_v18 = vmul.f32 %v2995_v37, %v1154_v14  ;;  %v1624_v35 = vunpack.c.l.bf16 %v3110_v56  ;;  %v1686_v23 = vadd.f32 %v1654_v21, %v1216_v40 }
  0x70   : > { %v1687_v0 = vadd.f32 %v1655_v7, %v1217_v61  ;;  %v1191_v48 = vmul.f32 %v2995_v37, %v1155_v6  ;;  %v1625_v60 = vunpack.c.h.bf16 %v3110_v56  ;;  %v480_v52 = vmul.f32 %v2988_v34, %v444_v4 }
  0x71   : > { %v481_v45 = vmul.f32 %v2988_v34, %v445_v1  ;;  %v1689_v2 = vadd.f32 %v1657_v16, %v1219_v63  ;;  %v482_v25 = vmul.f32 %v2988_v34, %v446_v29  ;;  %v1658_v26 = vmul.f32 %v3018_v49, %v1622_v46 }
  0x72   : > { %v1707_v43 = vpack.c.bf16 %v1687_v0, %v1686_v23  ;;  %v1220_v37 = vadd.f32 %v1188_v57, %v480_v52  ;;  %v1659_v56 = vmul.f32 %v3018_v49, %v1623_v9  ;;  %v1660_v33 = vmul.f32 %v3018_v49, %v1624_v35 }
  0x73   : > { %2458 = vmatmul.mubr.msk.bf16.gmra.mrb[16].mxu1 %vm615_vm0, %v3316_v51  ;;  %v1688_v51 = vadd.f32 %v1656_v38, %v1218_v62  ;;  %v1221_v17 = vadd.f32 %v1189_v22, %v481_v45  ;;  %v1222_v32 = vadd.f32 %v1190_v18, %v482_v25  ;;  %v1661_v31 = vmul.f32 %v3018_v49, %v1625_v60 }
  0x74   : > { %2461 = vmatprep.mubr.msk.bf16.mxu1 %vm615_vm0, %v3322_v12  ;;  %2530 = vmatmul.mubr.msk.bf16.gmra.mrb[16].mxu0 %vm615_vm0, %v1705_v27  ;;  %v483_v12 = vmul.f32 %v2988_v34, %v447_v44  ;;  %v1690_v34 = vadd.f32 %v1658_v26, %v1220_v37 }
  0x75   : > { %2533 = vmatprep.mubr.msk.bf16.mxu0 %vm615_vm0, %v1706_v24  ;;  %v1708_v41 = vpack.c.bf16 %v1689_v2, %v1688_v51  ;;  %v1691_v36 = vadd.f32 %v1659_v56, %v1221_v17  ;;  %v1692_v5 = vadd.f32 %v1660_v33, %v1222_v32 }
  0x76   : > { %v1223_v30 = vadd.f32 %v1191_v48, %v483_v12 }
  0x77   : > { %v1709_v58 = vpack.c.bf16 %v1691_v36, %v1690_v34 }
  0x78   : > { %v1693_v47 = vadd.f32 %v1661_v31, %v1223_v30 }
  0x7a   : > { %v1710_v10 = vpack.c.bf16 %v1693_v47, %v1692_v5 }
  0x7b   : > { %2462 = vmatmul.mubr.msk.bf16.gmra.mrb[20].mxu1 %vm615_vm0, %v3362_v54 }
  0x7c   : > { %2465 = vmatprep.mubr.msk.bf16.mxu1 %vm615_vm0, %v3373_v11  ;;  %2534 = vmatmul.mubr.msk.bf16.gmra.mrb[20].mxu0 %vm615_vm0, %v1707_v43 }
  0x7d   : > { %2537 = vmatprep.mubr.msk.bf16.mxu0 %vm615_vm0, %v1708_v41 }
  0x83   : > { %2466 = vmatmul.mubr.msk.bf16.gmra.mrb[24].mxu1 %vm615_vm0, %v408_v19 }
  0x84   : > { %2469 = vmatprep.mubr.msk.bf16.mxu1 %vm615_vm0, %v410_v39  ;;  %2538 = vmatmul.mubr.msk.bf16.gmra.mrb[24].mxu0 %vm615_vm0, %v1709_v58 }
  0x85   : > { %2541 = vmatprep.mubr.msk.bf16.mxu0 %vm615_vm0, %v1710_v10 }
  0x8b   : > { %2470 = vmatmul.mubr.msk.bf16.gmra.mrb[28].mxu1 %vm615_vm0, %v3272_v59 }
  0x8c   : > { %2542 = vmatmul.mubr.msk.bf16.gmra.mrb[28].mxu0 %vm615_vm0, %v1711_v13 }
 0x126   : > { %v2443_v49 = vpop.f32.mrb[0].mxu1 }
 0x127   : > { %v999_v54 = vpop.f32.mrb[1].mxu1  ;;  %v2515_v11 = vpop.f32.mrb[0].mxu0 }
 0x128   : > { %v2444_v20 = vpop.f32.mrb[2].mxu1  ;;  %v2545_v15 = vadd.f32 %v2515_v11, %v2443_v49  ;;  %v1811_v8 = vpop.f32.mrb[1].mxu0 }
 0x129   : > { %v1002_v50 = vpop.f32.mrb[3].mxu1  ;;  %v2546_v59 = vadd.f32 %v1811_v8, %v999_v54  ;;  %v2516_v42 = vpop.f32.mrb[2].mxu0 }
 0x12a   : > { %v1979_v55 = vadd.f32 %v2545_v15, %v3455_v53  ;;  %v2547_v13 = vadd.f32 %v2516_v42, %v2444_v20  ;;  %v1814_v14 = vpop.f32.mrb[3].mxu0 }
 0x12b   : > { %v1977_v6 = vadd.f32 %v2546_v59, %v3455_v53  ;;  %v2548_v3 = vadd.f32 %v1814_v14, %v1002_v50 }
 0x12c   : > { %2011 = vst [vmem:[%s3460_s16 + $0x10] sm:$0xff] %v1979_v55  ;;  %v1980_v28 = vadd.f32 %v2547_v13, %v3455_v53 }
 0x12d   : > { %2009 = vst [vmem:[%s3460_s16] sm:$0xff] %v1977_v6  ;;  %v1978_v19 = vadd.f32 %v2548_v3, %v3455_v53 }
 0x12e   : > { %v2447_v21 = vpop.f32.mrb[4].mxu1  ;;  %2012 = vst [vmem:[%s3460_s16 + $0x18] sm:$0xff] %v1980_v28 }
 0x12f   : > { %v1015_v7 = vpop.f32.mrb[5].mxu1  ;;  %2010 = vst [vmem:[%s3460_s16 + $0x8] sm:$0xff] %v1978_v19  ;;  %v2519_v39 = vpop.f32.mrb[4].mxu0 }
 0x130   : > { %v2448_v27 = vpop.f32.mrb[6].mxu1  ;;  %v2549_v40 = vadd.f32 %v2519_v39, %v2447_v21  ;;  %v1827_v61 = vpop.f32.mrb[5].mxu0 }
 0x131   : > { %v1018_v38 = vpop.f32.mrb[7].mxu1  ;;  %v2550_v24 = vadd.f32 %v1827_v61, %v1015_v7  ;;  %v2520_v16 = vpop.f32.mrb[6].mxu0 }
 0x132   : > { %v1983_v4 = vadd.f32 %v2549_v40, %v3455_v53  ;;  %v2551_v1 = vadd.f32 %v2520_v16, %v2448_v27  ;;  %v1830_v62 = vpop.f32.mrb[7].mxu0 }
 0x133   : > { %v1981_v63 = vadd.f32 %v2550_v24, %v3455_v53  ;;  %v2552_v29 = vadd.f32 %v1830_v62, %v1018_v38 }
 0x134   : > { %2015 = vst [vmem:[%s3460_s16 + $0x30] sm:$0xff] %v1983_v4  ;;  %v1984_v44 = vadd.f32 %v2551_v1, %v3455_v53 }
 0x135   : > { %2013 = vst [vmem:[%s3460_s16 + $0x20] sm:$0xff] %v1981_v63  ;;  %v1982_v57 = vadd.f32 %v2552_v29, %v3455_v53 }
 0x136   : > { %v2451_v22 = vpop.f32.mrb[8].mxu1  ;;  %2016 = vst [vmem:[%s3460_s16 + $0x38] sm:$0xff] %v1984_v44 }
 0x137   : > { %v1031_v46 = vpop.f32.mrb[9].mxu1  ;;  %2014 = vst [vmem:[%s3460_s16 + $0x28] sm:$0xff] %v1982_v57  ;;  %v2523_v9 = vpop.f32.mrb[8].mxu0 }
 0x138   : > { %v2452_v18 = vpop.f32.mrb[10].mxu1  ;;  %v2553_v35 = vadd.f32 %v2523_v9, %v2451_v22  ;;  %v1843_v23 = vpop.f32.mrb[9].mxu0 }
 0x139   : > { %v1034_v0 = vpop.f32.mrb[11].mxu1  ;;  %v2554_v48 = vadd.f32 %v1843_v23, %v1031_v46  ;;  %v2524_v60 = vpop.f32.mrb[10].mxu0 }
 0x13a   : > { %v1987_v52 = vadd.f32 %v2553_v35, %v3455_v53  ;;  %v2555_v45 = vadd.f32 %v2524_v60, %v2452_v18  ;;  %v1846_v51 = vpop.f32.mrb[11].mxu0 }
 0x13b   : > { %v1985_v2 = vadd.f32 %v2554_v48, %v3455_v53  ;;  %v2556_v25 = vadd.f32 %v1846_v51, %v1034_v0 }
 0x13c   : > { %2019 = vst [vmem:[%s3460_s16 + $0x50] sm:$0xff] %v1987_v52  ;;  %v1988_v12 = vadd.f32 %v2555_v45, %v3455_v53 }
 0x13d   : > { %2017 = vst [vmem:[%s3460_s16 + $0x40] sm:$0xff] %v1985_v2  ;;  %v1986_v43 = vadd.f32 %v2556_v25, %v3455_v53 }
 0x13e   : > { %v2455_v26 = vpop.f32.mrb[12].mxu1  ;;  %2020 = vst [vmem:[%s3460_s16 + $0x58] sm:$0xff] %v1988_v12 }
 0x13f   : > { %v1047_v37 = vpop.f32.mrb[13].mxu1  ;;  %2018 = vst [vmem:[%s3460_s16 + $0x48] sm:$0xff] %v1986_v43  ;;  %v2527_v17 = vpop.f32.mrb[12].mxu0 }
 0x140   : > { %v2456_v56 = vpop.f32.mrb[14].mxu1  ;;  %v2557_v33 = vadd.f32 %v2527_v17, %v2455_v26  ;;  %v1859_v41 = vpop.f32.mrb[13].mxu0 }
 0x141   : > { %v1050_v32 = vpop.f32.mrb[15].mxu1  ;;  %v2558_v30 = vadd.f32 %v1859_v41, %v1047_v37  ;;  %v2528_v31 = vpop.f32.mrb[14].mxu0 }
 0x142   : > { %v1991_v34 = vadd.f32 %v2557_v33, %v3455_v53  ;;  %v2559_v36 = vadd.f32 %v2528_v31, %v2456_v56  ;;  %v1862_v5 = vpop.f32.mrb[15].mxu0 }
 0x143   : > { %v1989_v47 = vadd.f32 %v2558_v30, %v3455_v53  ;;  %v2560_v58 = vadd.f32 %v1862_v5, %v1050_v32 }
 0x144   : > { %2023 = vst [vmem:[%s3460_s16 + $0x70] sm:$0xff] %v1991_v34  ;;  %v1992_v10 = vadd.f32 %v2559_v36, %v3455_v53 }
 0x145   : > { %2021 = vst [vmem:[%s3460_s16 + $0x60] sm:$0xff] %v1989_v47  ;;  %v1990_v49 = vadd.f32 %v2560_v58, %v3455_v53 }
 0x146   : > { %v2459_v54 = vpop.f32.mrb[16].mxu1  ;;  %2024 = vst [vmem:[%s3460_s16 + $0x78] sm:$0xff] %v1992_v10 }
 0x147   : > { %v1063_v11 = vpop.f32.mrb[17].mxu1  ;;  %2022 = vst [vmem:[%s3460_s16 + $0x68] sm:$0xff] %v1990_v49  ;;  %v2531_v20 = vpop.f32.mrb[16].mxu0 }
 0x148   : > { %v2460_v15 = vpop.f32.mrb[18].mxu1  ;;  %v2561_v8 = vadd.f32 %v2531_v20, %v2459_v54  ;;  %v1875_v50 = vpop.f32.mrb[17].mxu0 }
 0x149   : > { %v1066_v59 = vpop.f32.mrb[19].mxu1  ;;  %v2562_v42 = vadd.f32 %v1875_v50, %v1063_v11  ;;  %v2532_v55 = vpop.f32.mrb[18].mxu0 }
 0x14a   : > { %v1995_v13 = vadd.f32 %v2561_v8, %v3455_v53  ;;  %v2563_v14 = vadd.f32 %v2532_v55, %v2460_v15  ;;  %v1878_v6 = vpop.f32.mrb[19].mxu0 }
 0x14b   : > { %v1993_v3 = vadd.f32 %v2562_v42, %v3455_v53  ;;  %v2564_v28 = vadd.f32 %v1878_v6, %v1066_v59 }
 0x14c   : > { %2027 = vst [vmem:[%s3460_s16 + $0x90] sm:$0xff] %v1995_v13  ;;  %v1996_v19 = vadd.f32 %v2563_v14, %v3455_v53 }
 0x14d   : > { %2025 = vst [vmem:[%s3460_s16 + $0x80] sm:$0xff] %v1993_v3  ;;  %v1994_v21 = vadd.f32 %v2564_v28, %v3455_v53 }
 0x14e   : > { %v2463_v7 = vpop.f32.mrb[20].mxu1  ;;  %2028 = vst [vmem:[%s3460_s16 + $0x98] sm:$0xff] %v1996_v19 }
 0x14f   : > { %v1079_v39 = vpop.f32.mrb[21].mxu1  ;;  %2026 = vst [vmem:[%s3460_s16 + $0x88] sm:$0xff] %v1994_v21  ;;  %v2535_v27 = vpop.f32.mrb[20].mxu0 }
 0x150   : > { %v2464_v40 = vpop.f32.mrb[22].mxu1  ;;  %v2565_v61 = vadd.f32 %v2535_v27, %v2463_v7  ;;  %v1891_v38 = vpop.f32.mrb[21].mxu0 }
 0x151   : > { %v1082_v24 = vpop.f32.mrb[23].mxu1  ;;  %v2566_v16 = vadd.f32 %v1891_v38, %v1079_v39  ;;  %v2536_v4 = vpop.f32.mrb[22].mxu0 }
 0x152   : > { %v1999_v1 = vadd.f32 %v2565_v61, %v3455_v53  ;;  %v2567_v62 = vadd.f32 %v2536_v4, %v2464_v40  ;;  %v1894_v63 = vpop.f32.mrb[23].mxu0 }
 0x153   : > { %v1997_v29 = vadd.f32 %v2566_v16, %v3455_v53  ;;  %v2568_v44 = vadd.f32 %v1894_v63, %v1082_v24 }
 0x154   : > { %2031 = vst [vmem:[%s3460_s16 + $0xb0] sm:$0xff] %v1999_v1  ;;  %v2000_v57 = vadd.f32 %v2567_v62, %v3455_v53 }
 0x155   : > { %2029 = vst [vmem:[%s3460_s16 + $0xa0] sm:$0xff] %v1997_v29  ;;  %v1998_v22 = vadd.f32 %v2568_v44, %v3455_v53 }
 0x156   : > { %v2467_v46 = vpop.f32.mrb[24].mxu1  ;;  %2032 = vst [vmem:[%s3460_s16 + $0xb8] sm:$0xff] %v2000_v57 }
 0x157   : > { %v1095_v9 = vpop.f32.mrb[25].mxu1  ;;  %2030 = vst [vmem:[%s3460_s16 + $0xa8] sm:$0xff] %v1998_v22  ;;  %v2539_v18 = vpop.f32.mrb[24].mxu0 }
 0x158   : > { %v2468_v35 = vpop.f32.mrb[26].mxu1  ;;  %v2569_v23 = vadd.f32 %v2539_v18, %v2467_v46  ;;  %v1907_v0 = vpop.f32.mrb[25].mxu0 }
 0x159   : > { %v1098_v48 = vpop.f32.mrb[27].mxu1  ;;  %v2570_v60 = vadd.f32 %v1907_v0, %v1095_v9  ;;  %v2540_v52 = vpop.f32.mrb[26].mxu0 }
 0x15a   : > { %v2003_v45 = vadd.f32 %v2569_v23, %v3455_v53  ;;  %v2571_v51 = vadd.f32 %v2540_v52, %v2468_v35  ;;  %v1910_v2 = vpop.f32.mrb[27].mxu0 }
 0x15b   : > { %v2001_v25 = vadd.f32 %v2570_v60, %v3455_v53  ;;  %v2572_v12 = vadd.f32 %v1910_v2, %v1098_v48 }
 0x15c   : > { %2035 = vst [vmem:[%s3460_s16 + $0xd0] sm:$0xff] %v2003_v45  ;;  %v2004_v43 = vadd.f32 %v2571_v51, %v3455_v53 }
 0x15d   : > { %2033 = vst [vmem:[%s3460_s16 + $0xc0] sm:$0xff] %v2001_v25  ;;  %v2002_v26 = vadd.f32 %v2572_v12, %v3455_v53 }
 0x15e   : > { %v2471_v37 = vpop.f32.mrb[28].mxu1  ;;  %2036 = vst [vmem:[%s3460_s16 + $0xd8] sm:$0xff] %v2004_v43 }
 0x15f   : > { %v1111_v17 = vpop.f32.mrb[29].mxu1  ;;  %2034 = vst [vmem:[%s3460_s16 + $0xc8] sm:$0xff] %v2002_v26  ;;  %v2543_v56 = vpop.f32.mrb[28].mxu0 }
 0x160   : > { %v2472_v33 = vpop.f32.mrb[30].mxu1  ;;  %v2573_v41 = vadd.f32 %v2543_v56, %v2471_v37  ;;  %v1923_v32 = vpop.f32.mrb[29].mxu0 }
 0x161   : > { %v1114_v30 = vpop.f32.mrb[31].mxu1  ;;  %v2574_v31 = vadd.f32 %v1923_v32, %v1111_v17  ;;  %v2544_v34 = vpop.f32.mrb[30].mxu0 }
 0x162   : > { %v2007_v36 = vadd.f32 %v2573_v41, %v3455_v53  ;;  %v2575_v5 = vadd.f32 %v2544_v34, %v2472_v33  ;;  %v1926_v47 = vpop.f32.mrb[31].mxu0 }
 0x163   : > { %v2005_v58 = vadd.f32 %v2574_v31, %v3455_v53  ;;  %v2576_v10 = vadd.f32 %v1926_v47, %v1114_v30 }
 0x164   : > { %2039 = vst [vmem:[%s3460_s16 + $0xf0] sm:$0xff] %v2007_v36  ;;  %v2008_v49 = vadd.f32 %v2575_v5, %v3455_v53 }
 0x165   : > { %2037 = vst [vmem:[%s3460_s16 + $0xe0] sm:$0xff] %v2005_v58  ;;  %v2006_v54 = vadd.f32 %v2576_v10, %v3455_v53 }
 0x166   : > { %2040 = vst [vmem:[%s3460_s16 + $0xf8] sm:$0xff] %v2008_v49 }
 0x167   : > { %2038 = vst [vmem:[%s3460_s16 + $0xe8] sm:$0xff] %v2006_v54 }
 0x168 PF: > { %s16_s23 = sadd.s32 1, %s2791_s23   ;;  %s3559_s21 = smov %s2787_s22 }
 0x169   : > { %p13_p5 = scmp.ge.s32.totalorder %s16_s23, 4   ;;  %s3560_s22 = smov %s3562_s24 }
 0x16b   :  { %15 = sbr.rel (!%p13_p5) target bundleno = 2 (0x2), region = 86 }

</bundles_post_ra>
